<compile_context>
chip_gen: v7x
topology: tpu7x:2x2x1
jax: 0.10.0
libtpu: 0.0.40
codegen_flags: <defaults>
</compile_context>

<pallas_src>
import functools

import jax
import jax.numpy as jnp
from jax import lax
from jax.experimental import pallas as pl
from jax.experimental.pallas import tpu as pltpu

LN_EPS = 1e-5  # torch.nn.LayerNorm default eps

# Columns of the packed bias / LayerNorm slab (each column is a vector laid
# out along sublanes so it broadcasts over the lane (= batch) dimension).
_COL_BE0, _COL_LNG, _COL_LNB, _COL_BR0, _COL_BR1, _COL_BL0, _COL_BL1 = range(7)
_VEC_COLS = 8

_FEAT_PAD = 16   # F = 12 padded to an 8-aligned sublane count
_COUT_PAD = 8    # c_out = 4 padded to a full sublane group


def _round_up(x, m):
    return (x + m - 1) // m * m


def _make_weight_layout(hidden):
    """8-aligned row offsets of each (transposed) weight inside the slab."""
    order = (("wmean", _FEAT_PAD), ("wcov", _FEAT_PAD), ("we0", hidden),
             ("wr0", hidden), ("wr1", hidden), ("wl0", hidden),
             ("wl1", _COUT_PAD))
    offs, row = {}, 0
    for name, rows in order:
        offs[name] = row
        row = _round_up(row + rows, 8)
    return offs, row


def _mlp_kernel(decayscale, hidden, offs,
                mean_ref, cov_ref, w_ref, vec_ref, out_ref):
    f32 = jnp.float32
    d_mean = mean_ref.shape[1]   # 3
    d_cov = cov_ref.shape[1]     # 9

    def w(name, rows, cols):
        r0 = offs[name]
        return w_ref[r0:r0 + rows, 0:cols]

    def vcol(j, rows=hidden):
        return vec_ref[0:rows, j:j + 1]

    nt = (((1,), (1,)), ((), ()))   # A @ B^T (contract last dims)

    # Integrated positional encoding, batch on lanes: [16, tn].  Rows 12..15
    # come from zero weight rows -> cos(0)=1 / sin(0)=0 filler that meets zero
    # columns of the packed we0 below, so they contribute nothing.
    mean_proj = lax.dot_general(w("wmean", _FEAT_PAD, d_mean), mean_ref[...],
                                nt, preferred_element_type=f32)        # [16, tn]
    cov_proj = lax.dot_general(w("wcov", _FEAT_PAD, d_cov), cov_ref[...],
                               nt, preferred_element_type=f32)         # [16, tn]
    decay = jnp.exp((-0.5 * decayscale * decayscale) * cov_proj)
    enc = jnp.concatenate([decay * jnp.cos(mean_proj),
                           decay * jnp.sin(mean_proj)], axis=0)        # [32, tn]

    # layers_early: the [cos | sin] concat is just sublane placement here, so
    # a single K=32 matmul covers the whole first Linear.
    x = jnp.dot(w("we0", hidden, 2 * _FEAT_PAD), enc,
                preferred_element_type=f32)
    x = jnp.maximum(x + vcol(_COL_BE0), 0.0)                           # [H, tn]

    # Residual block: x + Linear(ReLU(Linear(LayerNorm(x)))).
    # NOTE: all-zero padded batch columns reach LayerNorm with a nonzero
    # variance in general, and LN_EPS keeps it finite even if not; those
    # columns are sliced away in the wrapper.
    mu = jnp.mean(x, axis=0, keepdims=True)
    var = jnp.mean(jnp.square(x - mu), axis=0, keepdims=True)
    h = (x - mu) * lax.rsqrt(var + LN_EPS) * vcol(_COL_LNG) + vcol(_COL_LNB)
    h = jnp.maximum(
        jnp.dot(w("wr0", hidden, hidden), h, preferred_element_type=f32)
        + vcol(_COL_BR0), 0.0)
    h = jnp.dot(w("wr1", hidden, hidden), h,
                preferred_element_type=f32) + vcol(_COL_BR1)
    x = x + h

    # layers_late; output stays lane-dense [8, tn] (rows 4..7 are zero pad).
    x = jnp.maximum(
        jnp.dot(w("wl0", hidden, hidden), x, preferred_element_type=f32)
        + vcol(_COL_BL0), 0.0)
    out = jnp.dot(w("wl1", _COUT_PAD, hidden), x,
                  preferred_element_type=f32) + vcol(_COL_BL1, _COUT_PAD)
    out_ref[...] = out.astype(out_ref.dtype)


def pack_params(params):
    """Pack per-layer parameters into transposed, 8-row-aligned slabs."""
    f32 = jnp.float32
    fm = jnp.asarray(params["fm"], f32)                  # [3, F]
    feat = fm.shape[1]
    hidden = params["wr0"].shape[0]
    c_out = params["wl1"].shape[1]
    assert feat <= _FEAT_PAD and c_out <= _COUT_PAD

    # fm_outer[3*i+j, f] = fm[i, f] * fm[j, f], so that
    # cov_flat @ fm_outer == (cov @ fm * fm).sum(-2) for any 3x3 cov.
    fm_outer = (fm[:, None, :] * fm[None, :, :]).reshape(9, feat)

    offs, total_rows = _make_weight_layout(hidden)
    lane_w = max(hidden, 2 * _FEAT_PAD)
    w_slab = jnp.zeros((total_rows, lane_w), f32)

    we0 = jnp.asarray(params["we0"], f32)                # [2F, H]
    we0p = jnp.zeros((hidden, 2 * _FEAT_PAD), f32)
    we0p = we0p.at[:, 0:feat].set(we0[:feat].T)                     # cos half
    we0p = we0p.at[:, _FEAT_PAD:_FEAT_PAD + feat].set(we0[feat:].T)  # sin half

    wmean = jnp.zeros((_FEAT_PAD, 3), f32).at[:feat].set(fm.T)
    wcov = jnp.zeros((_FEAT_PAD, 9), f32).at[:feat].set(fm_outer.T)
    wl1p = jnp.zeros((_COUT_PAD, hidden), f32).at[:c_out].set(
        jnp.asarray(params["wl1"], f32).T)

    pieces = {
        "wmean": wmean, "wcov": wcov, "we0": we0p,
        "wr0": jnp.asarray(params["wr0"], f32).T,
        "wr1": jnp.asarray(params["wr1"], f32).T,
        "wl0": jnp.asarray(params["wl0"], f32).T,
        "wl1": wl1p,
    }
    for name, arr in pieces.items():
        r0 = offs[name]
        w_slab = w_slab.at[r0:r0 + arr.shape[0], 0:arr.shape[1]].set(arr)

    def col(name):
        return jnp.asarray(params[name], f32).reshape(-1)

    vec_slab = jnp.zeros((hidden, _VEC_COLS), f32)
    vec_slab = vec_slab.at[:, _COL_BE0].set(col("be0"))
    vec_slab = vec_slab.at[:, _COL_LNG].set(col("lng"))
    vec_slab = vec_slab.at[:, _COL_LNB].set(col("lnb"))
    vec_slab = vec_slab.at[:, _COL_BR0].set(col("br0"))
    vec_slab = vec_slab.at[:, _COL_BR1].set(col("br1"))
    vec_slab = vec_slab.at[:, _COL_BL0].set(col("bl0"))
    vec_slab = vec_slab.at[:c_out, _COL_BL1].set(col("bl1"))

    return w_slab, vec_slab, offs, hidden, c_out


def dreamfields_mlp_pallas(mean, cov, params, decayscale=1.0, tile_n=4096):
    """mean: [N, 3] f32, cov: [N, 3, 3] f32 -> [N, c_out] f32."""
    assert tile_n % 128 == 0, "tile_n must be a multiple of 128 (lane width)"
    n = mean.shape[0]
    w_slab, vec_slab, offs, hidden, c_out = pack_params(params)

    mean32 = mean.astype(jnp.float32)
    cov9 = cov.reshape(n, 9).astype(jnp.float32)   # free reshape, no concat

    n128 = _round_up(max(n, 1), 128)
    eff_tile = min(tile_n, n128)
    if n128 >= 256:
        # Cap the tile so the grid has >= 2 steps: lets a 2-TensorCore chip
        # (v7x) split the batch; costs nothing on 1-TC chips.
        eff_tile = min(eff_tile, _round_up(n128 // 2, 128))
    n_pad = _round_up(n, eff_tile)
    if n_pad != n:
        mean32 = jnp.pad(mean32, ((0, n_pad - n), (0, 0)))
        cov9 = jnp.pad(cov9, ((0, n_pad - n), (0, 0)))

    kernel = functools.partial(_mlp_kernel, float(decayscale), hidden, offs)

    out_t = pl.pallas_call(
        kernel,
        out_shape=jax.ShapeDtypeStruct((_COUT_PAD, n_pad), jnp.float32),
        grid=(n_pad // eff_tile,),
        in_specs=[
            pl.BlockSpec((eff_tile, 3), lambda i: (i, 0)),     # mean tiles
            pl.BlockSpec((eff_tile, 9), lambda i: (i, 0)),     # flattened cov tiles
            pl.BlockSpec(w_slab.shape, lambda i: (0, 0)),      # packed weights
            pl.BlockSpec(vec_slab.shape, lambda i: (0, 0)),    # packed bias / LN columns
        ],
        out_specs=pl.BlockSpec((_COUT_PAD, eff_tile), lambda i: (0, i)),  # lane-dense
        compiler_params=pltpu.CompilerParams(
            dimension_semantics=("parallel",),
            vmem_limit_bytes=32 * 1024 * 1024),
    )(mean32, cov9, w_slab, vec_slab)

    # Lane-dense [8, N_pad] -> conventional [N, c_out].  Skip the transpose if
    # a downstream consumer can take channels-first output.
    return out_t[:c_out, :n].T


def reference_forward(mean, cov, p, decayscale=1.0):
    """Pure-JAX reference matching the PyTorch forward."""
    fm = p["fm"]                                                   # [3, F]
    mean_proj = mean @ fm
    cov_diag_proj = jnp.sum(jnp.einsum("nij,jf->nif", cov, fm) * fm[None], axis=-2)
    decay = jnp.exp(-0.5 * cov_diag_proj * decayscale ** 2)
    x = jnp.concatenate([decay * jnp.cos(mean_proj),
                         decay * jnp.sin(mean_proj)], -1).astype(jnp.float32)
    x = jnp.maximum(x @ p["we0"] + p["be0"], 0.0)
    mu = x.mean(-1, keepdims=True)
    var = ((x - mu) ** 2).mean(-1, keepdims=True)
    h = (x - mu) / jnp.sqrt(var + LN_EPS) * p["lng"] + p["lnb"]
    h = jnp.maximum(h @ p["wr0"] + p["br0"], 0.0)
    h = h @ p["wr1"] + p["br1"]
    x = x + h
    x = jnp.maximum(x @ p["wl0"] + p["bl0"], 0.0)
    return x @ p["wl1"] + p["bl1"]


def make_params(key, max_deg=4, hidden=32, c_out=4):
    # Non-fourfeat feature matrix: 2^arange(max_deg)[:,None,None] * eye(3) -> [3*max_deg, 3]
    feature_matrix = (2.0 ** jnp.arange(max_deg, dtype=jnp.float32))[:, None, None] \
        * jnp.eye(3, dtype=jnp.float32)
    feature_matrix = feature_matrix.reshape(-1, 3)                 # [F, 3]
    fm = feature_matrix.T                                          # [3, F]
    feat = fm.shape[1]
    dim_in = 2 * feat

    def lecun(k, fan_in, fan_out):
        return (jax.random.normal(k, (fan_in, fan_out), jnp.float32)
                / jnp.sqrt(jnp.float32(fan_in)))

    def bias(k, n):
        return 0.1 * jax.random.normal(k, (1, n), jnp.float32)

    ks = jax.random.split(key, 12)
    return {
        "fm": fm,
        # early
        "we0": lecun(ks[0], dim_in, hidden), "be0": bias(ks[1], hidden),
        # residual block layer-norm (elementwise affine)
        "lng": 1.0 + bias(ks[2], hidden), "lnb": bias(ks[3], hidden),
        # residual block linears
        "wr0": lecun(ks[4], hidden, hidden), "br0": bias(ks[5], hidden),
        "wr1": lecun(ks[6], hidden, hidden), "br1": bias(ks[7], hidden),
        # late
        "wl0": lecun(ks[8], hidden, hidden), "bl0": bias(ks[9], hidden),
        "wl1": lecun(ks[10], hidden, c_out), "bl1": bias(ks[11], c_out),
    }


if __name__ == "__main__":
    key = jax.random.PRNGKey(0)
    k_par, k_mean, k_cov = jax.random.split(key, 3)

    # N deliberately not a multiple of the tile: exercises the padded tail and
    # the >=2-step grid cap.
    N = 2000
    params = make_params(k_par, max_deg=4, hidden=32, c_out=4)

    mean = jax.random.uniform(k_mean, (N, 3), jnp.float32, -1.0, 1.0)
    a = jax.random.normal(k_cov, (N, 3, 3), jnp.float32) * 0.1
    cov = jnp.einsum("nij,nkj->nik", a, a)  # symmetric PSD covariances

    out = dreamfields_mlp_pallas(mean, cov, params, decayscale=1.0)
    out = jax.block_until_ready(out)

    ref = reference_forward(mean, cov, params, decayscale=1.0)
    assert out.shape == (N, 4), out.shape
    max_err = float(jnp.max(jnp.abs(out - ref)))
    assert jnp.allclose(out, ref, rtol=2e-4, atol=2e-4), f"max abs err {max_err}"

    print("KERNEL_OK")
</pallas_src>

<mosaic_0001>
module attributes {stable_mosaic.version = 11 : i64} {
  func.func @_mlp_kernel(%arg0: i32, %arg1: memref<1024x3xf32, #tpu.memory_space<vmem>>, %arg2: memref<1024x9xf32, #tpu.memory_space<vmem>>, %arg3: memref<168x32xf32, #tpu.memory_space<vmem>>, %arg4: memref<32x8xf32, #tpu.memory_space<vmem>>, %arg5: memref<8x1024xf32, #tpu.memory_space<vmem>>) attributes {dimension_semantics = [#tpu.dimension_semantics<parallel>], iteration_bounds = array<i64: 2>, scalar_prefetch = 0 : i64, scratch_operands = 0 : i64, tpu.core_type = #tpu.core_type<tc>, window_params = [{transform_indices = @transform_0, window_bounds = array<i64: 1024, 3>}, {transform_indices = @transform_1, window_bounds = array<i64: 1024, 9>}, {pipeline_mode = #tpu.pipeline_mode<synchronous>, transform_indices = @transform_2, window_bounds = array<i64: 168, 32>}, {pipeline_mode = #tpu.pipeline_mode<synchronous>, transform_indices = @transform_3, window_bounds = array<i64: 32, 8>}, {transform_indices = @transform_4, window_bounds = array<i64: 8, 1024>}]} {
    %c0 = arith.constant 0 : index
    %c0_0 = arith.constant 0 : index
    %0 = vector.load %arg3[%c0, %c0_0] : memref<168x32xf32, #tpu.memory_space<vmem>>, vector<16x3xf32>
    %c0_1 = arith.constant 0 : index
    %c0_2 = arith.constant 0 : index
    %1 = vector.load %arg1[%c0_1, %c0_2] : memref<1024x3xf32, #tpu.memory_space<vmem>>, vector<1024x3xf32>
    %cst = arith.constant dense<0.000000e+00> : vector<16x1024xf32>
    %2 = tpu.matmul %0, %1, %cst {dimension_numbers = #tpu.dot_dimension_numbers<[1], [1], [0], [0], [0, 0, 1, 0], [], []>} : vector<16x3xf32>, vector<1024x3xf32>, vector<16x1024xf32> -> vector<16x1024xf32>
    %c16 = arith.constant 16 : index
    %c0_3 = arith.constant 0 : index
    %3 = vector.load %arg3[%c16, %c0_3] : memref<168x32xf32, #tpu.memory_space<vmem>>, vector<16x9xf32>
    %c0_4 = arith.constant 0 : index
    %c0_5 = arith.constant 0 : index
    %4 = vector.load %arg2[%c0_4, %c0_5] : memref<1024x9xf32, #tpu.memory_space<vmem>>, vector<1024x9xf32>
    %cst_6 = arith.constant dense<0.000000e+00> : vector<16x1024xf32>
    %5 = tpu.matmul %3, %4, %cst_6 {dimension_numbers = #tpu.dot_dimension_numbers<[1], [1], [0], [0], [0, 0, 1, 0], [], []>} : vector<16x9xf32>, vector<1024x9xf32>, vector<16x1024xf32> -> vector<16x1024xf32>
    %cst_7 = arith.constant -5.000000e-01 : f32
    %6 = vector.broadcast %cst_7 : f32 to vector<16x1024xf32>
    %7 = arith.mulf %6, %5 : vector<16x1024xf32>
    %8 = math.exp %7 : vector<16x1024xf32>
    %9 = math.cos %2 : vector<16x1024xf32>
    %10 = arith.mulf %8, %9 : vector<16x1024xf32>
    %11 = math.sin %2 : vector<16x1024xf32>
    %12 = arith.mulf %8, %11 : vector<16x1024xf32>
    %13 = tpu.concatenate %10, %12 in 0 : vector<16x1024xf32>, vector<16x1024xf32> -> vector<32x1024xf32>
    %c32 = arith.constant 32 : index
    %c0_8 = arith.constant 0 : index
    %14 = vector.load %arg3[%c32, %c0_8] : memref<168x32xf32, #tpu.memory_space<vmem>>, vector<32x32xf32>
    %cst_9 = arith.constant dense<0.000000e+00> : vector<32x1024xf32>
    %15 = tpu.matmul %14, %13, %cst_9 {dimension_numbers = #tpu.dot_dimension_numbers<[1], [0], [0], [1], [0, 0, 1, 1], [], []>} : vector<32x32xf32>, vector<32x1024xf32>, vector<32x1024xf32> -> vector<32x1024xf32>
    %c0_10 = arith.constant 0 : index
    %c0_11 = arith.constant 0 : index
    %16 = vector.load %arg4[%c0_10, %c0_11] : memref<32x8xf32, #tpu.memory_space<vmem>>, vector<32x1xf32>
    %17 = vector.broadcast %16 : vector<32x1xf32> to vector<32x1024xf32>
    %18 = arith.addf %15, %17 : vector<32x1024xf32>
    %cst_12 = arith.constant 0.000000e+00 : f32
    %19 = vector.broadcast %cst_12 : f32 to vector<32x1024xf32>
    %20 = arith.maximumf %18, %19 : vector<32x1024xf32>
    %cst_13 = arith.constant dense<0.000000e+00> : vector<1024xf32>
    %21 = vector.multi_reduction <add>, %20, %cst_13 [0] : vector<32x1024xf32> to vector<1024xf32>
    %22 = vector.shape_cast %21 : vector<1024xf32> to vector<1x1024xf32>
    %cst_14 = arith.constant 3.200000e+01 : f32
    %23 = vector.broadcast %cst_14 : f32 to vector<1x1024xf32>
    %24 = arith.divf %22, %23 : vector<1x1024xf32>
    %25 = vector.broadcast %24 : vector<1x1024xf32> to vector<32x1024xf32>
    %26 = arith.subf %20, %25 : vector<32x1024xf32>
    %27 = arith.mulf %26, %26 : vector<32x1024xf32>
    %cst_15 = arith.constant dense<0.000000e+00> : vector<1024xf32>
    %28 = vector.multi_reduction <add>, %27, %cst_15 [0] : vector<32x1024xf32> to vector<1024xf32>
    %29 = vector.shape_cast %28 : vector<1024xf32> to vector<1x1024xf32>
    %cst_16 = arith.constant 3.200000e+01 : f32
    %30 = vector.broadcast %cst_16 : f32 to vector<1x1024xf32>
    %31 = arith.divf %29, %30 : vector<1x1024xf32>
    %32 = vector.broadcast %24 : vector<1x1024xf32> to vector<32x1024xf32>
    %33 = arith.subf %20, %32 : vector<32x1024xf32>
    %cst_17 = arith.constant 9.99999974E-6 : f32
    %34 = vector.broadcast %cst_17 : f32 to vector<1x1024xf32>
    %35 = arith.addf %31, %34 : vector<1x1024xf32>
    %36 = math.rsqrt %35 : vector<1x1024xf32>
    %37 = vector.broadcast %36 : vector<1x1024xf32> to vector<32x1024xf32>
    %38 = arith.mulf %33, %37 : vector<32x1024xf32>
    %c0_18 = arith.constant 0 : index
    %c1 = arith.constant 1 : index
    %39 = vector.load %arg4[%c0_18, %c1] : memref<32x8xf32, #tpu.memory_space<vmem>>, vector<32x1xf32>
    %40 = vector.broadcast %39 : vector<32x1xf32> to vector<32x1024xf32>
    %41 = arith.mulf %38, %40 : vector<32x1024xf32>
    %c0_19 = arith.constant 0 : index
    %c2 = arith.constant 2 : index
    %42 = vector.load %arg4[%c0_19, %c2] : memref<32x8xf32, #tpu.memory_space<vmem>>, vector<32x1xf32>
    %43 = vector.broadcast %42 : vector<32x1xf32> to vector<32x1024xf32>
    %44 = arith.addf %41, %43 : vector<32x1024xf32>
    %c64 = arith.constant 64 : index
    %c0_20 = arith.constant 0 : index
    %45 = vector.load %arg3[%c64, %c0_20] : memref<168x32xf32, #tpu.memory_space<vmem>>, vector<32x32xf32>
    %cst_21 = arith.constant dense<0.000000e+00> : vector<32x1024xf32>
    %46 = tpu.matmul %45, %44, %cst_21 {dimension_numbers = #tpu.dot_dimension_numbers<[1], [0], [0], [1], [0, 0, 1, 1], [], []>} : vector<32x32xf32>, vector<32x1024xf32>, vector<32x1024xf32> -> vector<32x1024xf32>
    %c0_22 = arith.constant 0 : index
    %c3 = arith.constant 3 : index
    %47 = vector.load %arg4[%c0_22, %c3] : memref<32x8xf32, #tpu.memory_space<vmem>>, vector<32x1xf32>
    %48 = vector.broadcast %47 : vector<32x1xf32> to vector<32x1024xf32>
    %49 = arith.addf %46, %48 : vector<32x1024xf32>
    %cst_23 = arith.constant 0.000000e+00 : f32
    %50 = vector.broadcast %cst_23 : f32 to vector<32x1024xf32>
    %51 = arith.maximumf %49, %50 : vector<32x1024xf32>
    %c96 = arith.constant 96 : index
    %c0_24 = arith.constant 0 : index
    %52 = vector.load %arg3[%c96, %c0_24] : memref<168x32xf32, #tpu.memory_space<vmem>>, vector<32x32xf32>
    %cst_25 = arith.constant dense<0.000000e+00> : vector<32x1024xf32>
    %53 = tpu.matmul %52, %51, %cst_25 {dimension_numbers = #tpu.dot_dimension_numbers<[1], [0], [0], [1], [0, 0, 1, 1], [], []>} : vector<32x32xf32>, vector<32x1024xf32>, vector<32x1024xf32> -> vector<32x1024xf32>
    %c0_26 = arith.constant 0 : index
    %c4 = arith.constant 4 : index
    %54 = vector.load %arg4[%c0_26, %c4] : memref<32x8xf32, #tpu.memory_space<vmem>>, vector<32x1xf32>
    %55 = vector.broadcast %54 : vector<32x1xf32> to vector<32x1024xf32>
    %56 = arith.addf %53, %55 : vector<32x1024xf32>
    %57 = arith.addf %20, %56 : vector<32x1024xf32>
    %c128 = arith.constant 128 : index
    %c0_27 = arith.constant 0 : index
    %58 = vector.load %arg3[%c128, %c0_27] : memref<168x32xf32, #tpu.memory_space<vmem>>, vector<32x32xf32>
    %cst_28 = arith.constant dense<0.000000e+00> : vector<32x1024xf32>
    %59 = tpu.matmul %58, %57, %cst_28 {dimension_numbers = #tpu.dot_dimension_numbers<[1], [0], [0], [1], [0, 0, 1, 1], [], []>} : vector<32x32xf32>, vector<32x1024xf32>, vector<32x1024xf32> -> vector<32x1024xf32>
    %c0_29 = arith.constant 0 : index
    %c5 = arith.constant 5 : index
    %60 = vector.load %arg4[%c0_29, %c5] : memref<32x8xf32, #tpu.memory_space<vmem>>, vector<32x1xf32>
    %61 = vector.broadcast %60 : vector<32x1xf32> to vector<32x1024xf32>
    %62 = arith.addf %59, %61 : vector<32x1024xf32>
    %cst_30 = arith.constant 0.000000e+00 : f32
    %63 = vector.broadcast %cst_30 : f32 to vector<32x1024xf32>
    %64 = arith.maximumf %62, %63 : vector<32x1024xf32>
    %c160 = arith.constant 160 : index
    %c0_31 = arith.constant 0 : index
    %65 = vector.load %arg3[%c160, %c0_31] : memref<168x32xf32, #tpu.memory_space<vmem>>, vector<8x32xf32>
    %cst_32 = arith.constant dense<0.000000e+00> : vector<8x1024xf32>
    %66 = tpu.matmul %65, %64, %cst_32 {dimension_numbers = #tpu.dot_dimension_numbers<[1], [0], [0], [1], [0, 0, 1, 1], [], []>} : vector<8x32xf32>, vector<32x1024xf32>, vector<8x1024xf32> -> vector<8x1024xf32>
    %c0_33 = arith.constant 0 : index
    %c6 = arith.constant 6 : index
    %67 = vector.load %arg4[%c0_33, %c6] : memref<32x8xf32, #tpu.memory_space<vmem>>, vector<8x1xf32>
    %68 = vector.broadcast %67 : vector<8x1xf32> to vector<8x1024xf32>
    %69 = arith.addf %66, %68 : vector<8x1024xf32>
    %c0_34 = arith.constant 0 : index
    %c0_35 = arith.constant 0 : index
    %70 = vector.load %arg5[%c0_34, %c0_35] : memref<8x1024xf32, #tpu.memory_space<vmem>>, vector<8x1024xf32>
    tpu.vector_store %arg5[%c0_34, %c0_35], %69 {strides = array<i32>} : memref<8x1024xf32, #tpu.memory_space<vmem>>, vector<8x1024xf32>,
    return
  }
  func.func @transform_0(%arg0: i32) -> (i32, i32) {
    %c0_i32 = arith.constant 0 : i32
    %c0_i32_0 = arith.constant 0 : i32
    return %arg0, %c0_i32 : i32, i32
  }
  func.func @transform_1(%arg0: i32) -> (i32, i32) {
    %c0_i32 = arith.constant 0 : i32
    %c0_i32_0 = arith.constant 0 : i32
    return %arg0, %c0_i32 : i32, i32
  }
  func.func @transform_2(%arg0: i32) -> (i32, i32) {
    %c0_i32 = arith.constant 0 : i32
    %c0_i32_0 = arith.constant 0 : i32
    %c0_i32_1 = arith.constant 0 : i32
    return %c0_i32, %c0_i32_0 : i32, i32
  }
  func.func @transform_3(%arg0: i32) -> (i32, i32) {
    %c0_i32 = arith.constant 0 : i32
    %c0_i32_0 = arith.constant 0 : i32
    %c0_i32_1 = arith.constant 0 : i32
    return %c0_i32, %c0_i32_0 : i32, i32
  }
  func.func @transform_4(%arg0: i32) -> (i32, i32) {
    %c0_i32 = arith.constant 0 : i32
    %c0_i32_0 = arith.constant 0 : i32
    return %c0_i32, %arg0 : i32, i32
  }
}

</mosaic_0001>

<bundles_post_ra>
// kernel: tpu_custom_call.1
= control target key start
LH: loop header
LB: loop body
LE: loop exit
PB: predicated region body
PF: predicated region fallthrough
CT: control target
= control target key end

     0   :  { %9 = vsyncpa [#allocation3], 0  ;;  %s13046_s0 = inlined_call_operand.vmem [shape: f32[2048,3], index: 0, kind: input, shape index: {}]   ;;  %s13047_s1 = inlined_call_operand.vmem [shape: f32[2048,9], index: 1, kind: input, shape index: {}]   ;;  %s13048_s2 = inlined_call_operand.vmem [shape: f32[168,32], index: 2, kind: input, shape index: {}]   ;;  %s13049_s3 = inlined_call_operand.vmem [shape: f32[32,8], index: 3, kind: input, shape index: {}]   ;;  %s13050_s4 = inlined_call_operand.hbm [shape: f32[8,2048], index: 4, kind: output, shape index: {}]  }
   0x1   :  { %11 = vsyncpa [#allocation3 + $0x1], 0  ;;  %s9385_s15 = smov 0   ;;  %s9387_s16 = smov 0  }
   0x2   :  { %s9389_s17 = smov 0   ;;  %s9391_s18 = smov 0  }
   0x3 LB: > { %s9406_s19 = sadd.s32 4294967295, %s9343_s18   ;;  %s7717_s20 = sadd.s32 4294967294, %s9343_s18   ;;  %s9343_s18 = sphi %s9391_s18, %s13338_s18   ;;  %s9339_s17 = sphi %s9389_s17, %s13337_s17   ;;  %s9335_s16 = sphi %s9387_s16, %s13336_s16   ;;  %s9331_s15 = sphi %s9385_s15, %s13335_s15  }
   0x4   : > { %s9410_s21 = sadd.s32 1, %s9343_s18   ;;  %s118_s22 = sadd.s32 1, %s9339_s17 }
   0x5   : > { %s115_s23 = ssub.s32 %s9343_s18, %s9410_s21  ;;  %p128_p0 = scmp.ne.s32.totalorder %s9339_s17, %s9335_s16 }
   0x6   : > { %p116_p1 = scmp.eq.s32.totalorder %s115_s23, 0  ;;  %p129_p2 = scmp.eq.s32.totalorder %s9406_s19, 1 }
   0x7   : > { %p134_p3 = scmp.ne.s32.totalorder %s9335_s16, %s9331_s15  ;;  %p135_p4 = scmp.eq.s32.totalorder %s7717_s20, 1 }
   0x8   : > { %s9421_s24 = scalar_select %p116_p1, %s9339_s17, %s118_s22  }
   0x9   : > { %p9423_p5 = por %p129_p2, %p128_p0  ;;  %p9427_p6 = por %p135_p4, %p134_p3 }
   0xa   : > { %p7720_p7 = scmp.ge.s32.totalorder %s9343_s18, 1  ;;  %p177_p8 = scmp.lt.s32.totalorder %s9343_s18, 3 }
   0xc   : > { %p178_p9 = pnand %p7720_p7, %p177_p8 }
   0xe   : > { %181 = sbr.rel (%p178_p9) target bundleno = 2024 (0x7e8), region = 36 }
  0x15   : > { %s7722_s27 = sshll.u32 %s9406_s19, 7  ;;  %vm351_vm0 = vcmask 23552   ;;  %v9437_v0 = vld [vmem:[%s13048_s2] sm:$0xff]  ;;  %vm1180_vm2 = vcmask 72704   ;;  %s9359_s10 = smov [#allocation2]  }
  0x16   : > { %p209_p10 = scmp.lt.s32.totalorder %s7722_s27, 255  ;;  %8232 = vmatprep.mubr.msk.f32.mxu0 %vm351_vm0, %v9437_v0  ;;  %8268 = vmatprep.mubr.msk.f32.mxu1 %vm351_vm0, %v9437_v0  ;;  %vm9455_vm1 = vmpackc.low %vm351_vm0, %vm351_vm0  ;;  %s9285_s11 = sshll.u32 %s9359_s10, 4  ;;  %s9286_s11 = int_to_ptr.vmem [resolvable:$false] %s9285_s11 }
  0x17   : > { %vm9745_vm3 = vmpackc.low %vm1180_vm2, %vm1180_vm2 }
  0x18   : > { %s13340_s27 = smov (!%p209_p10, %s7722_s27), 255 }
  0x19   : > { %s7723_s30 = sshll.u32 %s13340_s27, 3  ;;  %s205_s27 = sand.u32 1, %s9335_s16  }
  0x1a   : > { %s9451_s7 = scalar_lea.vmem %s13046_s0, %s7723_s30  ;;  %s9725_s12 = scalar_lea.vmem %s13047_s1, %s7723_s30 }
  0x1b   : > { %v239_v2 = vld [vmem:[%s9451_s7 + $0x80] sm:$0xff]  ;;  %v240_v3 = vld [vmem:[%s9451_s7 + $0x88] sm:$0xff]  ;;  %v241_v13 = vld [vmem:[%s9451_s7 + $0x90] sm:$0xff]  ;;  %s7721_s28 = sshll.u32 %s205_s27, 6  ;;  %s8199_s30 = sshll.u32 %s9406_s19, 10 }
  0x1c   : > { %v271_v4 = vld [vmem:[%s9451_s7 + $0x180] sm:$0xff]  ;;  %v8488_v5 = vpack.c.bf16 %v240_v3, %v239_v2  ;;  %v272_v6 = vld [vmem:[%s9451_s7 + $0x188] sm:$0xff]  ;;  %v242_v15 = vld [vmem:[%s9451_s7 + $0x98] sm:$0xff]  ;;  %s207_s29 = scalar_lea.vmem [#allocation2], %s7721_s28  ;;  %s13002_s8 = scalar_lea.hbm %s13050_s4, %s8199_s30 }
  0x1d   : > { %v223_v7 = vld [vmem:[%s9451_s7] sm:$0xff]  ;;  %v224_v8 = vld [vmem:[%s9451_s7 + $0x8] sm:$0xff]  ;;  %v8536_v9 = vpack.c.bf16 %v272_v6, %v271_v4  ;;  %v273_v16 = vld [vmem:[%s9451_s7 + $0x190] sm:$0xff]  ;;  %v8494_v18 = vpack.c.bf16 %v242_v15, %v241_v13  ;;  %s7646_s5 = sshll.u32 %s207_s29, 4  ;;  %s7632_s19 = scalar_lea.sflag [#allocation3], %s205_s27  ;;  %s13004_s5 = int_to_ptr.vmem [resolvable:$true] %s7646_s5 }
  0x1e   : > { %v8491_v10 = vpack.c.bf16 %v224_v8, %v223_v7  ;;  %v255_v11 = vld [vmem:[%s9451_s7 + $0x100] sm:$0xff]  ;;  %v256_v12 = vld [vmem:[%s9451_s7 + $0x108] sm:$0xff]  ;;  %8490 = vmatprep.subr.msk.bf16.mxu0 %vm9455_vm1, %v8488_v5  ;;  %v274_v17 = vld [vmem:[%s9451_s7 + $0x198] sm:$0xff]  ;;  %s9281_s9 = scalar_lea.vmem %s13004_s5, 1024  ;;  %p9288_p0 = scmp.lt.s32.totalorder %s13004_s5, %s9286_s11 }
  0x1f   : > { %v8539_v14 = vpack.c.bf16 %v256_v12, %v255_v11  ;;  %8538 = vmatprep.subr.msk.bf16.mxu1 %vm9455_vm1, %v8536_v9  ;;  %v8542_v19 = vpack.c.bf16 %v274_v17, %v273_v16  ;;  %v225_v20 = vld [vmem:[%s9451_s7 + $0x10] sm:$0xff]  ;;  %v226_v21 = vld [vmem:[%s9451_s7 + $0x18] sm:$0xff]  ;;  %v243_v24 = vld [vmem:[%s9451_s7 + $0xa0] sm:$0xff]  ;;  %p9282_p11 = scmp.ne.s32.totalorder %s13004_s5, %s9281_s9 }
  0x20   : > { %8493 = vmatpush3.bf16.xpose.msk.msra.mxu0 %vm9455_vm1, %v8491_v10  ;;  %v257_v22 = vld [vmem:[%s9451_s7 + $0x110] sm:$0xff]  ;;  %v258_v23 = vld [vmem:[%s9451_s7 + $0x118] sm:$0xff]  ;;  %v244_v25 = vld [vmem:[%s9451_s7 + $0xa8] sm:$0xff]  ;;  %v8497_v28 = vpack.c.bf16 %v226_v21, %v225_v20 }
  0x21   : > { %8541 = vmatpush3.bf16.xpose.msk.msra.mxu1 %vm9455_vm1, %v8539_v14  ;;  %8496 = vmatprep.subr.msk.bf16.mxu0 %vm9455_vm1, %v8494_v18  ;;  %v275_v26 = vld [vmem:[%s9451_s7 + $0x1a0] sm:$0xff]  ;;  %v276_v27 = vld [vmem:[%s9451_s7 + $0x1a8] sm:$0xff]  ;;  %v8545_v29 = vpack.c.bf16 %v258_v23, %v257_v22  ;;  %v8500_v30 = vpack.c.bf16 %v244_v25, %v243_v24  ;;  %v245_v36 = vld [vmem:[%s9451_s7 + $0xb0] sm:$0xff]  ;;  %p9283_p12 = pnand %p9282_p11, %p9423_p5 }
  0x22   : > { %8544 = vmatprep.subr.msk.bf16.mxu1 %vm9455_vm1, %v8542_v19  ;;  %v8548_v31 = vpack.c.bf16 %v276_v27, %v275_v26  ;;  %v227_v32 = vld [vmem:[%s9451_s7 + $0x20] sm:$0xff]  ;;  %v228_v33 = vld [vmem:[%s9451_s7 + $0x28] sm:$0xff]  ;;  %v246_v37 = vld [vmem:[%s9451_s7 + $0xb8] sm:$0xff] }
  0x23   : > { %v259_v34 = vld [vmem:[%s9451_s7 + $0x120] sm:$0xff]  ;;  %v260_v35 = vld [vmem:[%s9451_s7 + $0x128] sm:$0xff]  ;;  %v277_v38 = vld [vmem:[%s9451_s7 + $0x1b0] sm:$0xff]  ;;  %v8503_v40 = vpack.c.bf16 %v228_v33, %v227_v32  ;;  %v8506_v42 = vpack.c.bf16 %v246_v37, %v245_v36  ;;  %p9284_p13 = pneg %p9283_p12 }
  0x24   : > { %v278_v39 = vld [vmem:[%s9451_s7 + $0x1b8] sm:$0xff]  ;;  %v8551_v41 = vpack.c.bf16 %v260_v35, %v259_v34  ;;  %v229_v44 = vld [vmem:[%s9451_s7 + $0x30] sm:$0xff]  ;;  %v247_v48 = vld [vmem:[%s9451_s7 + $0xc0] sm:$0xff] }
  0x25   : > { %v8554_v43 = vpack.c.bf16 %v278_v39, %v277_v38  ;;  %v230_v45 = vld [vmem:[%s9451_s7 + $0x38] sm:$0xff]  ;;  %v261_v46 = vld [vmem:[%s9451_s7 + $0x130] sm:$0xff]  ;;  %v248_v49 = vld [vmem:[%s9451_s7 + $0xc8] sm:$0xff] }
  0x26   : > { %v262_v47 = vld [vmem:[%s9451_s7 + $0x138] sm:$0xff]  ;;  %v279_v50 = vld [vmem:[%s9451_s7 + $0x1c0] sm:$0xff]  ;;  %v280_v51 = vld [vmem:[%s9451_s7 + $0x1c8] sm:$0xff]  ;;  %v8509_v52 = vpack.c.bf16 %v230_v45, %v229_v44  ;;  %v8512_v54 = vpack.c.bf16 %v248_v49, %v247_v48 }
  0x27   : > { %v8557_v53 = vpack.c.bf16 %v262_v47, %v261_v46  ;;  %v8560_v55 = vpack.c.bf16 %v280_v51, %v279_v50  ;;  %v231_v56 = vld [vmem:[%s9451_s7 + $0x40] sm:$0xff]  ;;  %v232_v57 = vld [vmem:[%s9451_s7 + $0x48] sm:$0xff]  ;;  %v249_v60 = vld [vmem:[%s9451_s7 + $0xd0] sm:$0xff] }
  0x28   : > { %8499 = vmatpush3.bf16.xpose.msk.msra.mxu0 %vm9455_vm1, %v8497_v28  ;;  %v263_v58 = vld [vmem:[%s9451_s7 + $0x140] sm:$0xff]  ;;  %v264_v59 = vld [vmem:[%s9451_s7 + $0x148] sm:$0xff]  ;;  %v250_v61 = vld [vmem:[%s9451_s7 + $0xd8] sm:$0xff]  ;;  %v8515_v2 = vpack.c.bf16 %v232_v57, %v231_v56 }
  0x29   : > { %8547 = vmatpush3.bf16.xpose.msk.msra.mxu1 %vm9455_vm1, %v8545_v29  ;;  %8502 = vmatprep.subr.msk.bf16.mxu0 %vm9455_vm1, %v8500_v30  ;;  %v281_v62 = vld [vmem:[%s9451_s7 + $0x1d0] sm:$0xff]  ;;  %v282_v63 = vld [vmem:[%s9451_s7 + $0x1d8] sm:$0xff]  ;;  %v8563_v3 = vpack.c.bf16 %v264_v59, %v263_v58  ;;  %v8518_v4 = vpack.c.bf16 %v250_v61, %v249_v60  ;;  %v251_v10 = vld [vmem:[%s9451_s7 + $0xe0] sm:$0xff] }
  0x2a   : > { %8550 = vmatprep.subr.msk.bf16.mxu1 %vm9455_vm1, %v8548_v31  ;;  %v8566_v5 = vpack.c.bf16 %v282_v63, %v281_v62  ;;  %v233_v6 = vld [vmem:[%s9451_s7 + $0x50] sm:$0xff]  ;;  %v234_v7 = vld [vmem:[%s9451_s7 + $0x58] sm:$0xff]  ;;  %v252_v11 = vld [vmem:[%s9451_s7 + $0xe8] sm:$0xff] }
  0x2b   : > { %v265_v8 = vld [vmem:[%s9451_s7 + $0x150] sm:$0xff]  ;;  %v266_v9 = vld [vmem:[%s9451_s7 + $0x158] sm:$0xff]  ;;  %v283_v12 = vld [vmem:[%s9451_s7 + $0x1e0] sm:$0xff]  ;;  %v8521_v14 = vpack.c.bf16 %v234_v7, %v233_v6  ;;  %v8524_v16 = vpack.c.bf16 %v252_v11, %v251_v10 }
  0x2c   : > { %v284_v13 = vld [vmem:[%s9451_s7 + $0x1e8] sm:$0xff]  ;;  %v8569_v15 = vpack.c.bf16 %v266_v9, %v265_v8  ;;  %v235_v18 = vld [vmem:[%s9451_s7 + $0x60] sm:$0xff]  ;;  %v253_v22 = vld [vmem:[%s9451_s7 + $0xf0] sm:$0xff] }
  0x2d   : > { %v8572_v17 = vpack.c.bf16 %v284_v13, %v283_v12  ;;  %v236_v19 = vld [vmem:[%s9451_s7 + $0x68] sm:$0xff]  ;;  %v267_v20 = vld [vmem:[%s9451_s7 + $0x160] sm:$0xff]  ;;  %v254_v23 = vld [vmem:[%s9451_s7 + $0xf8] sm:$0xff] }
  0x2e   : > { %v268_v21 = vld [vmem:[%s9451_s7 + $0x168] sm:$0xff]  ;;  %v285_v24 = vld [vmem:[%s9451_s7 + $0x1f0] sm:$0xff]  ;;  %v286_v25 = vld [vmem:[%s9451_s7 + $0x1f8] sm:$0xff]  ;;  %v8527_v26 = vpack.c.bf16 %v236_v19, %v235_v18  ;;  %v8530_v28 = vpack.c.bf16 %v254_v23, %v253_v22 }
  0x2f   : > { %v8575_v27 = vpack.c.bf16 %v268_v21, %v267_v20  ;;  %v8578_v29 = vpack.c.bf16 %v286_v25, %v285_v24  ;;  %v237_v30 = vld [vmem:[%s9451_s7 + $0x70] sm:$0xff]  ;;  %v238_v31 = vld [vmem:[%s9451_s7 + $0x78] sm:$0xff]  ;;  %v303_v34 = vld [vmem:[%s9451_s7 + $0x280] sm:$0xff] }
  0x30   : > { %8505 = vmatpush3.bf16.xpose.msk.msra.mxu0 %vm9455_vm1, %v8503_v40  ;;  %v269_v32 = vld [vmem:[%s9451_s7 + $0x170] sm:$0xff]  ;;  %v270_v33 = vld [vmem:[%s9451_s7 + $0x178] sm:$0xff]  ;;  %v304_v35 = vld [vmem:[%s9451_s7 + $0x288] sm:$0xff]  ;;  %v8533_v38 = vpack.c.bf16 %v238_v31, %v237_v30 }
  0x31   : > { %8553 = vmatpush3.bf16.xpose.msk.msra.mxu1 %vm9455_vm1, %v8551_v41  ;;  %8508 = vmatprep.subr.msk.bf16.mxu0 %vm9455_vm1, %v8506_v42  ;;  %v335_v36 = vld [vmem:[%s9451_s7 + $0x380] sm:$0xff]  ;;  %v336_v37 = vld [vmem:[%s9451_s7 + $0x388] sm:$0xff]  ;;  %v8581_v39 = vpack.c.bf16 %v270_v33, %v269_v32  ;;  %v8584_v40 = vpack.c.bf16 %v304_v35, %v303_v34  ;;  %v305_v46 = vld [vmem:[%s9451_s7 + $0x290] sm:$0xff] }
  0x32   : > { %8556 = vmatprep.subr.msk.bf16.mxu1 %vm9455_vm1, %v8554_v43  ;;  %v8632_v41 = vpack.c.bf16 %v336_v37, %v335_v36  ;;  %v287_v42 = vld [vmem:[%s9451_s7 + $0x200] sm:$0xff]  ;;  %v288_v43 = vld [vmem:[%s9451_s7 + $0x208] sm:$0xff]  ;;  %v306_v47 = vld [vmem:[%s9451_s7 + $0x298] sm:$0xff] }
  0x33   : > { %v319_v44 = vld [vmem:[%s9451_s7 + $0x300] sm:$0xff]  ;;  %v320_v45 = vld [vmem:[%s9451_s7 + $0x308] sm:$0xff]  ;;  %v8587_v48 = vpack.c.bf16 %v288_v43, %v287_v42  ;;  %v337_v49 = vld [vmem:[%s9451_s7 + $0x390] sm:$0xff] }
  0x34   : > { %v338_v50 = vld [vmem:[%s9451_s7 + $0x398] sm:$0xff]  ;;  %v8635_v51 = vpack.c.bf16 %v320_v45, %v319_v44  ;;  %v321_v57 = vld [vmem:[%s9451_s7 + $0x310] sm:$0xff]  ;;  %v307_v59 = vld [vmem:[%s9451_s7 + $0x2a0] sm:$0xff] }
  0x35   : > { %v290_v56 = vld [vmem:[%s9451_s7 + $0x218] sm:$0xff]  ;;  %v308_v60 = vld [vmem:[%s9451_s7 + $0x2a8] sm:$0xff]  ;;  %v339_v61 = vld [vmem:[%s9451_s7 + $0x3a0] sm:$0xff] }
  0x36   : > { %v322_v58 = vld [vmem:[%s9451_s7 + $0x318] sm:$0xff]  ;;  %v340_v62 = vld [vmem:[%s9451_s7 + $0x3a8] sm:$0xff]  ;;  %v323_v7 = vld [vmem:[%s9451_s7 + $0x320] sm:$0xff] }
  0x37   : > { %v292_v6 = vld [vmem:[%s9451_s7 + $0x228] sm:$0xff]  ;;  %v309_v9 = vld [vmem:[%s9451_s7 + $0x2b0] sm:$0xff]  ;;  %v310_v10 = vld [vmem:[%s9451_s7 + $0x2b8] sm:$0xff] }
  0x38   : > { %8511 = vmatpush3.bf16.xpose.msk.msra.mxu0 %vm9455_vm1, %v8509_v52  ;;  %v9606_v52 = vld [vmem:[%s13048_s2 + $0x8] sm:$0xff]  ;;  %v341_v11 = vld [vmem:[%s9451_s7 + $0x3b0] sm:$0xff]  ;;  %v342_v12 = vld [vmem:[%s9451_s7 + $0x3b8] sm:$0xff] }
  0x39   : > { %8559 = vmatpush3.bf16.xpose.msk.msra.mxu1 %vm9455_vm1, %v8557_v53  ;;  %8514 = vmatprep.subr.msk.bf16.mxu0 %vm9455_vm1, %v8512_v54  ;;  %v8590_v53 = vpack.c.bf16 %v306_v47, %v305_v46  ;;  %v8638_v54 = vpack.c.bf16 %v338_v50, %v337_v49  ;;  %v324_v8 = vld [vmem:[%s9451_s7 + $0x328] sm:$0xff]  ;;  %v294_v18 = vld [vmem:[%s9451_s7 + $0x238] sm:$0xff]  ;;  %v325_v19 = vld [vmem:[%s9451_s7 + $0x330] sm:$0xff] }
  0x3a   : > { %8562 = vmatprep.subr.msk.bf16.mxu1 %vm9455_vm1, %v8560_v55  ;;  %v289_v55 = vld [vmem:[%s9451_s7 + $0x210] sm:$0xff]  ;;  %v326_v20 = vld [vmem:[%s9451_s7 + $0x338] sm:$0xff]  ;;  %v311_v21 = vld [vmem:[%s9451_s7 + $0x2c0] sm:$0xff] }
  0x3b   : > { %v8593_v63 = vpack.c.bf16 %v290_v56, %v289_v55  ;;  %v312_v22 = vld [vmem:[%s9451_s7 + $0x2c8] sm:$0xff]  ;;  %v343_v23 = vld [vmem:[%s9451_s7 + $0x3c0] sm:$0xff]  ;;  %v313_v33 = vld [vmem:[%s9451_s7 + $0x2d0] sm:$0xff] }
  0x3c   : > { %v344_v24 = vld [vmem:[%s9451_s7 + $0x3c8] sm:$0xff]  ;;  %v327_v31 = vld [vmem:[%s9451_s7 + $0x340] sm:$0xff]  ;;  %v314_v34 = vld [vmem:[%s9451_s7 + $0x2d8] sm:$0xff] }
  0x3d   : > { %v296_v30 = vld [vmem:[%s9451_s7 + $0x248] sm:$0xff]  ;;  %v345_v35 = vld [vmem:[%s9451_s7 + $0x3d0] sm:$0xff]  ;;  %v346_v36 = vld [vmem:[%s9451_s7 + $0x3d8] sm:$0xff] }
  0x3e   : > { %v328_v32 = vld [vmem:[%s9451_s7 + $0x348] sm:$0xff]  ;;  %v298_v42 = vld [vmem:[%s9451_s7 + $0x258] sm:$0xff]  ;;  %v329_v43 = vld [vmem:[%s9451_s7 + $0x350] sm:$0xff] }
  0x3f   : > { %v330_v44 = vld [vmem:[%s9451_s7 + $0x358] sm:$0xff]  ;;  %v315_v45 = vld [vmem:[%s9451_s7 + $0x2e0] sm:$0xff]  ;;  %v316_v46 = vld [vmem:[%s9451_s7 + $0x2e8] sm:$0xff] }
  0x40   : > { %8517 = vmatpush3.bf16.xpose.msk.msra.mxu0 %vm9455_vm1, %v8515_v2  ;;  %v8641_v2 = vpack.c.bf16 %v322_v58, %v321_v57  ;;  %v347_v47 = vld [vmem:[%s9451_s7 + $0x3e0] sm:$0xff]  ;;  %v8665_v50 = vpack.c.bf16 %v330_v44, %v329_v43  ;;  %v300_v55 = vld [vmem:[%s9451_s7 + $0x268] sm:$0xff]  ;;  %v317_v58 = vld [vmem:[%s9451_s7 + $0x2f0] sm:$0xff] }
  0x41   : > { %8565 = vmatpush3.bf16.xpose.msk.msra.mxu1 %vm9455_vm1, %v8563_v3  ;;  %8520 = vmatprep.subr.msk.bf16.mxu0 %vm9455_vm1, %v8518_v4  ;;  %v8596_v3 = vpack.c.bf16 %v308_v60, %v307_v59  ;;  %v8644_v4 = vpack.c.bf16 %v340_v62, %v339_v61  ;;  %v331_v56 = vld [vmem:[%s9451_s7 + $0x360] sm:$0xff]  ;;  %v332_v57 = vld [vmem:[%s9451_s7 + $0x368] sm:$0xff]  ;;  %v318_v59 = vld [vmem:[%s9451_s7 + $0x2f8] sm:$0xff] }
  0x42   : > { %8568 = vmatprep.subr.msk.bf16.mxu1 %vm9455_vm1, %v8566_v5  ;;  %v291_v5 = vld [vmem:[%s9451_s7 + $0x220] sm:$0xff]  ;;  %v349_v60 = vld [vmem:[%s9451_s7 + $0x3f0] sm:$0xff]  ;;  %v350_v61 = vld [vmem:[%s9451_s7 + $0x3f8] sm:$0xff] }
  0x43   : > { %v8599_v13 = vpack.c.bf16 %v292_v6, %v291_v5  ;;  %v302_v5 = vld [vmem:[%s9451_s7 + $0x278] sm:$0xff]  ;;  %v333_v6 = vld [vmem:[%s9451_s7 + $0x370] sm:$0xff] }
  0x44   : > { %v1103_v1 = vld [vmem:[%s9725_s12 + $0x198] sm:$0xff]  ;;  %v1074_v43 = vld [vmem:[%s9725_s12 + $0xb0] sm:$0xff] }
  0x45   : > { %v1075_v44 = vld [vmem:[%s9725_s12 + $0xb8] sm:$0xff] }
  0x48   : > { %8523 = vmatpush3.bf16.xpose.msk.msra.mxu0 %vm9455_vm1, %v8521_v14  ;;  %v8647_v14 = vpack.c.bf16 %v324_v8, %v323_v7  ;;  %v334_v7 = vld [vmem:[%s9451_s7 + $0x378] sm:$0xff]  ;;  %v1068_v8 = vld [vmem:[%s9725_s12 + $0x80] sm:$0xff] }
  0x49   : > { %8571 = vmatpush3.bf16.xpose.msk.msra.mxu1 %vm9455_vm1, %v8569_v15  ;;  %8526 = vmatprep.subr.msk.bf16.mxu0 %vm9455_vm1, %v8524_v16  ;;  %v8602_v15 = vpack.c.bf16 %v310_v10, %v309_v9  ;;  %v8650_v16 = vpack.c.bf16 %v342_v12, %v341_v11  ;;  %v1069_v9 = vld [vmem:[%s9725_s12 + $0x88] sm:$0xff]  ;;  %v1100_v10 = vld [vmem:[%s9725_s12 + $0x180] sm:$0xff] }
  0x4a   : > { %8574 = vmatprep.subr.msk.bf16.mxu1 %vm9455_vm1, %v8572_v17  ;;  %v293_v17 = vld [vmem:[%s9451_s7 + $0x230] sm:$0xff]  ;;  %v1101_v11 = vld [vmem:[%s9725_s12 + $0x188] sm:$0xff] }
  0x4b   : > { %v8605_v25 = vpack.c.bf16 %v294_v18, %v293_v17  ;;  %v1052_v17 = vld [vmem:[%s9725_s12] sm:$0xff]  ;;  %v1053_v18 = vld [vmem:[%s9725_s12 + $0x8] sm:$0xff] }
  0x50   : > { %8529 = vmatpush3.bf16.xpose.msk.msra.mxu0 %vm9455_vm1, %v8527_v26  ;;  %v8653_v26 = vpack.c.bf16 %v326_v20, %v325_v19  ;;  %v1084_v19 = vld [vmem:[%s9725_s12 + $0x100] sm:$0xff]  ;;  %v1085_v20 = vld [vmem:[%s9725_s12 + $0x108] sm:$0xff] }
  0x51   : > { %8577 = vmatpush3.bf16.xpose.msk.msra.mxu1 %vm9455_vm1, %v8575_v27  ;;  %8532 = vmatprep.subr.msk.bf16.mxu0 %vm9455_vm1, %v8530_v28  ;;  %v8608_v27 = vpack.c.bf16 %v312_v22, %v311_v21  ;;  %v8656_v28 = vpack.c.bf16 %v344_v24, %v343_v23  ;;  %v1070_v21 = vld [vmem:[%s9725_s12 + $0x90] sm:$0xff]  ;;  %v1071_v22 = vld [vmem:[%s9725_s12 + $0x98] sm:$0xff]  ;;  %v8683_v23 = vpack.c.bf16 %v1053_v18, %v1052_v17 }
  0x52   : > { %8580 = vmatprep.subr.msk.bf16.mxu1 %vm9455_vm1, %v8578_v29  ;;  %v295_v29 = vld [vmem:[%s9451_s7 + $0x240] sm:$0xff]  ;;  %v1102_v24 = vld [vmem:[%s9725_s12 + $0x190] sm:$0xff]  ;;  %v1095_v18 = vld [vmem:[%s9725_s12 + $0x158] sm:$0xff] }
  0x53   : > { %v8611_v37 = vpack.c.bf16 %v296_v30, %v295_v29  ;;  %v1055_v29 = vld [vmem:[%s9725_s12 + $0x18] sm:$0xff]  ;;  %v1086_v30 = vld [vmem:[%s9725_s12 + $0x110] sm:$0xff] }
  0x54   : > { %v1094_v17 = vld [vmem:[%s9725_s12 + $0x150] sm:$0xff] }
  0x58   : > { %8535 = vmatpush3.bf16.xpose.msk.msra.mxu0 %vm9455_vm1, %v8533_v38  ;;  %v8659_v38 = vpack.c.bf16 %v328_v32, %v327_v31  ;;  %v9781_v31 = vld [vmem:[%s13048_s2 + $0x10] sm:$0xff]  ;;  %v1072_v32 = vld [vmem:[%s9725_s12 + $0xa0] sm:$0xff] }
  0x59   : > { %8583 = vmatpush3.bf16.xpose.msk.msra.mxu1 %vm9455_vm1, %v8581_v39  ;;  %8586 = vmatprep.subr.msk.bf16.mxu0 %vm9455_vm1, %v8584_v40  ;;  %v8614_v39 = vpack.c.bf16 %v314_v34, %v313_v33  ;;  %v8662_v40 = vpack.c.bf16 %v346_v36, %v345_v35  ;;  %v1073_v33 = vld [vmem:[%s9725_s12 + $0xa8] sm:$0xff]  ;;  %v1104_v34 = vld [vmem:[%s9725_s12 + $0x1a0] sm:$0xff] }
  0x5a   : > { %8634 = vmatprep.subr.msk.bf16.mxu1 %vm9455_vm1, %v8632_v41  ;;  %v297_v41 = vld [vmem:[%s9451_s7 + $0x250] sm:$0xff]  ;;  %v1105_v35 = vld [vmem:[%s9725_s12 + $0x1a8] sm:$0xff] }
  0x5b   : > { %v8617_v49 = vpack.c.bf16 %v298_v42, %v297_v41  ;;  %v1088_v41 = vld [vmem:[%s9725_s12 + $0x120] sm:$0xff]  ;;  %v1089_v42 = vld [vmem:[%s9725_s12 + $0x128] sm:$0xff] }
  0x5f   : > { %8233 = vmatmul.mubr.msk.f32.vlgmr.msra.gmra.mrb[0].mxu0 %vm351_vm0, %v9437_v0 }
  0x60   : > { %8269 = vmatmul.mubr.msk.f32.vlgmr.msra.gmra.mrb[0].mxu1 %vm351_vm0, %v9437_v0  ;;  %8589 = vmatpush3.bf16.xpose.msk.msra.mxu0 %vm9455_vm1, %v8587_v48  ;;  %v348_v48 = vld [vmem:[%s9451_s7 + $0x3e8] sm:$0xff] }
  0x61   : > { %8637 = vmatpush3.bf16.xpose.msk.msra.mxu1 %vm9455_vm1, %v8635_v51  ;;  %8234 = vmatprep.mubr.msk.f32.mxu0 %vm351_vm0, %v9606_v52  ;;  %v8620_v51 = vpack.c.bf16 %v316_v46, %v315_v45  ;;  %v1106_v45 = vld [vmem:[%s9725_s12 + $0x1b0] sm:$0xff]  ;;  %v1107_v46 = vld [vmem:[%s9725_s12 + $0x1b8] sm:$0xff] }
  0x62   : > { %8270 = vmatprep.mubr.msk.f32.mxu1 %vm351_vm0, %v9606_v52  ;;  %8592 = vmatprep.subr.msk.bf16.mxu0 %vm9455_vm1, %v8590_v53  ;;  %v8668_v53 = vpack.c.bf16 %v348_v48, %v347_v47  ;;  %v8743_v48 = vpack.c.bf16 %v1089_v42, %v1088_v41  ;;  %v1132_v41 = vld [vmem:[%s9725_s12 + $0x280] sm:$0xff]  ;;  %v1133_v42 = vld [vmem:[%s9725_s12 + $0x288] sm:$0xff] }
  0x63   : > { %8235 = vmatmul.mubr.msk.f32.gmra.mrb[2].mxu0 %vm351_vm0, %v9606_v52  ;;  %8640 = vmatprep.subr.msk.bf16.mxu1 %vm9455_vm1, %v8638_v54  ;;  %v299_v54 = vld [vmem:[%s9451_s7 + $0x260] sm:$0xff] }
  0x64   : > { %8271 = vmatmul.mubr.msk.f32.gmra.mrb[2].mxu1 %vm351_vm0, %v9606_v52  ;;  %8304 = vmatprep.mubr.msk.f32.mxu0 %vm351_vm0, %v9437_v0  ;;  %v8623_v62 = vpack.c.bf16 %v300_v55, %v299_v54  ;;  %v1090_v54 = vld [vmem:[%s9725_s12 + $0x130] sm:$0xff]  ;;  %v1091_v55 = vld [vmem:[%s9725_s12 + $0x138] sm:$0xff] }
  0x65   : > { %8340 = vmatprep.mubr.msk.f32.mxu1 %vm351_vm0, %v9437_v0 }
  0x68   : > { %8595 = vmatpush3.bf16.xpose.msk.msra.mxu0 %vm9455_vm1, %v8593_v63  ;;  %v8671_v63 = vpack.c.bf16 %v332_v57, %v331_v56  ;;  %v1076_v56 = vld [vmem:[%s9725_s12 + $0xc0] sm:$0xff]  ;;  %v1077_v57 = vld [vmem:[%s9725_s12 + $0xc8] sm:$0xff] }
  0x69   : > { %8643 = vmatpush3.bf16.xpose.msk.msra.mxu1 %vm9455_vm1, %v8641_v2  ;;  %8598 = vmatprep.subr.msk.bf16.mxu0 %vm9455_vm1, %v8596_v3  ;;  %v8626_v2 = vpack.c.bf16 %v318_v59, %v317_v58  ;;  %v8674_v3 = vpack.c.bf16 %v350_v61, %v349_v60  ;;  %v1108_v58 = vld [vmem:[%s9725_s12 + $0x1c0] sm:$0xff]  ;;  %v1109_v59 = vld [vmem:[%s9725_s12 + $0x1c8] sm:$0xff]  ;;  %v8749_v61 = vpack.c.bf16 %v1091_v55, %v1090_v54  ;;  %v1134_v54 = vld [vmem:[%s9725_s12 + $0x290] sm:$0xff] }
  0x6a   : > { %8646 = vmatprep.subr.msk.bf16.mxu1 %vm9455_vm1, %v8644_v4  ;;  %v301_v4 = vld [vmem:[%s9451_s7 + $0x270] sm:$0xff]  ;;  %v1135_v55 = vld [vmem:[%s9725_s12 + $0x298] sm:$0xff] }
  0x6b   : > { %v8629_v12 = vpack.c.bf16 %v302_v5, %v301_v4  ;;  %v1092_v4 = vld [vmem:[%s9725_s12 + $0x140] sm:$0xff]  ;;  %v1093_v5 = vld [vmem:[%s9725_s12 + $0x148] sm:$0xff] }
  0x70   : > { %8601 = vmatpush3.bf16.xpose.msk.msra.mxu0 %vm9455_vm1, %v8599_v13  ;;  %v8677_v13 = vpack.c.bf16 %v334_v7, %v333_v6  ;;  %v1078_v6 = vld [vmem:[%s9725_s12 + $0xd0] sm:$0xff]  ;;  %v1079_v7 = vld [vmem:[%s9725_s12 + $0xd8] sm:$0xff] }
  0x71   : > { %8649 = vmatpush3.bf16.xpose.msk.msra.mxu1 %vm9455_vm1, %v8647_v14  ;;  %8604 = vmatprep.subr.msk.bf16.mxu0 %vm9455_vm1, %v8602_v15  ;;  %v8680_v14 = vpack.c.bf16 %v1069_v9, %v1068_v8  ;;  %v1110_v8 = vld [vmem:[%s9725_s12 + $0x1d0] sm:$0xff]  ;;  %v1111_v9 = vld [vmem:[%s9725_s12 + $0x1d8] sm:$0xff] }
  0x72   : > { %8652 = vmatprep.subr.msk.bf16.mxu1 %vm9455_vm1, %v8650_v16  ;;  %v8728_v16 = vpack.c.bf16 %v1101_v11, %v1100_v10  ;;  %v8755_v11 = vpack.c.bf16 %v1093_v5, %v1092_v4  ;;  %v1151_v4 = vld [vmem:[%s9725_s12 + $0x318] sm:$0xff]  ;;  %v1136_v5 = vld [vmem:[%s9725_s12 + $0x2a0] sm:$0xff] }
  0x78   : > { %8607 = vmatpush3.bf16.xpose.msk.msra.mxu0 %vm9455_vm1, %v8605_v25  ;;  %v8731_v25 = vpack.c.bf16 %v1085_v20, %v1084_v19  ;;  %v1080_v19 = vld [vmem:[%s9725_s12 + $0xe0] sm:$0xff]  ;;  %v1081_v20 = vld [vmem:[%s9725_s12 + $0xe8] sm:$0xff] }
  0x79   : > { %8655 = vmatpush3.bf16.xpose.msk.msra.mxu1 %vm9455_vm1, %v8653_v26  ;;  %8610 = vmatprep.subr.msk.bf16.mxu0 %vm9455_vm1, %v8608_v27  ;;  %v8686_v26 = vpack.c.bf16 %v1071_v22, %v1070_v21  ;;  %v8734_v27 = vpack.c.bf16 %v1103_v1, %v1102_v24  ;;  %v1112_v21 = vld [vmem:[%s9725_s12 + $0x1e0] sm:$0xff]  ;;  %v1113_v22 = vld [vmem:[%s9725_s12 + $0x1e8] sm:$0xff]  ;;  %v8761_v24 = vpack.c.bf16 %v1095_v18, %v1094_v17  ;;  %v1138_v18 = vld [vmem:[%s9725_s12 + $0x2b0] sm:$0xff] }
  0x7a   : > { %8658 = vmatprep.subr.msk.bf16.mxu1 %vm9455_vm1, %v8656_v28  ;;  %v1054_v28 = vld [vmem:[%s9725_s12 + $0x10] sm:$0xff]  ;;  %v8716_v1 = vpack.c.bf16 %v1081_v20, %v1080_v19  ;;  %v1153_v17 = vld [vmem:[%s9725_s12 + $0x328] sm:$0xff]  ;;  %v1139_v19 = vld [vmem:[%s9725_s12 + $0x2b8] sm:$0xff] }
  0x7b   : > { %v8689_v36 = vpack.c.bf16 %v1055_v29, %v1054_v28  ;;  %v1096_v28 = vld [vmem:[%s9725_s12 + $0x160] sm:$0xff]  ;;  %v1097_v29 = vld [vmem:[%s9725_s12 + $0x168] sm:$0xff]  ;;  %v1170_v20 = vld [vmem:[%s9725_s12 + $0x3b0] sm:$0xff] }
  0x80   : > { %8613 = vmatpush3.bf16.xpose.msk.msra.mxu0 %vm9455_vm1, %v8611_v37 }
  0x81   : > { %8661 = vmatpush3.bf16.xpose.msk.msra.mxu1 %vm9455_vm1, %v8659_v38  ;;  %8616 = vmatprep.subr.msk.bf16.mxu0 %vm9455_vm1, %v8614_v39  ;;  %v8692_v38 = vpack.c.bf16 %v1073_v33, %v1072_v32  ;;  %v8740_v39 = vpack.c.bf16 %v1105_v35, %v1104_v34  ;;  %v1114_v32 = vld [vmem:[%s9725_s12 + $0x1f0] sm:$0xff]  ;;  %v1115_v33 = vld [vmem:[%s9725_s12 + $0x1f8] sm:$0xff]  ;;  %v8767_v35 = vpack.c.bf16 %v1097_v29, %v1096_v28  ;;  %v1140_v29 = vld [vmem:[%s9725_s12 + $0x2c0] sm:$0xff] }
  0x82   : > { %8664 = vmatprep.subr.msk.bf16.mxu1 %vm9455_vm1, %v8662_v40  ;;  %v1057_v40 = vld [vmem:[%s9725_s12 + $0x28] sm:$0xff]  ;;  %v1155_v28 = vld [vmem:[%s9725_s12 + $0x338] sm:$0xff] }
  0x88   : > { %8619 = vmatpush3.bf16.xpose.msk.msra.mxu0 %vm9455_vm1, %v8617_v49  ;;  %v8698_v49 = vpack.c.bf16 %v1075_v44, %v1074_v43  ;;  %v1164_v43 = vld [vmem:[%s9725_s12 + $0x380] sm:$0xff]  ;;  %v1165_v44 = vld [vmem:[%s9725_s12 + $0x388] sm:$0xff] }
  0x89   : > { %8667 = vmatpush3.bf16.xpose.msk.msra.mxu1 %vm9455_vm1, %v8665_v50  ;;  %8622 = vmatprep.subr.msk.bf16.mxu0 %vm9455_vm1, %v8620_v51  ;;  %v8746_v50 = vpack.c.bf16 %v1107_v46, %v1106_v45  ;;  %v1058_v51 = vld [vmem:[%s9725_s12 + $0x30] sm:$0xff] }
  0x8a   : > { %8670 = vmatprep.subr.msk.bf16.mxu1 %vm9455_vm1, %v8668_v53  ;;  %v1059_v53 = vld [vmem:[%s9725_s12 + $0x38] sm:$0xff] }
  0x8b   : > { %v8701_v60 = vpack.c.bf16 %v1059_v53, %v1058_v51  ;;  %v1148_v51 = vld [vmem:[%s9725_s12 + $0x300] sm:$0xff]  ;;  %v1149_v53 = vld [vmem:[%s9725_s12 + $0x308] sm:$0xff] }
  0x90   : > { %8625 = vmatpush3.bf16.xpose.msk.msra.mxu0 %vm9455_vm1, %v8623_v62  ;;  %v8704_v62 = vpack.c.bf16 %v1077_v57, %v1076_v56  ;;  %v1166_v57 = vld [vmem:[%s9725_s12 + $0x390] sm:$0xff] }
  0x91   : > { %8673 = vmatpush3.bf16.xpose.msk.msra.mxu1 %vm9455_vm1, %v8671_v63  ;;  %8628 = vmatprep.subr.msk.bf16.mxu0 %vm9455_vm1, %v8626_v2  ;;  %v8752_v63 = vpack.c.bf16 %v1109_v59, %v1108_v58  ;;  %v1060_v2 = vld [vmem:[%s9725_s12 + $0x40] sm:$0xff]  ;;  %v1167_v58 = vld [vmem:[%s9725_s12 + $0x398] sm:$0xff]  ;;  %v8827_v59 = vpack.c.bf16 %v1149_v53, %v1148_v51 }
  0x92   : > { %8676 = vmatprep.subr.msk.bf16.mxu1 %vm9455_vm1, %v8674_v3  ;;  %v1061_v3 = vld [vmem:[%s9725_s12 + $0x48] sm:$0xff]  ;;  %v1159_v51 = vld [vmem:[%s9725_s12 + $0x358] sm:$0xff]  ;;  %v1144_v53 = vld [vmem:[%s9725_s12 + $0x2e0] sm:$0xff] }
  0x93   : > { %v8707_v10 = vpack.c.bf16 %v1061_v3, %v1060_v2  ;;  %v1119_v2 = vld [vmem:[%s9725_s12 + $0x218] sm:$0xff]  ;;  %v1150_v3 = vld [vmem:[%s9725_s12 + $0x310] sm:$0xff] }
  0x98   : > { %8631 = vmatpush3.bf16.xpose.msk.msra.mxu0 %vm9455_vm1, %v8629_v12  ;;  %v8710_v12 = vpack.c.bf16 %v1079_v7, %v1078_v6  ;;  %v1137_v6 = vld [vmem:[%s9725_s12 + $0x2a8] sm:$0xff]  ;;  %v1168_v7 = vld [vmem:[%s9725_s12 + $0x3a0] sm:$0xff] }
  0x99   : > { %8679 = vmatpush3.bf16.xpose.msk.msra.mxu1 %vm9455_vm1, %v8677_v13  ;;  %8682 = vmatprep.subr.msk.bf16.mxu0 %vm9745_vm3, %v8680_v14  ;;  %v8758_v13 = vpack.c.bf16 %v1111_v9, %v1110_v8  ;;  %v1062_v14 = vld [vmem:[%s9725_s12 + $0x50] sm:$0xff]  ;;  %v1169_v8 = vld [vmem:[%s9725_s12 + $0x3a8] sm:$0xff] }
  0x9a   : > { %8730 = vmatprep.subr.msk.bf16.mxu1 %vm9745_vm3, %v8728_v16  ;;  %v1063_v16 = vld [vmem:[%s9725_s12 + $0x58] sm:$0xff] }
  0x9f   : > { %8305 = vmatmul.mubr.msk.f32.vlgmr.msra.gmra.mrb[4].mxu0 %vm351_vm0, %v9437_v0 }
  0xa0   : > { %8341 = vmatmul.mubr.msk.f32.vlgmr.msra.gmra.mrb[4].mxu1 %vm351_vm0, %v9437_v0  ;;  %8685 = vmatpush3.bf16.xpose.msk.msra.mxu0 %vm9745_vm3, %v8683_v23  ;;  %v1087_v0 = vld [vmem:[%s9725_s12 + $0x118] sm:$0xff]  ;;  %v8713_v23 = vpack.c.bf16 %v1063_v16, %v1062_v14  ;;  %v1121_v14 = vld [vmem:[%s9725_s12 + $0x228] sm:$0xff]  ;;  %v1152_v16 = vld [vmem:[%s9725_s12 + $0x320] sm:$0xff] }
  0xa1   : > { %8733 = vmatpush3.bf16.xpose.msk.msra.mxu1 %vm9745_vm3, %v8731_v25  ;;  %8306 = vmatprep.mubr.msk.f32.mxu0 %vm351_vm0, %v9606_v52  ;;  %v8737_v37 = vpack.c.bf16 %v1087_v0, %v1086_v30  ;;  %v8764_v25 = vpack.c.bf16 %v1113_v22, %v1112_v21  ;;  %v1082_v30 = vld [vmem:[%s9725_s12 + $0xf0] sm:$0xff]  ;;  %v1083_v0 = vld [vmem:[%s9725_s12 + $0xf8] sm:$0xff] }
  0xa2   : > { %8342 = vmatprep.mubr.msk.f32.mxu1 %vm351_vm0, %v9606_v52  ;;  %8688 = vmatprep.subr.msk.bf16.mxu0 %vm9745_vm3, %v8686_v26  ;;  %v1064_v26 = vld [vmem:[%s9725_s12 + $0x60] sm:$0xff]  ;;  %v1171_v21 = vld [vmem:[%s9725_s12 + $0x3b8] sm:$0xff] }
  0xa3   : > { %8307 = vmatmul.mubr.msk.f32.gmra.mrb[6].mxu0 %vm351_vm0, %v9606_v52  ;;  %8736 = vmatprep.subr.msk.bf16.mxu1 %vm9745_vm3, %v8734_v27  ;;  %v1065_v27 = vld [vmem:[%s9725_s12 + $0x68] sm:$0xff] }
  0xa4   : > { %8343 = vmatmul.mubr.msk.f32.gmra.mrb[6].mxu1 %vm351_vm0, %v9606_v52  ;;  %8376 = vmatprep.mubr.msk.f32.mxu0 %vm1180_vm2, %v9781_v31  ;;  %v1056_v52 = vld [vmem:[%s9725_s12 + $0x20] sm:$0xff]  ;;  %v8719_v34 = vpack.c.bf16 %v1065_v27, %v1064_v26  ;;  %v1123_v26 = vld [vmem:[%s9725_s12 + $0x238] sm:$0xff]  ;;  %v1154_v27 = vld [vmem:[%s9725_s12 + $0x330] sm:$0xff] }
  0xa5   : > { %8412 = vmatprep.mubr.msk.f32.mxu1 %vm1180_vm2, %v9781_v31  ;;  %v8695_v47 = vpack.c.bf16 %v1057_v40, %v1056_v52  ;;  %v1098_v52 = vld [vmem:[%s9725_s12 + $0x170] sm:$0xff]  ;;  %v1099_v40 = vld [vmem:[%s9725_s12 + $0x178] sm:$0xff] }
  0xa6   : > { %v8773_v46 = vpack.c.bf16 %v1099_v40, %v1098_v52  ;;  %v1157_v52 = vld [vmem:[%s9725_s12 + $0x348] sm:$0xff]  ;;  %v1142_v40 = vld [vmem:[%s9725_s12 + $0x2d0] sm:$0xff] }
  0xa8   : > { %8691 = vmatpush3.bf16.xpose.msk.msra.mxu0 %vm9745_vm3, %v8689_v36  ;;  %v8722_v36 = vpack.c.bf16 %v1083_v0, %v1082_v30  ;;  %v1141_v30 = vld [vmem:[%s9725_s12 + $0x2c8] sm:$0xff]  ;;  %v1172_v0 = vld [vmem:[%s9725_s12 + $0x3c0] sm:$0xff] }
  0xa9   : > { %8739 = vmatpush3.bf16.xpose.msk.msra.mxu1 %vm9745_vm3, %v8737_v37  ;;  %8694 = vmatprep.subr.msk.bf16.mxu0 %vm9745_vm3, %v8692_v38  ;;  %v8770_v37 = vpack.c.bf16 %v1115_v33, %v1114_v32  ;;  %v1066_v38 = vld [vmem:[%s9725_s12 + $0x70] sm:$0xff]  ;;  %v1173_v32 = vld [vmem:[%s9725_s12 + $0x3c8] sm:$0xff] }
  0xaa   : > { %8742 = vmatprep.subr.msk.bf16.mxu1 %vm9745_vm3, %v8740_v39  ;;  %v1067_v39 = vld [vmem:[%s9725_s12 + $0x78] sm:$0xff] }
  0xab   : > { %v8725_v45 = vpack.c.bf16 %v1067_v39, %v1066_v38  ;;  %v1125_v38 = vld [vmem:[%s9725_s12 + $0x248] sm:$0xff]  ;;  %v1156_v39 = vld [vmem:[%s9725_s12 + $0x340] sm:$0xff] }
  0xb0   : > { %8697 = vmatpush3.bf16.xpose.msk.msra.mxu0 %vm9745_vm3, %v8695_v47  ;;  %v8776_v47 = vpack.c.bf16 %v1133_v42, %v1132_v41  ;;  %v1143_v41 = vld [vmem:[%s9725_s12 + $0x2d8] sm:$0xff]  ;;  %v1174_v42 = vld [vmem:[%s9725_s12 + $0x3d0] sm:$0xff] }
  0xb1   : > { %8745 = vmatpush3.bf16.xpose.msk.msra.mxu1 %vm9745_vm3, %v8743_v48  ;;  %8700 = vmatprep.subr.msk.bf16.mxu0 %vm9745_vm3, %v8698_v49  ;;  %v8824_v48 = vpack.c.bf16 %v1165_v44, %v1164_v43  ;;  %v1116_v49 = vld [vmem:[%s9725_s12 + $0x200] sm:$0xff]  ;;  %v1175_v43 = vld [vmem:[%s9725_s12 + $0x3d8] sm:$0xff] }
  0xb2   : > { %8748 = vmatprep.subr.msk.bf16.mxu1 %vm9745_vm3, %v8746_v50  ;;  %v1117_v50 = vld [vmem:[%s9725_s12 + $0x208] sm:$0xff] }
  0xb3   : > { %v8779_v56 = vpack.c.bf16 %v1117_v50, %v1116_v49  ;;  %v1127_v49 = vld [vmem:[%s9725_s12 + $0x258] sm:$0xff]  ;;  %v1158_v50 = vld [vmem:[%s9725_s12 + $0x350] sm:$0xff] }
  0xb8   : > { %8703 = vmatpush3.bf16.xpose.msk.msra.mxu0 %vm9745_vm3, %v8701_v60  ;;  %v9917_v60 = vld [vmem:[%s13048_s2 + $0x18] sm:$0xff] }
  0xb9   : > { %8751 = vmatpush3.bf16.xpose.msk.msra.mxu1 %vm9745_vm3, %v8749_v61  ;;  %8706 = vmatprep.subr.msk.bf16.mxu0 %vm9745_vm3, %v8704_v62  ;;  %v8782_v61 = vpack.c.bf16 %v1135_v55, %v1134_v54  ;;  %v8830_v62 = vpack.c.bf16 %v1167_v58, %v1166_v57  ;;  %v1145_v54 = vld [vmem:[%s9725_s12 + $0x2e8] sm:$0xff]  ;;  %v1176_v55 = vld [vmem:[%s9725_s12 + $0x3e0] sm:$0xff]  ;;  %v8857_v58 = vpack.c.bf16 %v1159_v51, %v1158_v50  ;;  %v13053_v51 = vmov 2475754826  }
  0xba   : > { %8754 = vmatprep.subr.msk.bf16.mxu1 %vm9745_vm3, %v8752_v63  ;;  %v1118_v63 = vld [vmem:[%s9725_s12 + $0x210] sm:$0xff] }
  0xbb   : > { %v8785_v9 = vpack.c.bf16 %v1119_v2, %v1118_v63  ;;  %v1129_v63 = vld [vmem:[%s9725_s12 + $0x268] sm:$0xff]  ;;  %v1160_v2 = vld [vmem:[%s9725_s12 + $0x360] sm:$0xff] }
  0xc0   : > { %8709 = vmatpush3.bf16.xpose.msk.msra.mxu0 %vm9745_vm3, %v8707_v10  ;;  %v8833_v10 = vpack.c.bf16 %v1151_v4, %v1150_v3  ;;  %v1161_v3 = vld [vmem:[%s9725_s12 + $0x368] sm:$0xff]  ;;  %v1146_v4 = vld [vmem:[%s9725_s12 + $0x2f0] sm:$0xff] }
  0xc1   : > { %8757 = vmatpush3.bf16.xpose.msk.msra.mxu1 %vm9745_vm3, %v8755_v11  ;;  %8712 = vmatprep.subr.msk.bf16.mxu0 %vm9745_vm3, %v8710_v12  ;;  %v8788_v11 = vpack.c.bf16 %v1137_v6, %v1136_v5  ;;  %v8836_v12 = vpack.c.bf16 %v1169_v8, %v1168_v7  ;;  %v1147_v5 = vld [vmem:[%s9725_s12 + $0x2f8] sm:$0xff]  ;;  %v1178_v6 = vld [vmem:[%s9725_s12 + $0x3f0] sm:$0xff] }
  0xc2   : > { %8760 = vmatprep.subr.msk.bf16.mxu1 %vm9745_vm3, %v8758_v13  ;;  %v1120_v13 = vld [vmem:[%s9725_s12 + $0x220] sm:$0xff]  ;;  %v1179_v7 = vld [vmem:[%s9725_s12 + $0x3f8] sm:$0xff] }
  0xc3   : > { %v8791_v22 = vpack.c.bf16 %v1121_v14, %v1120_v13  ;;  %v1131_v13 = vld [vmem:[%s9725_s12 + $0x278] sm:$0xff]  ;;  %v1162_v14 = vld [vmem:[%s9725_s12 + $0x370] sm:$0xff] }
  0xc8   : > { %8715 = vmatpush3.bf16.xpose.msk.msra.mxu0 %vm9745_vm3, %v8713_v23  ;;  %v8839_v23 = vpack.c.bf16 %v1153_v17, %v1152_v16  ;;  %v1163_v16 = vld [vmem:[%s9725_s12 + $0x378] sm:$0xff] }
  0xc9   : > { %8763 = vmatpush3.bf16.xpose.msk.msra.mxu1 %vm9745_vm3, %v8761_v24  ;;  %8718 = vmatprep.subr.msk.bf16.mxu0 %vm9745_vm3, %v8716_v1  ;;  %v8794_v24 = vpack.c.bf16 %v1139_v19, %v1138_v18  ;;  %v8842_v1 = vpack.c.bf16 %v1171_v21, %v1170_v20  ;;  %v8869_v18 = vpack.c.bf16 %v1163_v16, %v1162_v14 }
  0xca   : > { %8766 = vmatprep.subr.msk.bf16.mxu1 %vm9745_vm3, %v8764_v25  ;;  %v1122_v25 = vld [vmem:[%s9725_s12 + $0x230] sm:$0xff] }
  0xcb   : > { %v8797_v33 = vpack.c.bf16 %v1123_v26, %v1122_v25 }
  0xd0   : > { %8721 = vmatpush3.bf16.xpose.msk.msra.mxu0 %vm9745_vm3, %v8719_v34  ;;  %v8845_v34 = vpack.c.bf16 %v1155_v28, %v1154_v27 }
  0xd1   : > { %8769 = vmatpush3.bf16.xpose.msk.msra.mxu1 %vm9745_vm3, %v8767_v35  ;;  %8724 = vmatprep.subr.msk.bf16.mxu0 %vm9745_vm3, %v8722_v36  ;;  %v8800_v35 = vpack.c.bf16 %v1141_v30, %v1140_v29  ;;  %v8848_v36 = vpack.c.bf16 %v1173_v32, %v1172_v0 }
  0xd2   : > { %8772 = vmatprep.subr.msk.bf16.mxu1 %vm9745_vm3, %v8770_v37  ;;  %v1124_v37 = vld [vmem:[%s9725_s12 + $0x240] sm:$0xff] }
  0xd3   : > { %v8803_v44 = vpack.c.bf16 %v1125_v38, %v1124_v37 }
  0xd8   : > { %8727 = vmatpush3.bf16.xpose.msk.msra.mxu0 %vm9745_vm3, %v8725_v45  ;;  %v8851_v45 = vpack.c.bf16 %v1157_v52, %v1156_v39 }
  0xd9   : > { %8775 = vmatpush3.bf16.xpose.msk.msra.mxu1 %vm9745_vm3, %v8773_v46  ;;  %8778 = vmatprep.subr.msk.bf16.mxu0 %vm9745_vm3, %v8776_v47  ;;  %v8806_v46 = vpack.c.bf16 %v1143_v41, %v1142_v40  ;;  %v8854_v47 = vpack.c.bf16 %v1175_v43, %v1174_v42 }
  0xda   : > { %8826 = vmatprep.subr.msk.bf16.mxu1 %vm9745_vm3, %v8824_v48  ;;  %v1126_v48 = vld [vmem:[%s9725_s12 + $0x250] sm:$0xff] }
  0xdb   : > { %v8809_v57 = vpack.c.bf16 %v1127_v49, %v1126_v48 }
  0xdf   : > { %8377 = vmatmul.mubr.msk.f32.vlgmr.msra.gmra.mrb[8].mxu0 %vm1180_vm2, %v9781_v31 }
  0xe0   : > { %8413 = vmatmul.mubr.msk.f32.vlgmr.msra.gmra.mrb[8].mxu1 %vm1180_vm2, %v9781_v31  ;;  %8781 = vmatpush3.bf16.xpose.msk.msra.mxu0 %vm9745_vm3, %v8779_v56  ;;  %v1177_v56 = vld [vmem:[%s9725_s12 + $0x3e8] sm:$0xff] }
  0xe1   : > { %8829 = vmatpush3.bf16.xpose.msk.msra.mxu1 %vm9745_vm3, %v8827_v59  ;;  %8378 = vmatprep.mubr.msk.f32.mxu0 %vm1180_vm2, %v9917_v60  ;;  %v8812_v59 = vpack.c.bf16 %v1145_v54, %v1144_v53  ;;  %v13060_v54 = vmov 2131351028  }
  0xe2   : > { %8414 = vmatprep.mubr.msk.f32.mxu1 %vm1180_vm2, %v9917_v60  ;;  %8784 = vmatprep.subr.msk.bf16.mxu0 %vm9745_vm3, %v8782_v61  ;;  %v8860_v61 = vpack.c.bf16 %v1177_v56, %v1176_v55  ;;  %v13066_v56 = vmov 2102212464  }
  0xe3   : > { %8379 = vmatmul.mubr.msk.f32.gmra.mrb[10].mxu0 %vm1180_vm2, %v9917_v60  ;;  %8832 = vmatprep.subr.msk.bf16.mxu1 %vm9745_vm3, %v8830_v62  ;;  %v1128_v62 = vld [vmem:[%s9725_s12 + $0x260] sm:$0xff] }
  0xe4   : > { %8415 = vmatmul.mubr.msk.f32.gmra.mrb[10].mxu1 %vm1180_vm2, %v9917_v60  ;;  %8448 = vmatprep.mubr.msk.f32.mxu0 %vm1180_vm2, %v9781_v31  ;;  %v8815_v8 = vpack.c.bf16 %v1129_v63, %v1128_v62 }
  0xe5   : > { %8484 = vmatprep.mubr.msk.f32.mxu1 %vm1180_vm2, %v9781_v31 }
  0xe8   : > { %8787 = vmatpush3.bf16.xpose.msk.msra.mxu0 %vm9745_vm3, %v8785_v9  ;;  %v8863_v9 = vpack.c.bf16 %v1161_v3, %v1160_v2 }
  0xe9   : > { %8835 = vmatpush3.bf16.xpose.msk.msra.mxu1 %vm9745_vm3, %v8833_v10  ;;  %8790 = vmatprep.subr.msk.bf16.mxu0 %vm9745_vm3, %v8788_v11  ;;  %v8818_v10 = vpack.c.bf16 %v1147_v5, %v1146_v4  ;;  %v8866_v11 = vpack.c.bf16 %v1179_v7, %v1178_v6  ;;  %v13063_v4 = vmov 1326507024  }
  0xea   : > { %8838 = vmatprep.subr.msk.bf16.mxu1 %vm9745_vm3, %v8836_v12  ;;  %v1130_v12 = vld [vmem:[%s9725_s12 + $0x270] sm:$0xff]  ;;  %s9287_s12 = scalar_lea.vmem %s9286_s11, 2048 }
  0xeb   : > { %v8821_v17 = vpack.c.bf16 %v1131_v13, %v1130_v12  ;;  %p9289_p1 = scmp.lt.s32.totalorder %s9287_s12, %s9281_s9 }
  0xed   : > { %p9290_p2 = por %p9289_p1, %p9288_p0 }
  0xef   : > { %p9291_p3 = pnand %p9290_p2, %p9284_p13 }
  0xf0   : > { %8793 = vmatpush3.bf16.xpose.msk.msra.mxu0 %vm9745_vm3, %v8791_v22 }
  0xf1   : > { %8841 = vmatpush3.bf16.xpose.msk.msra.mxu1 %vm9745_vm3, %v8839_v23  ;;  %8796 = vmatprep.subr.msk.bf16.mxu0 %vm9745_vm3, %v8794_v24 }
  0xf2   : > { %8844 = vmatprep.subr.msk.bf16.mxu1 %vm9745_vm3, %v8842_v1 }
  0xf8   : > { %8799 = vmatpush3.bf16.xpose.msk.msra.mxu0 %vm9745_vm3, %v8797_v33 }
  0xf9   : > { %8847 = vmatpush3.bf16.xpose.msk.msra.mxu1 %vm9745_vm3, %v8845_v34  ;;  %8802 = vmatprep.subr.msk.bf16.mxu0 %vm9745_vm3, %v8800_v35 }
  0xfa   : > { %8850 = vmatprep.subr.msk.bf16.mxu1 %vm9745_vm3, %v8848_v36 }
 0x100   : > { %8805 = vmatpush3.bf16.xpose.msk.msra.mxu0 %vm9745_vm3, %v8803_v44 }
 0x101   : > { %8853 = vmatpush3.bf16.xpose.msk.msra.mxu1 %vm9745_vm3, %v8851_v45  ;;  %8808 = vmatprep.subr.msk.bf16.mxu0 %vm9745_vm3, %v8806_v46 }
 0x102   : > { %8856 = vmatprep.subr.msk.bf16.mxu1 %vm9745_vm3, %v8854_v47  ;;  %v13055_v47 = vmov 683565275  }
 0x108   : > { %8811 = vmatpush3.bf16.xpose.msk.msra.mxu0 %vm9745_vm3, %v8809_v57 }
 0x109   : > { %8859 = vmatpush3.bf16.xpose.msk.msra.mxu1 %vm9745_vm3, %v8857_v58  ;;  %8814 = vmatprep.subr.msk.bf16.mxu0 %vm9745_vm3, %v8812_v59  ;;  %v13070_v58 = vmov 920167782  }
 0x10a   : > { %8862 = vmatprep.subr.msk.bf16.mxu1 %vm9745_vm3, %v8860_v61 }
 0x110   : > { %8817 = vmatpush3.bf16.xpose.msk.msra.mxu0 %vm9745_vm3, %v8815_v8 }
 0x111   : > { %8865 = vmatpush3.bf16.xpose.msk.msra.mxu1 %vm9745_vm3, %v8863_v9  ;;  %8820 = vmatprep.subr.msk.bf16.mxu0 %vm9745_vm3, %v8818_v10 }
 0x112   : > { %8868 = vmatprep.subr.msk.bf16.mxu1 %vm9745_vm3, %v8866_v11 }
 0x118   : > { %8823 = vmatpush3.bf16.xpose.msk.msra.mxu0 %vm9745_vm3, %v8821_v17 }
 0x119   : > { %8871 = vmatpush3.bf16.xpose.msk.msra.mxu1 %vm9745_vm3, %v8869_v18 }
 0x11f   : > { %8449 = vmatmul.mubr.msk.f32.vlgmr.msra.gmra.mrb[12].mxu0 %vm1180_vm2, %v9781_v31 }
 0x120   : > { %8485 = vmatmul.mubr.msk.f32.vlgmr.msra.gmra.mrb[12].mxu1 %vm1180_vm2, %v9781_v31  ;;  %8450 = vmatprep.mubr.msk.f32.mxu0 %vm1180_vm2, %v9917_v60 }
 0x121   : > { %8486 = vmatprep.mubr.msk.f32.mxu1 %vm1180_vm2, %v9917_v60 }
 0x123   : > { %8451 = vmatmul.mubr.msk.f32.gmra.mrb[14].mxu0 %vm1180_vm2, %v9917_v60 }
 0x124   : > { %8487 = vmatmul.mubr.msk.f32.gmra.mrb[14].mxu1 %vm1180_vm2, %v9917_v60 }
 0x132   : > { %v10059_v15 = vpop.f32.mrb[0].mxu0 }
 0x133   : > { %v1927_v19 = vand.u32 2147483647, %v10059_v15  ;;  %v1930_v20 = vand.u32 2139095040, %v10059_v15  ;;  %v10063_v21 = vpop.f32.mrb[0].mxu1  ;;  %v10065_v31 = vpop.f32.mrb[1].mxu0 }
 0x134   : > { %v2133_v22 = vand.u32 2147483647, %v10063_v21  ;;  %v2136_v23 = vand.u32 2139095040, %v10063_v21  ;;  %v10069_v24 = vpop.f32.mrb[1].mxu1  ;;  %v2033_v27 = vand.u32 2139095040, %v10065_v31 }
 0x135   : > { %13138 = vst [vmem:[#allocation5_spill] sm:$0xff] %v10069_v24  ;;  %v1931_v1 = vshrl.u32 %v1930_v20, 23  ;;  %v1934_v60 = vand.u32 8388607, %v1927_v19 }
 0x136   : > { %v2137_v25 = vshrl.u32 %v2136_v23, 23  ;;  %v2140_v26 = vand.u32 8388607, %v2133_v22  ;;  %v2034_v30 = vshrl.u32 %v2033_v27, 23  ;;  %v10076_v0 = vpop.f32.mrb[2].mxu0 }
 0x137   : > { %v7998_v28 = vadd.s32 4294967169, %v1931_v1  ;;  %v10078_v32 = vpop.f32.mrb[2].mxu1  ;;  %v1935_v34 = vor.u32 8388608, %v1934_v60  ;;  %v10080_v38 = vpop.f32.mrb[3].mxu0 }
 0x138   : > { %v8006_v29 = vadd.s32 4294967169, %v2137_v25  ;;  %v2141_v35 = vor.u32 8388608, %v2140_v26  ;;  %v8002_v37 = vadd.s32 4294967169, %v2034_v30  ;;  %v10082_v39 = vpop.f32.mrb[3].mxu1 }
 0x139   : > { %v1937_v33 = vadd.s32 1, %v7998_v28  ;;  %13139 = vst [vmem:[#allocation6_spill] sm:$0xff] %v10082_v39  ;;  %v10084_v43 = vshll.u32 %v1935_v34, 8 }
 0x13a   : > { %v2143_v36 = vadd.s32 1, %v8006_v29  ;;  %v10086_v44 = vshll.u32 %v2141_v35, 8  ;;  %v10088_v45 = vadd.s32 1, %v8002_v37 }
 0x13b   : > { %vm1938_vm4 = vcmp.gt.s32.totalorder %v1937_v33, 0 }
 0x13c   : > { %v1939_v52 = vsel %vm1938_vm4, %v1937_v33, 0  ;;  %vm2144_vm5 = vcmp.gt.s32.totalorder %v2143_v36, 0  ;;  %vm2041_vm10 = vcmp.gt.s32.totalorder %v10088_v45, 0 }
 0x13d   : > { %v1940_v40 = vshrl.u32 %v1939_v52, 5  ;;  %v1941_v41 = vand.u32 31, %v1939_v52  ;;  %v2145_v42 = vsel %vm2144_vm5, %v2143_v36, 0 }
 0x13e   : > { %v10091_v49 = vshrl.u32 %v2145_v42, 5  ;;  %v2147_v50 = vand.u32 31, %v2145_v42 }
 0x13f   : > { %v1942_v46 = vsub.s32 32, %v1941_v41  ;;  %v1944_v48 = vshll.u32 %v13055_v47, %v1941_v41  ;;  %v1947_v53 = vshll.u32 %v13053_v51, %v1941_v41  ;;  %v1950_v55 = vshll.u32 %v13060_v54, %v1941_v41 }
 0x140   : > { %v1953_v57 = vshll.u32 %v13066_v56, %v1941_v41  ;;  %v1956_v59 = vshll.u32 %v13070_v58, %v1941_v41  ;;  %vm1959_vm6 = vcmp.lt.s32.totalorder %v1940_v40, 1  ;;  %vm1960_vm7 = vcmp.lt.s32.totalorder %v1940_v40, 2 }
 0x141   : > { %v1945_v61 = vshrl.u32 %v13053_v51, %v1942_v46  ;;  %v1948_v62 = vshrl.u32 %v13060_v54, %v1942_v46  ;;  %v1951_v63 = vshrl.u32 %v13066_v56, %v1942_v46  ;;  %v1943_v2 = vshrl.u32 %v13055_v47, %v1942_v46 }
 0x142   : > { %v1954_v3 = vshrl.u32 %v13070_v58, %v1942_v46  ;;  %v1957_v5 = vshrl.u32 %v13063_v4, %v1942_v46  ;;  %v2148_v9 = vsub.s32 32, %v2147_v50  ;;  %vm1961_vm8 = vcmp.lt.s32.totalorder %v1940_v40, 3 }
 0x143   : > { %v1946_v6 = vor.u32 %v1945_v61, %v1944_v48  ;;  %v1949_v7 = vor.u32 %v1948_v62, %v1947_v53  ;;  %v1952_v8 = vor.u32 %v1951_v63, %v1950_v55  ;;  %vm1962_vm9 = vcmp.lt.s32.totalorder %v1940_v40, 4 }
 0x144   : > { %v1955_v10 = vor.u32 %v1954_v3, %v1953_v57  ;;  %v1958_v11 = vor.u32 %v1957_v5, %v1956_v59  ;;  %v2150_v23 = vshll.u32 %v13055_v47, %v2147_v50  ;;  %v2151_v25 = vshrl.u32 %v13053_v51, %v2148_v9 }
 0x145   : > { %v1963_v12 = vsel %vm1959_vm6, %v1943_v2, %v1946_v6  ;;  %v1964_v13 = vsel %vm1962_vm9, %v1952_v8, 2102212464  ;;  %v1967_v14 = vsel %vm1959_vm6, %v1946_v6, %v1949_v7  ;;  %v1971_v16 = vsel %vm1959_vm6, %v1949_v7, %v1952_v8 }
 0x146   : > { %v1965_v17 = vsel %vm1961_vm8, %v1949_v7, %v1964_v13  ;;  %v1968_v18 = vsel %vm1962_vm9, %v1955_v10, 920167782  ;;  %v1972_v20 = vsel %vm1962_vm9, %v1958_v11, 1326507024  ;;  %v2153_v26 = vshll.u32 %v13053_v51, %v2147_v50 }
 0x147   : > { %v1969_v1 = vsel %vm1961_vm8, %v1952_v8, %v1968_v18  ;;  %v1973_v60 = vsel %vm1961_vm8, %v1955_v10, %v1972_v20  ;;  %v1966_v27 = vsel %vm1960_vm7, %v1963_v12, %v1965_v17  ;;  %v2154_v30 = vshrl.u32 %v13060_v54, %v2148_v9 }
 0x148   : > { %v1970_v28 = vsel %vm1960_vm7, %v1967_v14, %v1969_v1  ;;  %v1974_v29 = vsel %vm1960_vm7, %v1971_v16, %v1973_v60  ;;  %v2152_v37 = vor.u32 %v2151_v25, %v2150_v23  ;;  %v2156_v41 = vshll.u32 %v13060_v54, %v2147_v50 }
 0x149   : > { %v10115_v33 = vmul.u32.u64.low %v10084_v43, %v1974_v29  ;;  %v10116_v34 = vmul.u32.u64.high %v10084_v43, %v1974_v29, %v10115_v33  ;;  %v10119_v35 = vmul.u32.u64.low %v10084_v43, %v1970_v28  ;;  %v10120_v36 = vmul.u32.u64.high %v10084_v43, %v1970_v28, %v10119_v35 }
 0x14a   : > { %v2155_v52 = vor.u32 %v2154_v30, %v2153_v26  ;;  %v2157_v42 = vshrl.u32 %v13066_v56, %v2148_v9  ;;  %v2149_v40 = vshrl.u32 %v13055_v47, %v2148_v9  ;;  %v2159_v46 = vshll.u32 %v13066_v56, %v2147_v50 }
 0x14b   : > { %v2160_v48 = vshrl.u32 %v13070_v58, %v2148_v9  ;;  %v2163_v53 = vshrl.u32 %v13063_v4, %v2148_v9  ;;  %v1982_v55 = vmul.u32 %v10084_v43, %v1966_v27  ;;  %v2162_v59 = vshll.u32 %v13070_v58, %v2147_v50 }
 0x14c   : > { %v2158_v57 = vor.u32 %v2157_v42, %v2156_v41  ;;  %vm2165_vm11 = vcmp.lt.s32.totalorder %v10091_v49, 1  ;;  %vm1984_vm12 = vc.u32 %v10116_v34, %v10119_v35  ;;  %v1985_v61 = vadd.s32 1, %v10120_v36 }
 0x14d   : > { %v2161_v62 = vor.u32 %v2160_v48, %v2159_v46  ;;  %vm2166_vm13 = vcmp.lt.s32.totalorder %v10091_v49, 2  ;;  %v2164_v63 = vor.u32 %v2163_v53, %v2162_v59  ;;  %vm2167_vm14 = vcmp.lt.s32.totalorder %v10091_v49, 3 }
 0x14e   : > { %vm2168_vm15 = vcmp.lt.s32.totalorder %v10091_v49, 4  ;;  %v2173_v2 = vsel %vm2165_vm11, %v2152_v37, %v2155_v52  ;;  %v1986_v43 = vsel %vm1984_vm12, %v1985_v61, %v10120_v36  ;;  %v2177_v5 = vsel %vm2165_vm11, %v2155_v52, %v2158_v57 }
 0x14f   : > { %v2170_v3 = vsel %vm2168_vm15, %v2158_v57, 2102212464  ;;  %v2174_v50 = vsel %vm2168_vm15, %v2161_v62, 920167782  ;;  %v1987_v6 = vadd.s32 %v1986_v43, %v1982_v55  ;;  %v2169_v7 = vsel %vm2165_vm11, %v2149_v40, %v2152_v37 }
 0x150   : > { %v2175_v8 = vsel %vm2167_vm14, %v2158_v57, %v2174_v50  ;;  %v2178_v9 = vsel %vm2168_vm15, %v2164_v63, 1326507024  ;;  %v2171_v10 = vsel %vm2167_vm14, %v2155_v52, %v2170_v3  ;;  %v2042_v13 = vsel %vm2041_vm10, %v10088_v45, 0 }
 0x151   : > { %v2176_v11 = vsel %vm2166_vm13, %v2173_v2, %v2175_v8  ;;  %v2179_v12 = vsel %vm2167_vm14, %v2161_v62, %v2178_v9  ;;  %v1988_v14 = vadd.s32 536870912, %v1987_v6  ;;  %v2172_v60 = vsel %vm2166_vm13, %v2169_v7, %v2171_v10 }
 0x152   : > { %v2180_v16 = vsel %vm2166_vm13, %v2177_v5, %v2179_v12  ;;  %v10147_v17 = vmul.u32.u64.low %v10086_v44, %v2176_v11  ;;  %v10148_v18 = vmul.u32.u64.high %v10086_v44, %v2176_v11, %v10147_v17  ;;  %v2044_v25 = vand.u32 31, %v2042_v13 }
 0x153   : > { %v10152_v20 = vmul.u32.u64.low %v10086_v44, %v2180_v16  ;;  %v10153_v23 = vmul.u32.u64.high %v10086_v44, %v2180_v16, %v10152_v20  ;;  %v10155_v1 = vshrl.u32 %v1988_v14, 30  ;;  %v2188_v27 = vmul.u32 %v10086_v44, %v2172_v60 }
 0x154   : > { %v2191_v26 = vadd.s32 1, %v10148_v18  ;;  %v2030_v30 = vand.u32 2147483647, %v10065_v31  ;;  %v2045_v36 = vsub.s32 32, %v2044_v25  ;;  %v2043_v44 = vshrl.u32 %v2042_v13, 5 }
 0x155   : > { %v1990_v45 = vshll.u32 %v10155_v1, 30  ;;  %vm2190_vm0 = vc.u32 %v10153_v23, %v10147_v17  ;;  %v2056_v55 = vshll.u32 %v13066_v56, %v2044_v25  ;;  %v2239_v59 = vand.u32 2139095040, %v10069_v24 }
 0x156   : > { %v2192_v29 = vsel %vm2190_vm0, %v2191_v26, %v10148_v18  ;;  %v2037_v41 = vand.u32 8388607, %v2030_v30  ;;  %v2048_v40 = vshrl.u32 %v13053_v51, %v2045_v36  ;;  %v2051_v46 = vshrl.u32 %v13060_v54, %v2045_v36 }
 0x157   : > { %v10164_v28 = vsub.s32 %v1987_v6, %v1990_v45  ;;  %v2193_v33 = vadd.s32 %v2192_v29, %v2188_v27  ;;  %v2054_v48 = vshrl.u32 %v13066_v56, %v2045_v36  ;;  %v2057_v57 = vshrl.u32 %v13070_v58, %v2045_v36 }
 0x158   : > { %v2047_v62 = vshll.u32 %v13055_v47, %v2044_v25  ;;  %v2050_v63 = vshll.u32 %v13053_v51, %v2044_v25  ;;  %v2053_v2 = vshll.u32 %v13060_v54, %v2044_v25  ;;  %v2060_v50 = vshrl.u32 %v13063_v4, %v2045_v36 }
 0x159   : > { %v1993_v49 = vsub.s32 0, %v10164_v28  ;;  %v2194_v37 = vadd.s32 536870912, %v2193_v33  ;;  %v2058_v3 = vor.u32 %v2057_v57, %v2056_v55  ;;  %vm2065_vm1 = vcmp.lt.s32.totalorder %v2043_v44, 4 }
 0x15a   : > { %v2049_v6 = vor.u32 %v2048_v40, %v2047_v62  ;;  %v2052_v7 = vor.u32 %v2051_v46, %v2050_v63  ;;  %v2055_v8 = vor.u32 %v2054_v48, %v2053_v2  ;;  %v2059_v9 = vshll.u32 %v13070_v58, %v2044_v25 }
 0x15b   : > { %v7999_v52 = vmin.u32 %v1993_v49, %v10164_v28  ;;  %v10172_v42 = vshrl.u32 %v2194_v37, 30  ;;  %v2071_v10 = vsel %vm2065_vm1, %v2058_v3, 920167782  ;;  %v2240_v11 = vshrl.u32 %v2239_v59, 23 }
 0x15c   : > { %v2061_v14 = vor.u32 %v2060_v50, %v2059_v9  ;;  %vm2062_vm3 = vcmp.lt.s32.totalorder %v2043_v44, 1  ;;  %vm2064_vm4 = vcmp.lt.s32.totalorder %v2043_v44, 3  ;;  %v2038_v18 = vor.u32 8388608, %v2037_v41 }
 0x15d   : > { %v1995_v53 = vclz %v7999_v52  ;;  %v2196_v61 = vshll.u32 %v10172_v42, 30  ;;  %v2070_v20 = vsel %vm2062_vm3, %v2049_v6, %v2052_v7  ;;  %v2072_v60 = vsel %vm2064_vm4, %v2055_v8, %v2071_v10 }
 0x15e   : > { %v8010_v26 = vadd.s32 4294967169, %v2240_v11  ;;  %v2046_v25 = vshrl.u32 %v13055_v47, %v2045_v36  ;;  %vm2063_vm5 = vcmp.lt.s32.totalorder %v2043_v44, 2  ;;  %v2067_v29 = vsel %vm2065_vm1, %v2055_v8, 2102212464 }
 0x15f   : > { %v8000_v43 = vadd.s32 4294967294, %v1995_v53  ;;  %v10185_v5 = vsub.s32 %v2193_v33, %v2196_v61  ;;  %v2073_v33 = vsel %vm2063_vm5, %v2070_v20, %v2072_v60  ;;  %v2074_v49 = vsel %vm2062_vm3, %v2052_v7, %v2055_v8 }
 0x160   : > { %v2075_v37 = vsel %vm2065_vm1, %v2061_v14, 1326507024  ;;  %v2066_v41 = vsel %vm2062_vm3, %v2046_v25, %v2049_v6  ;;  %v2078_v40 = vshll.u32 %v2038_v18, 8  ;;  %v2068_v48 = vsel %vm2064_vm4, %v2052_v7, %v2067_v29 }
 0x161   : > { %vm8001_vm2 = vcmp.lt.s32.totalorder %v8000_v43, 0  ;;  %v2199_v13 = vsub.s32 0, %v10185_v5  ;;  %v2076_v53 = vsel %vm2064_vm4, %v2058_v3, %v2075_v37  ;;  %v2246_v55 = vadd.s32 1, %v8010_v26 }
 0x162   : > { %v1998_v12 = vsel %vm8001_vm2, 0, %v8000_v43  ;;  %v2077_v36 = vsel %vm2063_vm5, %v2074_v49, %v2076_v53  ;;  %v10202_v57 = vmul.u32.u64.low %v2078_v40, %v2073_v33  ;;  %v10203_v59 = vmul.u32.u64.high %v2078_v40, %v2073_v33, %v10202_v57 }
 0x163   : > { %v8007_v16 = vmin.u32 %v2199_v13, %v10185_v5  ;;  %v2003_v45 = vsub.s32 4294967266, %v1998_v12  ;;  %v10206_v61 = vmul.u32.u64.low %v2078_v40, %v2077_v36  ;;  %v10207_v62 = vmul.u32.u64.high %v2078_v40, %v2077_v36, %v10206_v61 }
 0x164   : > { %v1999_v63 = vsub.s32 32, %v1998_v12  ;;  %v2069_v2 = vsel %vm2063_vm5, %v2066_v41, %v2068_v48  ;;  %vm2247_vm7 = vcmp.gt.s32.totalorder %v2246_v55, 0  ;;  %v1983_v3 = vadd.s32 %v10119_v35, %v10116_v34 }
 0x165   : > { %v2201_v27 = vclz %v8007_v16  ;;  %v2004_v46 = vadd.s32 127, %v2003_v45  ;;  %v2248_v50 = vsel %vm2247_vm7, %v2246_v55, 0  ;;  %v2088_v7 = vadd.s32 1, %v10203_v59 }
 0x166   : > { %v2085_v8 = vmul.u32 %v2078_v40, %v2069_v2  ;;  %vm2087_vm8 = vc.u32 %v10207_v62, %v10202_v57  ;;  %v2250_v9 = vand.u32 31, %v2248_v50  ;;  %v2001_v10 = vshrl.u32 %v1983_v3, %v1999_v63 }
 0x167   : > { %v8008_v52 = vadd.s32 4294967294, %v2201_v27  ;;  %v2005_v43 = vshll.u32 %v2004_v46, 23  ;;  %v2089_v11 = vsel %vm2087_vm8, %v2088_v7, %v10203_v59  ;;  %v13057_v44 = vand.u32 2147483647, %v10069_v24 }
 0x168   : > { %v2090_v16 = vadd.s32 %v2089_v11, %v2085_v8  ;;  %v2251_v18 = vsub.s32 32, %v2250_v9  ;;  %v2000_v20 = vshll.u32 %v10164_v28, %v1998_v12  ;;  %v2262_v49 = vshll.u32 %v13066_v56, %v2250_v9 }
 0x169   : > { %vm8009_vm6 = vcmp.lt.s32.totalorder %v8008_v52, 0  ;;  %v2006_v13 = vor.u32 4788187, %v2005_v43  ;;  %v2243_v60 = vand.u32 8388607, %v13057_v44  ;;  %v2249_v12 = vshrl.u32 %v2248_v50, 5 }
 0x16a   : > { %v2204_v6 = vsel %vm8009_vm6, 0, %v8008_v52  ;;  %v2091_v34 = vadd.s32 536870912, %v2090_v16  ;;  %v2002_v35 = vor.u32 %v2001_v10, %v2000_v20  ;;  %v2254_v25 = vshrl.u32 %v13053_v51, %v2251_v18 }
 0x16b   : > { %v2209_v14 = vsub.s32 4294967266, %v2204_v6  ;;  %v2007_v45 = vand.u32 2147483647, %v2006_v13  ;;  %v2257_v29 = vshrl.u32 %v13060_v54, %v2251_v18  ;;  %v2260_v33 = vshrl.u32 %v13066_v56, %v2251_v18 }
 0x16c   : > { %v10220_v27 = vshrl.u32 %v2091_v34, 30  ;;  %v2263_v37 = vshrl.u32 %v13070_v58, %v2251_v18  ;;  %v2205_v28 = vsub.s32 32, %v2204_v6  ;;  %v2253_v52 = vshll.u32 %v13055_v47, %v2250_v9 }
 0x16d   : > { %v2210_v26 = vadd.s32 127, %v2209_v14  ;;  %v2266_v41 = vshrl.u32 %v13063_v4, %v2251_v18  ;;  %v2256_v40 = vshll.u32 %v13053_v51, %v2250_v9  ;;  %v2259_v46 = vshll.u32 %v13060_v54, %v2250_v9 }
 0x16e   : > { %v2264_v48 = vor.u32 %v2263_v37, %v2262_v49  ;;  %v2265_v53 = vshll.u32 %v13070_v58, %v2250_v9  ;;  %v2009_v55 = vcvt.s32.f32 %v2002_v35  ;;  %v2189_v36 = vadd.s32 %v10147_v17, %v10153_v23 }
 0x16f   : > { %v2211_v59 = vshll.u32 %v2210_v26, 23  ;;  %v2093_v61 = vshll.u32 %v10220_v27, 30  ;;  %v2255_v63 = vor.u32 %v2254_v25, %v2253_v52  ;;  %v2258_v2 = vor.u32 %v2257_v29, %v2256_v40 }
 0x170   : > { %v2261_v43 = vor.u32 %v2260_v33, %v2259_v46  ;;  %v2267_v50 = vor.u32 %v2266_v41, %v2265_v53  ;;  %v2010_v3 = vmul.f32 %v2009_v55, %v2007_v45  ;;  %v2207_v7 = vshrl.u32 %v2189_v36, %v2205_v28 }
 0x171   : > { %vm2271_vm9 = vcmp.lt.s32.totalorder %v2249_v12, 4  ;;  %v2206_v8 = vshll.u32 %v10185_v5, %v2204_v6  ;;  %v2244_v10 = vor.u32 8388608, %v2243_v60  ;;  %v2212_v9 = vor.u32 4788187, %v2211_v59 }
 0x172   : > { %v2277_v11 = vsel %vm2271_vm9, %v2264_v48, 920167782  ;;  %v10237_v13 = vsub.s32 %v2090_v16, %v2093_v61  ;;  %vm2268_vm10 = vcmp.lt.s32.totalorder %v2249_v12, 1  ;;  %vm2270_vm11 = vcmp.lt.s32.totalorder %v2249_v12, 3 }
 0x173   : > { %v2276_v17 = vsel %vm2268_vm10, %v2255_v63, %v2258_v2  ;;  %v2278_v23 = vsel %vm2270_vm11, %v2261_v43, %v2277_v11  ;;  %v2280_v14 = vsel %vm2268_vm10, %v2258_v2, %v2261_v43  ;;  %v2281_v20 = vsel %vm2271_vm9, %v2267_v50, 1326507024 }
 0x174   : > { %v2011_v34 = vxor.u32 2147483648, %v2010_v3  ;;  %v2208_v35 = vor.u32 %v2207_v7, %v2206_v8  ;;  %vm2269_vm12 = vcmp.lt.s32.totalorder %v2249_v12, 2  ;;  %v2282_v5 = vsel %vm2270_vm11, %v2264_v48, %v2281_v20 }
 0x175   : > { %v2013_v6 = vsub.s32 4, %v10155_v1  ;;  %v2283_v16 = vsel %vm2269_vm12, %v2280_v14, %v2282_v5  ;;  %v2284_v60 = vshll.u32 %v2244_v10, 8  ;;  %v2213_v45 = vand.u32 2147483647, %v2212_v9 }
 0x176   : > { %v2096_v26 = vsub.s32 0, %v10237_v13  ;;  %v2273_v25 = vsel %vm2271_vm9, %v2261_v43, 2102212464  ;;  %v2279_v29 = vsel %vm2269_vm12, %v2276_v17, %v2278_v23  ;;  %vm1929_vm13 = vcmp.lt.s32.totalorder %v10059_v15, 0 }
 0x177   : > { %v2252_v33 = vshrl.u32 %v13055_v47, %v2251_v18  ;;  %v10251_v49 = vmul.u32.u64.low %v2284_v60, %v2283_v16  ;;  %v10252_v37 = vmul.u32.u64.high %v2284_v60, %v2283_v16, %v10251_v49  ;;  %vm10256_vm14 = vcmp.le.f32.partialorder %v1927_v19, 0.7853982  ;;  %v10287_v16 = vpop.f32.mrb[4].mxu0 }
 0x178   : > { %v2012_v52 = vsel %vm1929_vm13, %v2011_v34, %v2010_v3  ;;  %v2215_v41 = vcvt.s32.f32 %v2208_v35  ;;  %v2754_v40 = vand.u32 2139095040, %v10076_v0  ;;  %v2274_v48 = vsel %vm2270_vm11, %v2258_v2, %v2273_v25  ;;  %v10298_v25 = vpop.f32.mrb[5].mxu0 }
 0x179   : > { %v2272_v46 = vsel %vm2268_vm10, %v2252_v33, %v2255_v63  ;;  %v10263_v53 = vmul.u32.u64.low %v2284_v60, %v2279_v29  ;;  %v10264_v55 = vmul.u32.u64.high %v2284_v60, %v2279_v29, %v10263_v53  ;;  %v2014_v18 = vsel %vm1929_vm13, %v2013_v6, %v10155_v1  ;;  %13142 = vst [vmem:[#allocation7_spill] sm:$0xff] %v10298_v25 }
 0x17a   : > { %v2216_v36 = vmul.f32 %v2215_v41, %v2213_v45  ;;  %v8003_v19 = vmin.u32 %v2096_v26, %v10237_v13  ;;  %v2755_v59 = vshrl.u32 %v2754_v40, 23  ;;  %v2015_v61 = vsel %vm10256_vm14, %v10059_v15, %v2012_v52 }
 0x17b   : > { %v2275_v43 = vsel %vm2269_vm12, %v2272_v46, %v2274_v48  ;;  %vm2293_vm15 = vc.u32 %v10252_v37, %v10263_v53  ;;  %v2016_v2 = vsel %vm10256_vm14, 0, %v2014_v18  ;;  %v2219_v50 = vsub.s32 4, %v10172_v42 }
 0x17c   : > { %v8030_v63 = vadd.s32 4294967169, %v2755_v59  ;;  %v2294_v1 = vadd.s32 1, %v10264_v55  ;;  %9165 = vcosq.f32 %v2015_v61  ;;  %v2217_v3 = vxor.u32 2147483648, %v2216_v36 }
 0x17d   : > { %v2098_v7 = vclz %v8003_v19  ;;  %v13052_v8 = vand.u32 2147483647, %v10076_v0  ;;  %v2291_v10 = vmul.u32 %v2284_v60, %v2275_v43  ;;  %v3684_v9 = vadd.s32 3, %v2016_v2  ;;  %v10289_v60 = vpop.f32.mrb[4].mxu1 }
 0x17e   : > { %v2295_v12 = vsel %vm2293_vm15, %v2294_v1, %v10264_v55  ;;  %v2761_v11 = vadd.s32 1, %v8030_v63  ;;  %vm2135_vm0 = vcmp.lt.s32.totalorder %v10063_v21, 0  ;;  %9167 = vsinq.f32 %v2015_v61 }
 0x17f   : > { %v2220_v17 = vsel %vm2135_vm0, %v2219_v50, %v10172_v42  ;;  %v2296_v23 = vadd.s32 %v2295_v12, %v2291_v10  ;;  %v2218_v14 = vsel %vm2135_vm0, %v2217_v3, %v2216_v36  ;;  %v8004_v20 = vadd.s32 4294967294, %v2098_v7 }
 0x180   : > { %vm2762_vm1 = vcmp.gt.s32.totalorder %v2761_v11, 0  ;;  %v2758_v34 = vand.u32 8388607, %v13052_v8  ;;  %vm2134_vm2 = vcmp.le.f32.partialorder %v2133_v22, 0.7853982  ;;  %v10291_v45 = vand.u32 3, %v2016_v2 }
 0x181   : > { %v2763_v35 = vsel %vm2762_vm1, %v2761_v11, 0  ;;  %v2297_v5 = vadd.s32 536870912, %v2296_v23  ;;  %v10293_v42 = vand.u32 3, %v3684_v9  ;;  %v10295_v26 = vsel %vm2134_vm2, 0, %v2220_v17 }
 0x182   : > { %v2765_v6 = vand.u32 31, %v2763_v35  ;;  %vm2032_vm3 = vcmp.lt.s32.totalorder %v10065_v31, 0  ;;  %v10301_v29 = vsel %vm2134_vm2, %v10063_v21, %v2218_v14  ;;  %v2116_v22 = vsub.s32 4, %v10220_v27 }
 0x183   : > { %v10304_v33 = vshrl.u32 %v2297_v5, 30  ;;  %vm8005_vm4 = vcmp.lt.s32.totalorder %v8004_v20, 0  ;;  %v2759_v28 = vor.u32 8388608, %v2758_v34  ;;  %v2764_v46 = vshrl.u32 %v2763_v35, 5 }
 0x184   : > { %v2766_v49 = vsub.s32 32, %v2765_v6  ;;  %v2768_v52 = vshll.u32 %v13055_v47, %v2765_v6  ;;  %v2771_v41 = vshll.u32 %v13053_v51, %v2765_v6  ;;  %v2774_v55 = vshll.u32 %v13060_v54, %v2765_v6 }
 0x185   : > { %v2299_v40 = vshll.u32 %v10304_v33, 30  ;;  %v2777_v59 = vshll.u32 %v13066_v56, %v2765_v6  ;;  %9169 = vcosq.f32 %v10301_v29  ;;  %v10319_v43 = vadd.s32 3, %v10295_v26 }
 0x186   : > { %v2769_v48 = vshrl.u32 %v13053_v51, %v2766_v49  ;;  %v10311_v18 = vpop.eup %9165  ;;  %v2772_v36 = vshrl.u32 %v13060_v54, %v2766_v49  ;;  %v2775_v19 = vshrl.u32 %v13066_v56, %v2766_v49  ;;  %v2778_v61 = vshrl.u32 %v13070_v58, %v2766_v49 }
 0x187   : > { %v2117_v63 = vsel %vm2032_vm3, %v2116_v22, %v10220_v27  ;;  %v10324_v2 = vsub.s32 %v2296_v23, %v2299_v40  ;;  %vm10328_vm5 = vcmp.le.f32.partialorder %v2030_v30, 0.7853982  ;;  %v2767_v1 = vshrl.u32 %v13055_v47, %v2766_v49 }
 0x188   : > { %v2770_v3 = vor.u32 %v2769_v48, %v2768_v52  ;;  %v2773_v7 = vor.u32 %v2772_v36, %v2771_v41  ;;  %v2780_v10 = vshll.u32 %v13070_v58, %v2765_v6  ;;  %v9168_v12 = vpop.eup %9167  ;;  %vm2022_vm6 = vcmp.eq.s32.totalorder %v10291_v45, 0 }
 0x189   : > { %vm2025_vm7 = vcmp.eq.s32.totalorder %v10291_v45, 2  ;;  %v2026_v27 = vxor.u32 2147483648, %v10311_v18  ;;  %vm3690_vm8 = vcmp.eq.s32.totalorder %v10293_v42, 2  ;;  %v10339_v30 = vsel %vm8005_vm4, 0, %v8004_v20 }
 0x18a   : > { %v2776_v11 = vor.u32 %v2775_v19, %v2774_v55  ;;  %v10341_v9 = vshll.u32 %v2759_v28, 8  ;;  %vm3687_vm9 = vcmp.eq.s32.totalorder %v10293_v42, 0  ;;  %v2779_v17 = vor.u32 %v2778_v61, %v2777_v59 }
 0x18b   : > { %v2781_v23 = vshrl.u32 %v13063_v4, %v2766_v49  ;;  %vm2783_vm10 = vcmp.lt.s32.totalorder %v2764_v46, 1  ;;  %v2960_v14 = vand.u32 2139095040, %v10078_v32  ;;  %v2302_v34 = vsub.s32 0, %v10324_v2 }
 0x18c   : > { %vm2784_vm11 = vcmp.lt.s32.totalorder %v2764_v46, 2  ;;  %vm2785_vm12 = vcmp.lt.s32.totalorder %v2764_v46, 3  ;;  %vm2786_vm13 = vcmp.lt.s32.totalorder %v2764_v46, 4  ;;  %vm2021_vm14 = vcmp.lt.s32.totalorder %v10291_v45, 2 }
 0x18d   : > { %v2782_v20 = vor.u32 %v2781_v23, %v2780_v10  ;;  %v2787_v35 = vsel %vm2783_vm10, %v2767_v1, %v2770_v3  ;;  %v2788_v5 = vsel %vm2786_vm13, %v2776_v11, 2102212464  ;;  %v2791_v6 = vsel %vm2783_vm10, %v2770_v3, %v2773_v7 }
 0x18e   : > { %v2023_v22 = vxor.u32 2147483648, %v9168_v12  ;;  %vm3686_vm15 = vcmp.lt.s32.totalorder %v10293_v42, 2  ;;  %v2789_v28 = vsel %vm2785_vm12, %v2773_v7, %v2788_v5  ;;  %v2792_v49 = vsel %vm2786_vm13, %v2779_v17, 920167782 }
 0x18f   : > { %v2795_v52 = vsel %vm2783_vm10, %v2773_v7, %v2776_v11  ;;  %v2106_v41 = vsub.s32 4294967266, %v10339_v30  ;;  %v2793_v40 = vsel %vm2785_vm12, %v2776_v11, %v2792_v49  ;;  %v2796_v48 = vsel %vm2786_vm13, %v2782_v20, 1326507024  ;;  %v10363_v11 = vpop.eup %9169 }
 0x190   : > { %v2961_v55 = vshrl.u32 %v2960_v14, 23  ;;  %v8011_v36 = vmin.u32 %v2302_v34, %v10324_v2  ;;  %v2790_v19 = vsel %vm2784_vm11, %v2787_v35, %v2789_v28  ;;  %v2794_v59 = vsel %vm2784_vm11, %v2791_v6, %v2793_v40  ;;  %v10372_v34 = vpop.f32.mrb[5].mxu1 }
 0x191   : > { %v2797_v61 = vsel %vm2785_vm12, %v2779_v17, %v2796_v48  ;;  %vm2019_vm0 = vweird.f32 %v10059_v15  ;;  %v10359_v3 = vmul.u32.u64.low %v10341_v9, %v2794_v59  ;;  %v10360_v7 = vmul.u32.u64.high %v10341_v9, %v2794_v59, %v10359_v3  ;;  %13145 = vst [vmem:[#allocation8_spill] sm:$0xff] %v10372_v34 }
 0x192   : > { %v2798_v1 = vsel %vm2784_vm11, %v2795_v52, %v2797_v61  ;;  %v8038_v10 = vadd.s32 4294967169, %v2961_v55  ;;  %9171 = vsinq.f32 %v10301_v29  ;;  %v2119_v23 = vsel %vm10328_vm5, 0, %v2117_v63 }
 0x193   : > { %v10369_v14 = vmul.u32.u64.low %v10341_v9, %v2798_v1  ;;  %v10370_v17 = vmul.u32.u64.high %v10341_v9, %v2798_v1, %v10369_v14  ;;  %v2024_v46 = vsel %vm2022_vm6, %v10311_v18, %v2023_v22  ;;  %v2027_v20 = vsel %vm2025_vm7, %v2026_v27, %v9168_v12 }
 0x194   : > { %v3692_v35 = vsel %vm3690_vm8, %v2026_v27, %v9168_v12  ;;  %v2967_v29 = vadd.s32 1, %v8038_v10  ;;  %v3689_v63 = vsel %vm3687_vm9, %v10311_v18, %v2023_v22  ;;  %v2102_v5 = vsub.s32 32, %v10339_v30 }
 0x195   : > { %v2107_v6 = vadd.s32 127, %v2106_v41  ;;  %v2806_v28 = vmul.u32 %v10341_v9, %v2790_v19  ;;  %v3788_v49 = vadd.s32 3, %v2119_v23  ;;  %v2304_v52 = vclz %v8011_v36 }
 0x196   : > { %v2809_v40 = vadd.s32 1, %v10360_v7  ;;  %vm2968_vm1 = vcmp.gt.s32.totalorder %v2967_v29, 0  ;;  %v2028_v48 = vsel %vm2021_vm14, %v2024_v46, %v2027_v20  ;;  %v10390_v12 = vand.u32 3, %v10295_v26 }
 0x197   : > { %v2086_v27 = vadd.s32 %v10202_v57, %v10207_v62  ;;  %vm2808_vm2 = vc.u32 %v10370_v17, %v10359_v3  ;;  %v3693_v18 = vsel %vm3686_vm15, %v3689_v63, %v3692_v35  ;;  %v13051_v22 = vand.u32 2147483647, %v10078_v32 }
 0x198   : > { %v2810_v9 = vsel %vm2808_vm2, %v2809_v40, %v10360_v7  ;;  %v2969_v41 = vsel %vm2968_vm1, %v2967_v29, 0  ;;  %v10401_v45 = vand.u32 3, %v10319_v43  ;;  %v2108_v26 = vshll.u32 %v2107_v6, 23 }
 0x199   : > { %v2104_v55 = vshrl.u32 %v2086_v27, %v2102_v5  ;;  %v2811_v36 = vadd.s32 %v2810_v9, %v2806_v28  ;;  %v10403_v19 = vand.u32 3, %v2119_v23  ;;  %v10405_v57 = vand.u32 3, %v3788_v49 }
 0x19a   : > { %v8012_v62 = vadd.s32 4294967294, %v2304_v52  ;;  %v2971_v59 = vand.u32 31, %v2969_v41  ;;  %v10409_v42 = vsel %vm2019_vm0, nan, %v2028_v48  ;;  %v10413_v61 = vsel %vm2019_vm0, nan, %v3693_v18 }
 0x19b   : > { %13146 = vst [vmem:[#allocation9_spill] sm:$0xff] %v10405_v57  ;;  %13147 = vst [vmem:[#allocation10_spill] sm:$0xff] %v10409_v42  ;;  %v2103_v43 = vshll.u32 %v10237_v13, %v10339_v30  ;;  %v2812_v1 = vadd.s32 536870912, %v2811_v36  ;;  %v2232_v7 = vxor.u32 2147483648, %v10363_v11  ;;  %v10420_v10 = vadd.s32 %v10263_v53, %v10252_v37 }
 0x19c   : > { %13148 = vst [vmem:[#allocation11_spill] sm:$0xff] %v10413_v61  ;;  %v2964_v23 = vand.u32 8388607, %v13051_v22  ;;  %v2972_v14 = vsub.s32 32, %v2971_v59  ;;  %v10424_v46 = vpop.eup %9171  ;;  %v2109_v15 = vor.u32 4788187, %v2108_v26  ;;  %v2974_v13 = vshll.u32 %v13055_v47, %v2971_v59 }
 0x19d   : > { %v2105_v20 = vor.u32 %v2104_v55, %v2103_v43  ;;  %v10426_v35 = vshrl.u32 %v2812_v1, 30  ;;  %v2857_v29 = vand.u32 2139095040, %v10080_v38  ;;  %vm8013_vm4 = vcmp.lt.s32.totalorder %v8012_v62, 0 }
 0x19e   : > { %v2977_v30 = vshll.u32 %v13053_v51, %v2971_v59  ;;  %v2983_v37 = vshll.u32 %v13066_v56, %v2971_v59  ;;  %vm2231_vm6 = vcmp.eq.s32.totalorder %v10390_v12, 2  ;;  %v2975_v63 = vshrl.u32 %v13053_v51, %v2972_v14 }
 0x19f   : > { %v2814_v53 = vshll.u32 %v10426_v35, 30  ;;  %v2978_v5 = vshrl.u32 %v13060_v54, %v2972_v14  ;;  %v2984_v6 = vshrl.u32 %v13070_v58, %v2972_v14  ;;  %v2965_v28 = vor.u32 8388608, %v2964_v23 }
 0x1a0   : > { %v2970_v49 = vshrl.u32 %v2969_v41, 5  ;;  %v2980_v52 = vshll.u32 %v13060_v54, %v2971_v59  ;;  %v2981_v40 = vshrl.u32 %v13066_v56, %v2972_v14  ;;  %v2986_v27 = vshll.u32 %v13070_v58, %v2971_v59 }
 0x1a1   : > { %v10439_v48 = vsub.s32 %v2811_v36, %v2814_v53  ;;  %v2987_v18 = vshrl.u32 %v13063_v4, %v2972_v14  ;;  %v2858_v9 = vshrl.u32 %v2857_v29, 23  ;;  %v13059_v55 = vxor.u32 2147483648, %v10424_v46 }
 0x1a2   : > { %v2110_v26 = vand.u32 2147483647, %v2109_v15  ;;  %v2112_v43 = vcvt.s32.f32 %v2105_v20  ;;  %v2973_v1 = vshrl.u32 %v13055_v47, %v2972_v14  ;;  %v2976_v41 = vor.u32 %v2975_v63, %v2974_v13 }
 0x1a3   : > { %v2817_v23 = vsub.s32 0, %v10439_v48  ;;  %v2979_v22 = vor.u32 %v2978_v5, %v2977_v30  ;;  %v2985_v8 = vor.u32 %v2984_v6, %v2983_v37  ;;  %vm3898_vm7 = vcmp.eq.s32.totalorder %v10401_v45, 2 }
 0x1a4   : > { %v10448_v36 = vsel %vm8013_vm4, 0, %v8012_v62  ;;  %v2982_v59 = vor.u32 %v2981_v40, %v2980_v52  ;;  %vm2989_vm8 = vcmp.lt.s32.totalorder %v2970_v49, 1  ;;  %vm2992_vm9 = vcmp.lt.s32.totalorder %v2970_v49, 4 }
 0x1a5   : > { %vm2228_vm10 = vcmp.eq.s32.totalorder %v10390_v12, 0  ;;  %v8031_v15 = vmin.u32 %v2817_v23, %v10439_v48  ;;  %v2988_v20 = vor.u32 %v2987_v18, %v2986_v27  ;;  %v3005_v29 = vshll.u32 %v2965_v28, 8 }
 0x1a6   : > { %v8034_v14 = vadd.s32 4294967169, %v2858_v9  ;;  %vm2990_vm11 = vcmp.lt.s32.totalorder %v2970_v49, 2  ;;  %vm2991_vm12 = vcmp.lt.s32.totalorder %v2970_v49, 3  ;;  %v2993_v13 = vsel %vm2989_vm8, %v2973_v1, %v2976_v41 }
 0x1a7   : > { %v2994_v30 = vsel %vm2992_vm9, %v2982_v59, 2102212464  ;;  %v2819_v37 = vclz %v8031_v15  ;;  %v2997_v53 = vsel %vm2989_vm8, %v2976_v41, %v2979_v22  ;;  %v2998_v63 = vsel %vm2992_vm9, %v2985_v8, 920167782 }
 0x1a8   : > { %v2995_v62 = vsel %vm2991_vm12, %v2979_v22, %v2994_v30  ;;  %v10462_v5 = vsel %vm2231_vm6, %v2232_v7, %v10424_v46  ;;  %v10464_v6 = vmul.f32 %v2112_v43, %v2110_v26  ;;  %v2312_v28 = vsub.s32 4294967266, %v10448_v36 }
 0x1a9   : > { %v3001_v52 = vsel %vm2989_vm8, %v2979_v22, %v2982_v59  ;;  %v2807_v40 = vadd.s32 %v10359_v3, %v10370_v17  ;;  %v8032_v27 = vadd.s32 4294967294, %v2819_v37  ;;  %v2999_v18 = vsel %vm2991_vm12, %v2982_v59, %v2998_v63  ;;  %v10483_v59 = vpop.f32.mrb[6].mxu0 }
 0x1aa   : > { %v3002_v9 = vsel %vm2992_vm9, %v2988_v20, 1326507024  ;;  %v2996_v1 = vsel %vm2990_vm11, %v2993_v13, %v2995_v62  ;;  %v3000_v23 = vsel %vm2990_vm11, %v2997_v53, %v2999_v18  ;;  %v2864_v26 = vadd.s32 1, %v8034_v14 }
 0x1ab   : > { %v3003_v41 = vsel %vm2991_vm12, %v2985_v8, %v3002_v9  ;;  %vm8033_vm13 = vcmp.lt.s32.totalorder %v8032_v27, 0  ;;  %v10476_v15 = vmul.u32.u64.low %v3005_v29, %v3000_v23  ;;  %v10477_v22 = vmul.u32.u64.high %v3005_v29, %v3000_v23, %v10476_v15 }
 0x1ac   : > { %v3004_v43 = vsel %vm2990_vm11, %v3001_v52, %v3003_v41  ;;  %v2822_v3 = vsel %vm8033_vm13, 0, %v8032_v27  ;;  %vm2865_vm14 = vcmp.gt.s32.totalorder %v2864_v26, 0  ;;  %v10490_v8 = vsel %vm3898_vm7, %v2232_v7, %v10424_v46 }
 0x1ad   : > { %v10480_v17 = vmul.u32.u64.low %v3005_v29, %v3004_v43  ;;  %v10481_v30 = vmul.u32.u64.high %v3005_v29, %v3004_v43, %v10480_v17  ;;  %v2823_v49 = vsub.s32 32, %v2822_v3  ;;  %v2827_v20 = vsub.s32 4294967266, %v2822_v3 }
 0x1ae   : > { %v2866_v14 = vsel %vm2865_vm14, %v2864_v26, 0  ;;  %v10497_v13 = vsel %vm2228_vm10, %v10363_v11, %v13059_v55  ;;  %v3012_v37 = vmul.u32 %v3005_v29, %v2996_v1  ;;  %v13058_v62 = vand.u32 2147483647, %v10080_v38 }
 0x1af   : > { %v2868_v53 = vand.u32 31, %v2866_v14  ;;  %v2313_v52 = vadd.s32 127, %v2312_v28  ;;  %v2828_v27 = vadd.s32 127, %v2827_v20  ;;  %v3015_v7 = vadd.s32 1, %v10477_v22 }
 0x1b0   : > { %v2824_v18 = vshll.u32 %v10439_v48, %v2822_v3  ;;  %v2825_v9 = vshrl.u32 %v2807_v40, %v2823_v49  ;;  %vm3014_vm15 = vc.u32 %v10481_v30, %v10476_v15  ;;  %v2308_v41 = vsub.s32 32, %v10448_v36 }
 0x1b1   : > { %v2869_v23 = vsub.s32 32, %v2868_v53  ;;  %v2829_v26 = vshll.u32 %v2828_v27, 23  ;;  %v3016_v29 = vsel %vm3014_vm15, %v3015_v7, %v10477_v22  ;;  %v2871_v1 = vshll.u32 %v13055_v47, %v2868_v53 }
 0x1b2   : > { %vm3895_vm0 = vcmp.eq.s32.totalorder %v10401_v45, 0  ;;  %v3017_v28 = vadd.s32 %v3016_v29, %v3012_v37  ;;  %v2874_v17 = vshll.u32 %v13053_v51, %v2868_v53  ;;  %v2861_v40 = vand.u32 8388607, %v13058_v62 }
 0x1b3   : > { %v2872_v43 = vshrl.u32 %v13053_v51, %v2869_v23  ;;  %v2875_v48 = vshrl.u32 %v13060_v54, %v2869_v23  ;;  %v10514_v3 = vshrl.u32 %v2866_v14, 5  ;;  %v2877_v49 = vshll.u32 %v13060_v54, %v2868_v53 }
 0x1b4   : > { %v2878_v22 = vshrl.u32 %v13066_v56, %v2869_v23  ;;  %v2314_v20 = vshll.u32 %v2313_v52, 23  ;;  %v2826_v27 = vor.u32 %v2825_v9, %v2824_v18  ;;  %v3018_v7 = vadd.s32 536870912, %v3017_v28 }
 0x1b5   : > { %v2880_v37 = vshll.u32 %v13066_v56, %v2868_v53  ;;  %v2830_v29 = vor.u32 4788187, %v2829_v26  ;;  %v2873_v63 = vor.u32 %v2872_v43, %v2871_v1  ;;  %v2881_v51 = vshrl.u32 %v13070_v58, %v2869_v23 }
 0x1b6   : > { %v2883_v47 = vshll.u32 %v13070_v58, %v2868_v53  ;;  %v10521_v44 = vshrl.u32 %v3018_v7, 30  ;;  %v2876_v62 = vor.u32 %v2875_v48, %v2874_v17  ;;  %v2879_v14 = vor.u32 %v2878_v22, %v2877_v49 }
 0x1b7   : > { %v2884_v55 = vshrl.u32 %v13063_v4, %v2869_v23  ;;  %v2882_v54 = vor.u32 %v2881_v51, %v2880_v37  ;;  %vm2886_vm1 = vcmp.lt.s32.totalorder %v10514_v3, 1  ;;  %vm2888_vm2 = vcmp.lt.s32.totalorder %v10514_v3, 3 }
 0x1b8   : > { %vm2889_vm4 = vcmp.lt.s32.totalorder %v10514_v3, 4  ;;  %vm2227_vm6 = vcmp.lt.s32.totalorder %v10390_v12, 2  ;;  %vm2238_vm7 = vcmp.lt.s32.totalorder %v10069_v24, 0  ;;  %v2310_v52 = vshrl.u32 %v10420_v10, %v2308_v41 }
 0x1b9   : > { %v2315_v53 = vor.u32 4788187, %v2314_v20  ;;  %v3020_v18 = vshll.u32 %v10521_v44, 30  ;;  %v2862_v9 = vor.u32 8388608, %v2861_v40  ;;  %v2831_v26 = vand.u32 2147483647, %v2830_v29 }
 0x1ba   : > { %v2833_v1 = vcvt.s32.f32 %v2826_v27  ;;  %v2885_v43 = vor.u32 %v2884_v55, %v2883_v47  ;;  %v2895_v51 = vsel %vm2889_vm4, %v2882_v54, 920167782  ;;  %vm3894_vm8 = vcmp.lt.s32.totalorder %v10401_v45, 2 }
 0x1bb   : > { %v10534_v17 = vsub.s32 %v3017_v28, %v3020_v18  ;;  %vm2887_vm9 = vcmp.lt.s32.totalorder %v10514_v3, 2  ;;  %v2894_v48 = vsel %vm2886_vm1, %v2873_v63, %v2876_v62  ;;  %v2896_v10 = vsel %vm2888_vm2, %v2879_v14, %v2895_v51 }
 0x1bc   : > { %v13149_v41 = vxor.u32 2147483648, %v10424_v46  ;;  %v13150_v55 = vand.u32 2147483647, %v10069_v24  ;;  %v2309_v28 = vshll.u32 %v10324_v2, %v10448_v36  ;;  %v13153_v49 = vmov 683565275  }
 0x1bd   : > { %v2870_v22 = vshrl.u32 %v13153_v49, %v2869_v23  ;;  %v3063_v20 = vand.u32 2139095040, %v10082_v39  ;;  %v2322_v27 = vsub.s32 4, %v10304_v33  ;;  %v3023_v46 = vsub.s32 0, %v10534_v17 }
 0x1be   : > { %v3897_v47 = vsel %vm3895_vm0, %v10363_v11, %v13149_v41  ;;  %vm10548_vm10 = vcmp.le.f32.partialorder %v13150_v55, 0.7853982  ;;  %v2891_v11 = vsel %vm2889_vm4, %v2879_v14, 2102212464  ;;  %v2902_v7 = vshll.u32 %v2862_v9, 8 }
 0x1bf   : > { %vm2225_vm11 = vweird.f32 %v10063_v21  ;;  %v2311_v37 = vor.u32 %v2310_v52, %v2309_v28  ;;  %v2897_v29 = vsel %vm2887_vm9, %v2894_v48, %v2896_v10  ;;  %v2898_v2 = vsel %vm2886_vm1, %v2876_v62, %v2879_v14 }
 0x1c0   : > { %v2899_v36 = vsel %vm2889_vm4, %v2885_v43, 1326507024  ;;  %v13154_v23 = vxor.u32 2147483648, %v10464_v6  ;;  %v2316_v51 = vand.u32 2147483647, %v2315_v53  ;;  %vm2753_vm12 = vcmp.lt.s32.totalorder %v10076_v0, 0 }
 0x1c1   : > { %v2834_v9 = vmul.f32 %v2833_v1, %v2831_v26  ;;  %v8039_v52 = vmin.u32 %v3023_v46, %v10534_v17  ;;  %v2890_v48 = vsel %vm2886_vm1, %v2870_v22, %v2873_v63  ;;  %v2892_v14 = vsel %vm2888_vm2, %v2876_v62, %v2891_v11  ;;  %v10586_v26 = vpop.f32.mrb[6].mxu1 }
 0x1c2   : > { %v2115_v18 = vsel %vm2032_vm3, %v13154_v23, %v10464_v6  ;;  %v2900_v43 = vsel %vm2888_vm2, %v2882_v54, %v2899_v36  ;;  %v3064_v10 = vshrl.u32 %v3063_v20, 23  ;;  %v2234_v63 = vsel %vm2227_vm6, %v10497_v13, %v10462_v5 }
 0x1c3   : > { %v3025_v41 = vclz %v8039_v52  ;;  %v2901_v6 = vsel %vm2887_vm9, %v2898_v2, %v2900_v43  ;;  %v10582_v53 = vmul.u32.u64.low %v2902_v7, %v2897_v29  ;;  %v10583_v55 = vmul.u32.u64.high %v2902_v7, %v2897_v29, %v10582_v53 }
 0x1c4   : > { %v2318_v62 = vcvt.s32.f32 %v2311_v37  ;;  %v2323_v54 = vsel %vm2238_vm7, %v2322_v27, %v10304_v33  ;;  %v13155_v1 = vand.u32 2147483647, %v10076_v0  ;;  %v8042_v22 = vadd.s32 4294967169, %v3064_v10 }
 0x1c5   : > { %v8040_v20 = vadd.s32 4294967294, %v3025_v41  ;;  %v2893_v46 = vsel %vm2887_vm9, %v2890_v48, %v2892_v14  ;;  %v10603_v11 = vmul.u32.u64.low %v2902_v7, %v2901_v6  ;;  %v10604_v29 = vmul.u32.u64.high %v2902_v7, %v2901_v6, %v10603_v11 }
 0x1c6   : > { %vm10597_vm3 = vcmp.le.f32.partialorder %v13155_v1, 0.7853982  ;;  %v3901_v12 = vsel %vm3894_vm8, %v3897_v47, %v10490_v8  ;;  %v2118_v33 = vsel %vm10328_vm5, %v10065_v31, %v2115_v18  ;;  %v2835_v5 = vxor.u32 2147483648, %v2834_v9 }
 0x1c7   : > { %v3070_v13 = vadd.s32 1, %v8042_v22  ;;  %v2319_v27 = vmul.f32 %v2318_v62, %v2316_v51  ;;  %v2325_v37 = vsel %vm10548_vm10, 0, %v2323_v54  ;;  %vm8041_vm13 = vcmp.lt.s32.totalorder %v8040_v20, 0 }
 0x1c8   : > { %v2912_v3 = vadd.s32 1, %v10583_v55  ;;  %v2837_v2 = vsub.s32 4, %v10426_v35  ;;  %v3028_v36 = vsel %vm8041_vm13, 0, %v8040_v20  ;;  %v2909_v23 = vmul.u32 %v2902_v7, %v2893_v46 }
 0x1c9   : > { %vm3071_vm14 = vcmp.gt.s32.totalorder %v3070_v13, 0  ;;  %v10618_v45 = vsel %vm2225_vm11, nan, %v2234_v63  ;;  %v3013_v50 = vadd.s32 %v10476_v15, %v10481_v30  ;;  %v3029_v8 = vsub.s32 32, %v3028_v36 }
 0x1ca   : > { %13158 = vst [vmem:[#allocation12_spill] sm:$0xff] %v10618_v45  ;;  %v3033_v47 = vsub.s32 4294967266, %v3028_v36  ;;  %9173 = vcosq.f32 %v2118_v33  ;;  %v2836_v18 = vsel %vm2753_vm12, %v2835_v5, %v2834_v9  ;;  %vm2911_vm5 = vc.u32 %v10604_v29, %v10582_v53 }
 0x1cb   : > { %v3072_v51 = vsel %vm3071_vm14, %v3070_v13, 0  ;;  %v2320_v52 = vxor.u32 2147483648, %v2319_v27  ;;  %v3996_v7 = vadd.s32 3, %v2325_v37  ;;  %v2913_v14 = vsel %vm2911_vm5, %v2912_v3, %v10583_v55 }
 0x1cc   : > { %v3034_v48 = vadd.s32 127, %v3033_v47  ;;  %v2838_v43 = vsel %vm2753_vm12, %v2837_v2, %v10426_v35  ;;  %v2914_v15 = vadd.s32 %v2913_v14, %v2909_v23  ;;  %v13062_v30 = vand.u32 2147483647, %v10082_v39 }
 0x1cd   : > { %v3074_v10 = vand.u32 31, %v3072_v51  ;;  %v2839_v9 = vsel %vm10597_vm3, %v10076_v0, %v2836_v18  ;;  %v3030_v41 = vshll.u32 %v10534_v17, %v3028_v36  ;;  %v3031_v6 = vshrl.u32 %v3013_v50, %v3029_v8 }
 0x1ce   : > { %v3035_v63 = vshll.u32 %v3034_v48, 23  ;;  %v10637_v62 = vsel %vm2225_vm11, nan, %v3901_v12  ;;  %9175 = vsinq.f32 %v2118_v33  ;;  %v2915_v55 = vadd.s32 536870912, %v2914_v15 }
 0x1cf   : > { %13159 = vst [vmem:[#allocation13_spill] sm:$0xff] %v10637_v62  ;;  %v3075_v54 = vsub.s32 32, %v3074_v10  ;;  %v2321_v35 = vsel %vm2238_vm7, %v2320_v52, %v2319_v27  ;;  %v10641_v1 = vand.u32 3, %v2325_v37  ;;  %v10643_v22 = vand.u32 3, %v3996_v7 }
 0x1d0   : > { %v2840_v20 = vsel %vm10597_vm3, 0, %v2838_v43  ;;  %9177 = vcosq.f32 %v2839_v9  ;;  %v10647_v17 = vshrl.u32 %v2915_v55, 30  ;;  %v3067_v21 = vand.u32 8388607, %v13062_v30 }
 0x1d1   : > { %13160 = vst [vmem:[#allocation14_spill] sm:$0xff] %v10641_v1  ;;  %13161 = vst [vmem:[#allocation15_spill] sm:$0xff] %v10643_v22  ;;  %v2342_v46 = vand.u32 2139095040, %v10287_v16  ;;  %vm2959_vm15 = vcmp.lt.s32.totalorder %v10078_v32, 0  ;;  %v3032_v11 = vor.u32 %v3031_v6, %v3030_v41  ;;  %v3036_v12 = vor.u32 4788187, %v3035_v63 }
 0x1d2   : > { %v3077_v33 = vshll.u32 %v13153_v49, %v3074_v10  ;;  %v13162_v5 = vmov 2475754826   ;;  %v2917_v27 = vshll.u32 %v10647_v17, 30  ;;  %v13163_v37 = vmov 2131351028  }
 0x1d3   : > { %v3078_v13 = vshrl.u32 %v13162_v5, %v3075_v54  ;;  %v3080_v28 = vshll.u32 %v13162_v5, %v3074_v10  ;;  %v3081_v3 = vshrl.u32 %v13163_v37, %v3075_v54  ;;  %v3083_v2 = vshll.u32 %v13163_v37, %v3074_v10 }
 0x1d4   : > { %9179 = vsinq.f32 %v2839_v9  ;;  %v3073_v36 = vshrl.u32 %v3072_v51, 5  ;;  %v3084_v23 = vshrl.u32 %v13066_v56, %v3075_v54  ;;  %v3086_v50 = vshll.u32 %v13066_v56, %v3074_v10  ;;  %v10661_v8 = vpop.eup %9173 }
 0x1d5   : > { %v10663_v47 = vsub.s32 %v2914_v15, %v2917_v27  ;;  %v3068_v18 = vor.u32 8388608, %v3067_v21  ;;  %v3087_v52 = vshrl.u32 %v13070_v58, %v3075_v54  ;;  %v2343_v7 = vshrl.u32 %v2342_v46, 23 }
 0x1d6   : > { %v10666_v48 = vand.u32 3, %v2840_v20  ;;  %v4516_v14 = vadd.s32 3, %v2840_v20  ;;  %v3039_v43 = vcvt.s32.f32 %v3032_v11  ;;  %v3089_v41 = vshll.u32 %v13070_v58, %v3074_v10 }
 0x1d7   : > { %v13164_v51 = vand.u32 2147483647, %v10078_v32  ;;  %v3037_v6 = vand.u32 2147483647, %v3036_v12  ;;  %v3079_v63 = vor.u32 %v3078_v13, %v3077_v33  ;;  %v3082_v15 = vor.u32 %v3081_v3, %v3080_v28 }
 0x1d8   : > { %v3085_v55 = vor.u32 %v3084_v23, %v3083_v2  ;;  %v2920_v21 = vsub.s32 0, %v10663_v47  ;;  %v3088_v27 = vor.u32 %v3087_v52, %v3086_v50  ;;  %v3090_v46 = vshrl.u32 %v13063_v4, %v3075_v54  ;;  %v10677_v20 = vpop.eup %9175 }
 0x1d9   : > { %vm10671_vm0 = vcmp.le.f32.partialorder %v13164_v51, 0.7853982  ;;  %vm3092_vm1 = vcmp.lt.s32.totalorder %v3073_v36, 1  ;;  %v10682_v10 = vsel %vm10548_vm10, %v10069_v24, %v2321_v35  ;;  %v3043_v11 = vsub.s32 4, %v10521_v44 }
 0x1da   : > { %v10685_v51 = vshll.u32 %v3068_v18, 8  ;;  %v8014_v12 = vadd.s32 4294967169, %v2343_v7  ;;  %v3076_v33 = vshrl.u32 %v13153_v49, %v3075_v54  ;;  %v3091_v13 = vor.u32 %v3090_v46, %v3089_v41  ;;  %v9178_v28 = vpop.eup %9177 }
 0x1db   : > { %vm3094_vm2 = vcmp.lt.s32.totalorder %v3073_v36, 3  ;;  %vm3095_vm4 = vcmp.lt.s32.totalorder %v3073_v36, 4  ;;  %v3040_v3 = vmul.f32 %v3039_v43, %v3037_v6  ;;  %vm3093_vm6 = vcmp.lt.s32.totalorder %v3073_v36, 2 }
 0x1dc   : > { %v3097_v2 = vsel %vm3095_vm4, %v3085_v55, 2102212464  ;;  %v3100_v23 = vsel %vm3092_vm1, %v3079_v63, %v3082_v15  ;;  %vm2856_vm7 = vcmp.lt.s32.totalorder %v10080_v38, 0  ;;  %v8035_v40 = vmin.u32 %v2920_v21, %v10663_v47 }
 0x1dd   : > { %v3101_v35 = vsel %vm3095_vm4, %v3088_v27, 920167782  ;;  %v3104_v50 = vsel %vm3092_vm1, %v3082_v15, %v3085_v55  ;;  %v3105_v18 = vsel %vm3095_vm4, %v3091_v13, 1326507024  ;;  %9181 = vcosq.f32 %v10682_v10 }
 0x1de   : > { %v3044_v54 = vsel %vm2959_vm15, %v3043_v11, %v10521_v44  ;;  %v3102_v52 = vsel %vm3094_vm2, %v3085_v55, %v3101_v35  ;;  %v3106_v7 = vsel %vm3094_vm2, %v3088_v27, %v3105_v18  ;;  %v9180_v43 = vpop.eup %9179  ;;  %v3096_v41 = vsel %vm3092_vm1, %v3076_v33, %v3079_v63  ;;  %v10719_v33 = vpop.f32.mrb[7].mxu0 }
 0x1df   : > { %v3098_v6 = vsel %vm3094_vm2, %v3082_v15, %v3097_v2  ;;  %v3103_v21 = vsel %vm3093_vm6, %v3100_v23, %v3102_v52  ;;  %v3107_v46 = vsel %vm3093_vm6, %v3104_v50, %v3106_v7  ;;  %v3041_v13 = vxor.u32 2147483648, %v3040_v3 }
 0x1e0   : > { %v13167_v30 = vand.u32 2147483647, %v10080_v38  ;;  %v10709_v44 = vmul.u32.u64.low %v10685_v51, %v3107_v46  ;;  %v10710_v55 = vmul.u32.u64.high %v10685_v51, %v3107_v46, %v10709_v44  ;;  %v2349_v27 = vadd.s32 1, %v8014_v12 }
 0x1e1   : > { %vm2845_vm9 = vcmp.lt.s32.totalorder %v10666_v48, 2  ;;  %vm2846_vm10 = vcmp.eq.s32.totalorder %v10666_v48, 0  ;;  %v2922_v63 = vclz %v8035_v40  ;;  %v3099_v2 = vsel %vm3093_vm6, %v3096_v41, %v3098_v6 }
 0x1e2   : > { %vm10704_vm8 = vcmp.le.f32.partialorder %v13167_v30, 0.7853982  ;;  %v10715_v15 = vmul.u32.u64.low %v10685_v51, %v3103_v21  ;;  %v10716_v11 = vmul.u32.u64.high %v10685_v51, %v3103_v21, %v10715_v15  ;;  %v4517_v30 = vand.u32 3, %v4516_v14 }
 0x1e3   : > { %v13065_v23 = vand.u32 2147483647, %v10287_v16  ;;  %vm2350_vm11 = vcmp.gt.s32.totalorder %v2349_v27, 0  ;;  %v2847_v35 = vxor.u32 2147483648, %v9180_v43  ;;  %v2850_v12 = vxor.u32 2147483648, %v9178_v28 }
 0x1e4   : > { %v3046_v50 = vsel %vm10671_vm0, 0, %v3044_v54  ;;  %v2351_v18 = vsel %vm2350_vm11, %v2349_v27, 0  ;;  %vm2849_vm12 = vcmp.eq.s32.totalorder %v10666_v48, 2  ;;  %v3042_v40 = vsel %vm2959_vm15, %v3041_v13, %v3040_v3 }
 0x1e5   : > { %v2940_v52 = vsub.s32 4, %v10647_v17  ;;  %vm3117_vm3 = vc.u32 %v10710_v55, %v10715_v15  ;;  %v8036_v36 = vadd.s32 4294967294, %v2922_v63  ;;  %v3115_v14 = vmul.u32 %v10685_v51, %v3099_v2 }
 0x1e6   : > { %v3118_v7 = vadd.s32 1, %v10716_v11  ;;  %v2353_v41 = vand.u32 31, %v2351_v18  ;;  %vm4519_vm13 = vcmp.eq.s32.totalorder %v4517_v30, 0  ;;  %vm4522_vm14 = vcmp.eq.s32.totalorder %v4517_v30, 2 }
 0x1e7   : > { %v4724_v54 = vadd.s32 3, %v3046_v50  ;;  %v2346_v6 = vand.u32 8388607, %v13065_v23  ;;  %v2848_v3 = vsel %vm2846_vm10, %v9178_v28, %v2847_v35  ;;  %v2851_v21 = vsel %vm2849_vm12, %v2850_v12, %v9180_v43  ;;  %v10738_v44 = vpop.eup %9181 }
 0x1e8   : > { %v4524_v46 = vsel %vm4522_vm14, %v2850_v12, %v9180_v43  ;;  %v3119_v13 = vsel %vm3117_vm3, %v3118_v7, %v10716_v11  ;;  %13170 = vst [vmem:[#allocation16_spill] sm:$0xff] %v10738_v44  ;;  %v4521_v27 = vsel %vm4519_vm13, %v9178_v28, %v2847_v35  ;;  %v3045_v51 = vsel %vm10671_vm0, %v10078_v32, %v3042_v40 }
 0x1e9   : > { %v2941_v63 = vsel %vm2856_vm7, %v2940_v52, %v10647_v17  ;;  %v2354_v2 = vsub.s32 32, %v2353_v41  ;;  %9183 = vsinq.f32 %v10682_v10  ;;  %vm4518_vm5 = vcmp.lt.s32.totalorder %v4517_v30, 2 }
 0x1ea   : > { %vm8037_vm15 = vcmp.lt.s32.totalorder %v8036_v36, 0  ;;  %v3120_v23 = vadd.s32 %v3119_v13, %v3115_v14  ;;  %v10749_v43 = vsel %vm2845_vm9, %v2848_v3, %v2851_v21  ;;  %v10751_v11 = vand.u32 3, %v3046_v50 }
 0x1eb   : > { %v10753_v28 = vand.u32 3, %v4724_v54  ;;  %v2910_v9 = vadd.s32 %v10582_v53, %v10604_v29  ;;  %v10757_v35 = vsel %vm4518_vm5, %v4521_v27, %v4524_v46  ;;  %9185 = vcosq.f32 %v3045_v51 }
 0x1ec   : > { %v10761_v17 = vsel %vm10704_vm8, 0, %v2941_v63  ;;  %v3121_v10 = vadd.s32 536870912, %v3120_v23  ;;  %v10763_v30 = vsel %vm8037_vm15, 0, %v8036_v36  ;;  %v2347_v48 = vor.u32 8388608, %v2346_v6 }
 0x1ed   : > { %v2357_v12 = vshrl.u32 %v13162_v5, %v2354_v2  ;;  %v2360_v50 = vshrl.u32 %v13163_v37, %v2354_v2  ;;  %v2363_v52 = vshrl.u32 %v13066_v56, %v2354_v2  ;;  %v2366_v53 = vshrl.u32 %v13070_v58, %v2354_v2 }
 0x1ee   : > { %v10767_v40 = vshrl.u32 %v3121_v10, 30  ;;  %v2548_v29 = vand.u32 2139095040, %v10289_v60  ;;  %v2356_v14 = vshll.u32 %v13153_v49, %v2353_v41  ;;  %v2359_v7 = vshll.u32 %v13162_v5, %v2353_v41 }
 0x1ef   : > { %v2365_v36 = vshll.u32 %v13066_v56, %v2353_v41  ;;  %v13171_v54 = vmov 1326507024   ;;  %v2930_v3 = vsub.s32 4294967266, %v10763_v30  ;;  %v2352_v46 = vshrl.u32 %v2351_v18, 5 }
 0x1f0   : > { %v2369_v6 = vshrl.u32 %v13171_v54, %v2354_v2  ;;  %v3123_v21 = vshll.u32 %v10767_v40, 30  ;;  %v2362_v13 = vshll.u32 %v13163_v37, %v2353_v41  ;;  %v2358_v27 = vor.u32 %v2357_v12, %v2356_v14 }
 0x1f1   : > { %v2361_v63 = vor.u32 %v2360_v50, %v2359_v7  ;;  %v2367_v10 = vor.u32 %v2366_v53, %v2365_v36  ;;  %v2368_v62 = vshll.u32 %v13070_v58, %v2353_v41  ;;  %vm2843_vm0 = vweird.f32 %v10076_v0 }
 0x1f2   : > { %9187 = vsinq.f32 %v3045_v51  ;;  %v10781_v61 = vsub.s32 %v3120_v23, %v3123_v21  ;;  %v2364_v56 = vor.u32 %v2363_v52, %v2362_v13  ;;  %v10783_v22 = vshll.u32 %v2347_v48, 8 }
 0x1f3   : > { %v2926_v57 = vsub.s32 32, %v10763_v30  ;;  %v2927_v18 = vshll.u32 %v10663_v47, %v10763_v30  ;;  %v2370_v45 = vor.u32 %v2369_v6, %v2368_v62  ;;  %v2549_v42 = vshrl.u32 %v2548_v29, 23  ;;  %v10788_v12 = vpop.eup %9183  ;;  %v10797_v30 = vpop.f32.mrb[7].mxu1 }
 0x1f4   : > { %13172 = vst [vmem:[#allocation17_spill] sm:$0xff] %v10788_v12  ;;  %v2931_v50 = vadd.s32 127, %v2930_v3  ;;  %v3126_v41 = vsub.s32 0, %v10781_v61  ;;  %vm2371_vm1 = vcmp.lt.s32.totalorder %v2352_v46, 1  ;;  %vm2374_vm2 = vcmp.lt.s32.totalorder %v2352_v46, 4 }
 0x1f5   : > { %vm2372_vm4 = vcmp.lt.s32.totalorder %v2352_v46, 2  ;;  %vm2373_vm6 = vcmp.lt.s32.totalorder %v2352_v46, 3  ;;  %v2379_v23 = vsel %vm2371_vm1, %v2358_v27, %v2361_v63  ;;  %v2380_v51 = vsel %vm2374_vm2, %v2367_v10, 920167782  ;;  %v10792_v48 = vpop.eup %9185 }
 0x1f6   : > { %v8043_v52 = vmin.u32 %v3126_v41, %v10781_v61  ;;  %v2376_v53 = vsel %vm2374_vm2, %v2364_v56, 2102212464  ;;  %v2381_v62 = vsel %vm2373_vm6, %v2364_v56, %v2380_v51  ;;  %v2383_v47 = vsel %vm2371_vm1, %v2361_v63, %v2364_v56 }
 0x1f7   : > { %v2355_v29 = vshrl.u32 %v13153_v49, %v2354_v2  ;;  %v2382_v14 = vsel %vm2372_vm4, %v2379_v23, %v2381_v62  ;;  %v2384_v7 = vsel %vm2374_vm2, %v2370_v45, 1326507024  ;;  %v8022_v36 = vadd.s32 4294967169, %v2549_v42 }
 0x1f8   : > { %v3128_v6 = vclz %v8043_v52  ;;  %v2385_v3 = vsel %vm2373_vm6, %v2367_v10, %v2384_v7  ;;  %v10803_v21 = vmul.u32.u64.low %v10783_v22, %v2382_v14  ;;  %v10804_v13 = vmul.u32.u64.high %v10783_v22, %v2382_v14, %v10803_v21 }
 0x1f9   : > { %v2375_v41 = vsel %vm2371_vm1, %v2355_v29, %v2358_v27  ;;  %v2377_v56 = vsel %vm2373_vm6, %v2361_v63, %v2376_v53  ;;  %v2386_v51 = vsel %vm2372_vm4, %v2383_v47, %v2385_v3  ;;  %v2555_v58 = vadd.s32 1, %v8022_v36 }
 0x1fa   : > { %v2928_v2 = vshrl.u32 %v2910_v9, %v2926_v57  ;;  %v8044_v44 = vadd.s32 4294967294, %v3128_v6  ;;  %v10811_v45 = vmul.u32.u64.low %v10783_v22, %v2386_v51  ;;  %v10812_v42 = vmul.u32.u64.high %v10783_v22, %v2386_v51, %v10811_v45 }
 0x1fb   : > { %v10817_v10 = vsel %vm2843_vm0, nan, %v10749_v43  ;;  %v2932_v23 = vshll.u32 %v2931_v50, 23  ;;  %v13073_v52 = vand.u32 2147483647, %v10289_v60  ;;  %vm2556_vm9 = vcmp.gt.s32.totalorder %v2555_v58, 0 }
 0x1fc   : > { %13173 = vst [vmem:[#allocation18_spill] sm:$0xff] %v10817_v10  ;;  %v10820_v27 = vpop.eup %9187  ;;  %vm8045_vm10 = vcmp.lt.s32.totalorder %v8044_v44, 0  ;;  %v2378_v63 = vsel %vm2372_vm4, %v2375_v41, %v2377_v56  ;;  %v2397_v57 = vadd.s32 1, %v10804_v13  ;;  %v2557_v9 = vsel %vm2556_vm9, %v2555_v58, 0 }
 0x1fd   : > { %v10827_v53 = vsel %vm2843_vm0, nan, %v10757_v35  ;;  %v10830_v43 = vand.u32 3, %v10761_v17  ;;  %v10832_v50 = vsel %vm8045_vm10, 0, %v8044_v44  ;;  %v2559_v62 = vand.u32 31, %v2557_v9 }
 0x1fe   : > { %13174 = vst [vmem:[#allocation19_spill] sm:$0xff] %v10827_v53  ;;  %v2929_v29 = vor.u32 %v2928_v2, %v2927_v18  ;;  %v4620_v46 = vadd.s32 3, %v10761_v17  ;;  %v3116_v14 = vadd.s32 %v10715_v15, %v10710_v55  ;;  %v2394_v0 = vmul.u32 %v10783_v22, %v2378_v63 }
 0x1ff   : > { %vm2396_vm11 = vc.u32 %v10812_v42, %v10803_v21  ;;  %v10842_v35 = vsub.s32 32, %v2559_v62  ;;  %v2933_v44 = vor.u32 4788187, %v2932_v23  ;;  %v3136_v7 = vsub.s32 4294967266, %v10832_v50 }
 0x200   : > { %v2398_v36 = vsel %vm2396_vm11, %v2397_v57, %v10804_v13  ;;  %v2552_v17 = vand.u32 8388607, %v13073_v52  ;;  %vm3055_vm12 = vcmp.eq.s32.totalorder %v10751_v11, 2  ;;  %v10849_v15 = vshrl.u32 %v2557_v9, 5 }
 0x201   : > { %v2399_v55 = vadd.s32 %v2398_v36, %v2394_v0  ;;  %v2563_v22 = vshrl.u32 %v13162_v5, %v10842_v35  ;;  %v2566_v18 = vshrl.u32 %v13163_v37, %v10842_v35  ;;  %vm3052_vm3 = vcmp.eq.s32.totalorder %v10751_v11, 0 }
 0x202   : > { %v3132_v6 = vsub.s32 32, %v10832_v50  ;;  %v2562_v3 = vshll.u32 %v13153_v49, %v2559_v62  ;;  %v2565_v13 = vshll.u32 %v13162_v5, %v2559_v62  ;;  %v13175_v41 = vmov 2102212464  }
 0x203   : > { %v2569_v56 = vshrl.u32 %v13175_v41, %v10842_v35  ;;  %v2400_v51 = vadd.s32 536870912, %v2399_v55  ;;  %v2568_v2 = vshll.u32 %v13163_v37, %v2559_v62  ;;  %v2571_v45 = vshll.u32 %v13175_v41, %v2559_v62 }
 0x204   : > { %v13176_v23 = vmov 920167782   ;;  %vm4730_vm13 = vcmp.eq.s32.totalorder %v10753_v28, 2  ;;  %v2936_v57 = vcvt.s32.f32 %v2929_v29  ;;  %v3137_v9 = vadd.s32 127, %v3136_v7 }
 0x205   : > { %v2572_v63 = vshrl.u32 %v13176_v23, %v10842_v35  ;;  %v2564_v0 = vor.u32 %v2563_v22, %v2562_v3  ;;  %v2567_v36 = vor.u32 %v2566_v18, %v2565_v13  ;;  %vm4727_vm14 = vcmp.eq.s32.totalorder %v10753_v28, 0 }
 0x206   : > { %v10867_v52 = vshrl.u32 %v2400_v51, 30  ;;  %v2570_v58 = vor.u32 %v2569_v56, %v2568_v2  ;;  %v2575_v53 = vshrl.u32 %v13171_v54, %v10842_v35  ;;  %vm3051_vm5 = vcmp.lt.s32.totalorder %v10751_v11, 2 }
 0x207   : > { %v2573_v47 = vor.u32 %v2572_v63, %v2571_v45  ;;  %v2934_v10 = vand.u32 2147483647, %v2933_v44  ;;  %v3133_v12 = vshll.u32 %v10781_v61, %v10832_v50  ;;  %v2553_v1 = vor.u32 8388608, %v2552_v17 }
 0x208   : > { %v2574_v29 = vshll.u32 %v13176_v23, %v2559_v62  ;;  %v3134_v7 = vshrl.u32 %v3116_v14, %v3132_v6  ;;  %v2402_v22 = vshll.u32 %v10867_v52, 30  ;;  %vm2577_vm15 = vcmp.lt.s32.totalorder %v10849_v15, 1 }
 0x209   : > { %vm2580_vm0 = vcmp.lt.s32.totalorder %v10849_v15, 4  ;;  %vm2579_vm1 = vcmp.lt.s32.totalorder %v10849_v15, 3  ;;  %v2585_v3 = vsel %vm2577_vm15, %v2564_v0, %v2567_v36  ;;  %vm3049_vm2 = vweird.f32 %v10078_v32 }
 0x20a   : > { %v2576_v18 = vor.u32 %v2575_v53, %v2574_v29  ;;  %v2586_v44 = vsel %vm2580_vm0, %v2573_v47, 920167782  ;;  %vm4726_vm4 = vcmp.lt.s32.totalorder %v10753_v28, 2  ;;  %vm3062_vm6 = vcmp.lt.s32.totalorder %v10082_v39, 0 }
 0x20b   : > { %v3138_v61 = vshll.u32 %v3137_v9, 23  ;;  %v10886_v50 = vsub.s32 %v2399_v55, %v2402_v22  ;;  %vm2578_vm9 = vcmp.lt.s32.totalorder %v10849_v15, 2  ;;  %v2587_v53 = vsel %vm2579_vm1, %v2570_v58, %v2586_v44 }
 0x20c   : > { %v13177_v62 = vxor.u32 2147483648, %v10792_v48  ;;  %v10896_v17 = vand.u32 3, %v4620_v46  ;;  %v2588_v6 = vsel %vm2578_vm9, %v2585_v3, %v2587_v53  ;;  %v2593_v13 = vshll.u32 %v2553_v1, 8 }
 0x20d   : > { %v13179_v55 = vxor.u32 2147483648, %v10820_v27  ;;  %v2937_v51 = vmul.f32 %v2936_v57, %v2934_v10  ;;  %v3135_v2 = vor.u32 %v3134_v7, %v3133_v12  ;;  %v2405_v45 = vsub.s32 0, %v10886_v50 }
 0x20e   : > { %v3057_v14 = vsel %vm3055_vm12, %v13177_v62, %v10820_v27  ;;  %13178 = vst [vmem:[#allocation20_spill] sm:$0xff] %v10896_v17  ;;  %v2589_v63 = vsel %vm2577_vm15, %v2567_v36, %v2570_v58  ;;  %v2590_v46 = vsel %vm2580_vm0, %v2576_v18, 1326507024  ;;  %v13180_v1 = vmov %v13177_v62 }
 0x20f   : > { %v3054_v56 = vsel %vm3052_vm3, %v10792_v48, %v13179_v55  ;;  %v10910_v9 = vmul.u32.u64.low %v2593_v13, %v2588_v6  ;;  %v10911_v29 = vmul.u32.u64.high %v2593_v13, %v2588_v6, %v10910_v9  ;;  %v4732_v22 = vsel %vm4730_vm13, %v13180_v1, %v10820_v27 }
 0x210   : > { %v3139_v10 = vor.u32 4788187, %v3138_v61  ;;  %v8015_v12 = vmin.u32 %v2405_v45, %v10886_v50  ;;  %v2582_v57 = vsel %vm2580_vm0, %v2570_v58, 2102212464  ;;  %v13181_v7 = vmov %v13179_v55 }
 0x211   : > { %v4729_v18 = vsel %vm4727_vm14, %v10792_v48, %v13181_v7  ;;  %v2561_v3 = vshrl.u32 %v13153_v49, %v10842_v35  ;;  %v2591_v44 = vsel %vm2579_vm1, %v2573_v47, %v2590_v46  ;;  %v2445_v53 = vand.u32 2139095040, %v10298_v25 }
 0x212   : > { %v3058_v61 = vsel %vm3051_vm5, %v3054_v56, %v3057_v14  ;;  %v2938_v62 = vxor.u32 2147483648, %v2937_v51  ;;  %v13182_v58 = vand.u32 2147483647, %v10082_v39  ;;  %vm2341_vm11 = vcmp.lt.s32.totalorder %v10287_v16, 0 }
 0x213   : > { %v2407_v48 = vclz %v8015_v12  ;;  %v2592_v35 = vsel %vm2578_vm9, %v2589_v63, %v2591_v44  ;;  %v3142_v6 = vcvt.s32.f32 %v3135_v2  ;;  %v3146_v47 = vsub.s32 4, %v10767_v40 }
 0x214   : > { %vm10936_vm10 = vcmp.le.f32.partialorder %v13182_v58, 0.7853982  ;;  %v2581_v11 = vsel %vm2577_vm15, %v2561_v3, %v2564_v0  ;;  %v2583_v14 = vsel %vm2579_vm1, %v2567_v36, %v2582_v57  ;;  %v3140_v55 = vand.u32 2147483647, %v3139_v10 }
 0x215   : > { %v8016_v56 = vadd.s32 4294967294, %v2407_v48  ;;  %v10948_v45 = vmul.u32.u64.low %v2593_v13, %v2592_v35  ;;  %v10949_v46 = vmul.u32.u64.high %v2593_v13, %v2592_v35, %v10948_v45  ;;  %v10953_v1 = vsel %vm3049_vm2, nan, %v3058_v61 }
 0x216   : > { %13185 = vst [vmem:[#allocation21_spill] sm:$0xff] %v10953_v1  ;;  %v4733_v2 = vsel %vm4726_vm4, %v4729_v18, %v4732_v22  ;;  %v13186_v63 = vand.u32 2147483647, %v10287_v16  ;;  %v13077_v0 = vand.u32 2147483647, %v10298_v25  ;;  %v2446_v36 = vshrl.u32 %v2445_v53, 23 }
 0x217   : > { %v2939_v10 = vsel %vm2856_vm7, %v2938_v62, %v2937_v51  ;;  %vm8017_vm3 = vcmp.lt.s32.totalorder %v8016_v56, 0  ;;  %v2584_v57 = vsel %vm2578_vm9, %v2581_v11, %v2583_v14  ;;  %v2603_v7 = vadd.s32 1, %v10911_v29 }
 0x218   : > { %vm10959_vm12 = vcmp.le.f32.partialorder %v13186_v63, 0.7853982  ;;  %v3147_v28 = vsel %vm3062_vm6, %v3146_v47, %v10767_v40  ;;  %v2410_v22 = vsel %vm8017_vm3, 0, %v8016_v56  ;;  %v2425_v18 = vsub.s32 4, %v10867_v52 }
 0x219   : > { %v8018_v3 = vadd.s32 4294967169, %v2446_v36  ;;  %v3143_v44 = vmul.f32 %v3142_v6, %v3140_v55  ;;  %v2395_v53 = vadd.s32 %v10803_v21, %v10812_v42  ;;  %v2411_v61 = vsub.s32 32, %v2410_v22 }
 0x21a   : > { %v2415_v51 = vsub.s32 4294967266, %v2410_v22  ;;  %v2600_v62 = vmul.u32 %v2593_v13, %v2584_v57  ;;  %vm2602_vm7 = vc.u32 %v10949_v46, %v10910_v9  ;;  %v2449_v15 = vand.u32 8388607, %v13077_v0 }
 0x21b   : > { %v2452_v58 = vadd.s32 1, %v8018_v3  ;;  %v2412_v40 = vshll.u32 %v10886_v50, %v2410_v22  ;;  %v2413_v48 = vshrl.u32 %v2395_v53, %v2411_v61  ;;  %v2604_v47 = vsel %vm2602_vm7, %v2603_v7, %v10911_v29 }
 0x21c   : > { %v2416_v35 = vadd.s32 127, %v2415_v51  ;;  %v2426_v21 = vsel %vm2341_vm11, %v2425_v18, %v10867_v52  ;;  %v2605_v42 = vadd.s32 %v2604_v47, %v2600_v62  ;;  %v2651_v13 = vand.u32 2139095040, %v10372_v34 }
 0x21d   : > { %vm2453_vm13 = vcmp.gt.s32.totalorder %v2452_v58, 0  ;;  %v2942_v6 = vsel %vm10704_vm8, %v10080_v38, %v2939_v10  ;;  %v2414_v11 = vor.u32 %v2413_v48, %v2412_v40  ;;  %v3144_v50 = vxor.u32 2147483648, %v3143_v44 }
 0x21e   : > { %v2417_v14 = vshll.u32 %v2416_v35, 23  ;;  %v2454_v55 = vsel %vm2453_vm13, %v2452_v58, 0  ;;  %v10990_v56 = vsel %vm10936_vm10, 0, %v3147_v28  ;;  %v2606_v29 = vadd.s32 536870912, %v2605_v42 }
 0x21f   : > { %v2456_v45 = vand.u32 31, %v2454_v55  ;;  %v10994_v52 = vsel %vm3049_vm2, nan, %v4733_v2  ;;  %v10998_v36 = vsel %vm10959_vm12, 0, %v2426_v21  ;;  %v2450_v4 = vor.u32 8388608, %v2449_v15 }
 0x220   : > { %13189 = vst [vmem:[#allocation22_spill] sm:$0xff] %v10994_v52  ;;  %v2418_v63 = vor.u32 4788187, %v2417_v14  ;;  %9189 = vcosq.f32 %v2942_v6  ;;  %v11000_v10 = vshrl.u32 %v2606_v29, 30  ;;  %v2652_v7 = vshrl.u32 %v2651_v13, 23 }
 0x221   : > { %v2457_v57 = vsub.s32 32, %v2456_v45  ;;  %9191 = vsinq.f32 %v2942_v6  ;;  %v11003_v28 = vadd.s32 3, %v10990_v56  ;;  %v2421_v18 = vcvt.s32.f32 %v2414_v11 }
 0x222   : > { %v2419_v22 = vand.u32 2147483647, %v2418_v63  ;;  %v11007_v32 = vsel %vm3062_vm6, %v3144_v50, %v3143_v44  ;;  %v11010_v2 = vadd.s32 3, %v10998_v36  ;;  %v2608_v3 = vshll.u32 %v11000_v10, 30 }
 0x223   : > { %v13076_v53 = vand.u32 2147483647, %v10372_v34  ;;  %v11016_v51 = vadd.s32 %v10910_v9, %v10949_v46  ;;  %v2460_v62 = vshrl.u32 %v13162_v5, %v2457_v57  ;;  %v11019_v15 = vshll.u32 %v2450_v4, 8 }
 0x224   : > { %v2422_v61 = vmul.f32 %v2421_v18, %v2419_v22  ;;  %v11021_v58 = vsub.s32 %v2605_v42, %v2608_v3  ;;  %v2463_v44 = vshrl.u32 %v13163_v37, %v2457_v57  ;;  %v2469_v40 = vshrl.u32 %v13176_v23, %v2457_v57 }
 0x225   : > { %v8026_v48 = vadd.s32 4294967169, %v2652_v7  ;;  %v2459_v47 = vshll.u32 %v13153_v49, %v2456_v45  ;;  %v2466_v21 = vshrl.u32 %v13175_v41, %v2457_v57  ;;  %v2472_v13 = vshrl.u32 %v13171_v54, %v2457_v57 }
 0x226   : > { %v2423_v35 = vxor.u32 2147483648, %v2422_v61  ;;  %v2611_v9 = vsub.s32 0, %v11021_v58  ;;  %v2455_v46 = vshrl.u32 %v2454_v55, 5  ;;  %v2462_v6 = vshll.u32 %v13162_v5, %v2456_v45 }
 0x227   : > { %v2468_v42 = vshll.u32 %v13175_v41, %v2456_v45  ;;  %v2461_v14 = vor.u32 %v2460_v62, %v2459_v47  ;;  %v2465_v50 = vshll.u32 %v13163_v37, %v2456_v45  ;;  %v2471_v29 = vshll.u32 %v13176_v23, %v2456_v45 }
 0x228   : > { %v2424_v11 = vsel %vm2341_vm11, %v2423_v35, %v2422_v61  ;;  %v8023_v4 = vmin.u32 %v2611_v9, %v11021_v58  ;;  %v2464_v7 = vor.u32 %v2463_v44, %v2462_v6  ;;  %v11041_v3 = vand.u32 8388607, %v13076_v53 }
 0x229   : > { %v2427_v63 = vsel %vm10959_vm12, %v10287_v16, %v2424_v11  ;;  %v2470_v55 = vor.u32 %v2469_v40, %v2468_v42  ;;  %v2467_v22 = vor.u32 %v2466_v21, %v2465_v50  ;;  %v2473_v18 = vor.u32 %v2472_v13, %v2471_v29 }
 0x22a   : > { %v2658_v61 = vadd.s32 1, %v8026_v48  ;;  %v11043_v62 = vpop.eup %9189  ;;  %v2613_v35 = vclz %v8023_v4  ;;  %v2458_v45 = vshrl.u32 %v13153_v49, %v2457_v57  ;;  %vm2474_vm8 = vcmp.lt.s32.totalorder %v2455_v46, 1 }
 0x22b   : > { %13190 = vst [vmem:[#allocation23_spill] sm:$0xff] %v11043_v62  ;;  %v3166_v12 = vand.u32 2139095040, %v10483_v59  ;;  %v11047_v47 = vpop.eup %9191  ;;  %9193 = vcosq.f32 %v2427_v63  ;;  %vm2475_vm14 = vcmp.lt.s32.totalorder %v2455_v46, 2  ;;  %vm2476_vm5 = vcmp.lt.s32.totalorder %v2455_v46, 3 }
 0x22c   : > { %13191 = vst [vmem:[#allocation24_spill] sm:$0xff] %v11047_v47  ;;  %vm2477_vm15 = vcmp.lt.s32.totalorder %v2455_v46, 4  ;;  %9195 = vsinq.f32 %v2427_v63  ;;  %v8024_v44 = vadd.s32 4294967294, %v2613_v35  ;;  %v2482_v40 = vsel %vm2474_vm8, %v2461_v14, %v2464_v7 }
 0x22d   : > { %v2483_v21 = vsel %vm2477_vm15, %v2470_v55, 920167782  ;;  %vm2547_vm0 = vcmp.lt.s32.totalorder %v10289_v60, 0  ;;  %v2479_v48 = vsel %vm2477_vm15, %v2467_v22, 2102212464  ;;  %v2486_v57 = vsel %vm2474_vm8, %v2464_v7, %v2467_v22 }
 0x22e   : > { %v2484_v13 = vsel %vm2476_vm5, %v2467_v22, %v2483_v21  ;;  %v2487_v9 = vsel %vm2477_vm15, %v2473_v18, 1326507024  ;;  %vm8025_vm1 = vcmp.lt.s32.totalorder %v8024_v44, 0  ;;  %v2478_v6 = vsel %vm2474_vm8, %v2458_v45, %v2461_v14 }
 0x22f   : > { %v2485_v42 = vsel %vm2475_vm14, %v2482_v40, %v2484_v13  ;;  %v2488_v11 = vsel %vm2476_vm5, %v2470_v55, %v2487_v9  ;;  %v2616_v50 = vsel %vm8025_vm1, 0, %v8024_v44  ;;  %v13192_v35 = vand.u32 2147483647, %v10289_v60 }
 0x230   : > { %v2489_v29 = vsel %vm2475_vm14, %v2486_v57, %v2488_v11  ;;  %v11058_v63 = vmul.u32.u64.low %v11019_v15, %v2485_v42  ;;  %v11059_v4 = vmul.u32.u64.high %v11019_v15, %v2485_v42, %v11058_v63  ;;  %v2617_v18 = vsub.s32 32, %v2616_v50 }
 0x231   : > { %vm11064_vm2 = vcmp.le.f32.partialorder %v13192_v35, 0.7853982  ;;  %v2621_v14 = vsub.s32 4294967266, %v2616_v50  ;;  %v2480_v45 = vsel %vm2476_vm5, %v2464_v7, %v2479_v48  ;;  %vm2659_vm4 = vcmp.gt.s32.totalorder %v2658_v61, 0 }
 0x232   : > { %v2631_v55 = vsub.s32 4, %v11000_v10  ;;  %v11071_v44 = vmul.u32.u64.low %v11019_v15, %v2489_v29  ;;  %v11072_v40 = vmul.u32.u64.high %v11019_v15, %v2489_v29, %v11071_v44  ;;  %v2660_v21 = vsel %vm2659_vm4, %v2658_v61, 0 }
 0x233   : > { %v2618_v13 = vshll.u32 %v11021_v58, %v2616_v50  ;;  %v2619_v57 = vshrl.u32 %v11016_v51, %v2617_v18  ;;  %v2622_v9 = vadd.s32 127, %v2621_v14  ;;  %v2662_v42 = vand.u32 31, %v2660_v21 }
 0x234   : > { %v11077_v11 = vand.u32 3, %v10998_v36  ;;  %v11080_v35 = vand.u32 3, %v11010_v2  ;;  %v2481_v7 = vsel %vm2475_vm14, %v2478_v6, %v2480_v45  ;;  %v2500_v48 = vadd.s32 1, %v11059_v4 }
 0x235   : > { %v11088_v61 = vsel %vm10936_vm10, %v10082_v39, %v11007_v32  ;;  %v11091_v51 = vand.u32 3, %v10990_v56  ;;  %v2620_v58 = vor.u32 %v2619_v57, %v2618_v13  ;;  %v2623_v50 = vshll.u32 %v2622_v9, 23  ;;  %v11093_v36 = vpop.eup %9193 }
 0x236   : > { %v11096_v2 = vand.u32 3, %v11003_v28  ;;  %vm2499_vm6 = vc.u32 %v11072_v40, %v11058_v63  ;;  %v2656_v46 = vor.u32 8388608, %v11041_v3  ;;  %v3167_v6 = vshrl.u32 %v3166_v12, 23  ;;  %v11101_v29 = vpop.eup %9195 }
 0x237   : > { %13195 = vst [vmem:[#allocation25_spill] sm:$0xff] %v11091_v51  ;;  %v2624_v27 = vor.u32 4788187, %v2623_v50  ;;  %v2632_v56 = vsel %vm2547_vm0, %v2631_v55, %v11000_v10  ;;  %v2497_v32 = vmul.u32 %v11019_v15, %v2481_v7  ;;  %v2663_v18 = vsub.s32 32, %v2662_v42 }
 0x238   : > { %13196 = vst [vmem:[#allocation26_spill] sm:$0xff] %v11096_v2  ;;  %9197 = vcosq.f32 %v11088_v61  ;;  %vm2434_vm9 = vcmp.eq.s32.totalorder %v11077_v11, 0  ;;  %vm2437_vm10 = vcmp.eq.s32.totalorder %v11077_v11, 2  ;;  %vm4106_vm11 = vcmp.eq.s32.totalorder %v11080_v35, 2 }
 0x239   : > { %v2501_v28 = vsel %vm2499_vm6, %v2500_v48, %v11059_v4  ;;  %v2625_v3 = vand.u32 2147483647, %v2624_v27  ;;  %v2627_v12 = vcvt.s32.f32 %v2620_v58  ;;  %v13080_v45 = vand.u32 2147483647, %v10483_v59 }
 0x23a   : > { %v2502_v14 = vadd.s32 %v2501_v28, %v2497_v32  ;;  %v11115_v10 = vsel %vm11064_vm2, 0, %v2632_v56  ;;  %v11117_v15 = vshrl.u32 %v2660_v21, 5  ;;  %v11119_v55 = vshll.u32 %v2656_v46, 8 }
 0x23b   : > { %v8046_v44 = vadd.s32 4294967169, %v3167_v6  ;;  %v2628_v13 = vmul.f32 %v2627_v12, %v2625_v3  ;;  %v2666_v9 = vshrl.u32 %v13162_v5, %v2663_v18  ;;  %v2669_v4 = vshrl.u32 %v13163_v37, %v2663_v18 }
 0x23c   : > { %v2503_v57 = vadd.s32 536870912, %v2502_v14  ;;  %v2435_v7 = vxor.u32 2147483648, %v11101_v29  ;;  %v2438_v48 = vxor.u32 2147483648, %v11093_v36  ;;  %v2672_v58 = vshrl.u32 %v13175_v41, %v2663_v18 }
 0x23d   : > { %v2675_v50 = vshrl.u32 %v13176_v23, %v2663_v18  ;;  %v2629_v27 = vxor.u32 2147483648, %v2628_v13  ;;  %vm2444_vm12 = vcmp.lt.s32.totalorder %v10298_v25, 0  ;;  %v2665_v46 = vshll.u32 %v13153_v49, %v2662_v42 }
 0x23e   : > { %v2504_v21 = vshrl.u32 %v2503_v57, 30  ;;  %v2668_v6 = vshll.u32 %v13162_v5, %v2662_v42  ;;  %v2671_v56 = vshll.u32 %v13163_v37, %v2662_v42  ;;  %v2674_v32 = vshll.u32 %v13175_v41, %v2662_v42 }
 0x23f   : > { %v2677_v28 = vshll.u32 %v13176_v23, %v2662_v42  ;;  %v2678_v3 = vshrl.u32 %v13171_v54, %v2663_v18  ;;  %v2667_v53 = vor.u32 %v2666_v9, %v2665_v46  ;;  %v11136_v52 = vand.u32 8388607, %v13080_v45 }
 0x240   : > { %v2505_v12 = vshll.u32 %v2504_v21, 30  ;;  %v2670_v0 = vor.u32 %v2669_v4, %v2668_v6  ;;  %vm4103_vm3 = vcmp.eq.s32.totalorder %v11080_v35, 0  ;;  %v2630_v57 = vsel %vm2547_vm0, %v2629_v27, %v2628_v13 }
 0x241   : > { %v2673_v2 = vor.u32 %v2672_v58, %v2671_v56  ;;  %v2676_v17 = vor.u32 %v2675_v50, %v2674_v32  ;;  %v2679_v1 = vor.u32 %v2678_v3, %v2677_v28  ;;  %v2436_v42 = vsel %vm2434_vm9, %v11093_v36, %v2435_v7 }
 0x242   : > { %v2439_v9 = vsel %vm2437_vm10, %v2438_v48, %v11101_v29  ;;  %v4108_v4 = vsel %vm4106_vm11, %v2438_v48, %v11101_v29  ;;  %v13197_v46 = vand.u32 2147483647, %v10298_v25  ;;  %v11156_v13 = vsub.s32 %v2502_v14, %v2505_v12  ;;  %v11158_v58 = vpop.eup %9197 }
 0x243   : > { %13200 = vst [vmem:[#allocation27_spill] sm:$0xff] %v11158_v58  ;;  %vm2433_vm13 = vcmp.lt.s32.totalorder %v11077_v11, 2  ;;  %v2528_v50 = vsub.s32 4, %v2504_v21  ;;  %v2664_v27 = vshrl.u32 %v13153_v49, %v2663_v18  ;;  %vm2680_vm8 = vcmp.lt.s32.totalorder %v11117_v15, 1 }
 0x244   : > { %vm11152_vm7 = vcmp.le.f32.partialorder %v13197_v46, 0.7853982  ;;  %vm2681_vm14 = vcmp.lt.s32.totalorder %v11117_v15, 2  ;;  %vm4102_vm5 = vcmp.lt.s32.totalorder %v11080_v35, 2  ;;  %v2633_v29 = vsel %vm11064_vm2, %v10289_v60, %v2630_v57  ;;  %v11224_v35 = vpop.f32.mrb[8].mxu0 }
 0x245   : > { %v2508_v14 = vsub.s32 0, %v11156_v13  ;;  %vm2683_vm15 = vcmp.lt.s32.totalorder %v11117_v15, 4  ;;  %v2688_v48 = vsel %vm2680_vm8, %v2667_v53, %v2670_v0  ;;  %vm2682_vm0 = vcmp.lt.s32.totalorder %v11117_v15, 3 }
 0x246   : > { %v2689_v18 = vsel %vm2683_vm15, %v2676_v17, 920167782  ;;  %v2692_v56 = vsel %vm2680_vm8, %v2670_v0, %v2673_v2  ;;  %v2693_v32 = vsel %vm2683_vm15, %v2679_v1, 1326507024  ;;  %v2685_v3 = vsel %vm2683_vm15, %v2673_v2, 2102212464 }
 0x247   : > { %v8019_v28 = vmin.u32 %v2508_v14, %v11156_v13  ;;  %v2690_v22 = vsel %vm2682_vm0, %v2673_v2, %v2689_v18  ;;  %v2694_v12 = vsel %vm2682_vm0, %v2676_v17, %v2693_v32  ;;  %9199 = vcosq.f32 %v2633_v29 }
 0x248   : > { %v2529_v57 = vsel %vm2444_vm12, %v2528_v50, %v2504_v21  ;;  %v2691_v46 = vsel %vm2681_vm14, %v2688_v48, %v2690_v22  ;;  %v2695_v45 = vsel %vm2681_vm14, %v2692_v56, %v2694_v12  ;;  %vm2431_vm1 = vweird.f32 %v10287_v16 }
 0x249   : > { %v2510_v1 = vclz %v8019_v28  ;;  %v11188_v14 = vmul.u32.u64.low %v11119_v55, %v2695_v45  ;;  %v11189_v58 = vmul.u32.u64.high %v11119_v55, %v2695_v45, %v11188_v14  ;;  %v3173_v2 = vadd.s32 1, %v8046_v44 }
 0x24a   : > { %v2684_v17 = vsel %vm2680_vm8, %v2664_v27, %v2667_v53  ;;  %v2686_v21 = vsel %vm2682_vm0, %v2670_v0, %v2685_v3  ;;  %v11196_v50 = vmul.u32.u64.low %v11119_v55, %v2691_v46  ;;  %v11197_v48 = vmul.u32.u64.high %v11119_v55, %v2691_v46, %v11196_v50 }
 0x24b   : > { %v4105_v18 = vsel %vm4103_vm3, %v11093_v36, %v2435_v7  ;;  %9201 = vsinq.f32 %v2633_v29  ;;  %v8020_v56 = vadd.s32 4294967294, %v2510_v1  ;;  %vm3174_vm2 = vcmp.gt.s32.totalorder %v3173_v2, 0  ;;  %v11230_v1 = vpop.f32.mrb[9].mxu0 }
 0x24c   : > { %v4308_v45 = vadd.s32 3, %v11115_v10  ;;  %v2498_v53 = vadd.s32 %v11058_v63, %v11072_v40  ;;  %v2531_v0 = vsel %vm11152_vm7, 0, %v2529_v57  ;;  %v3175_v44 = vsel %vm3174_vm2, %v3173_v2, 0 }
 0x24d   : > { %v2440_v27 = vsel %vm2433_vm13, %v2436_v42, %v2439_v9  ;;  %vm8021_vm4 = vcmp.lt.s32.totalorder %v8020_v56, 0  ;;  %v2687_v32 = vsel %vm2681_vm14, %v2684_v17, %v2686_v21  ;;  %vm2705_vm6 = vc.u32 %v11189_v58, %v11196_v50 }
 0x24e   : > { %v4109_v36 = vsel %vm4102_vm5, %v4105_v18, %v4108_v4  ;;  %v2513_v7 = vsel %vm8021_vm4, 0, %v8020_v56  ;;  %v2706_v63 = vadd.s32 1, %v11197_v48  ;;  %v3177_v40 = vand.u32 31, %v3175_v44  ;;  %v11226_v4 = vpop.f32.mrb[8].mxu1 }
 0x24f   : > { %v2514_v29 = vsub.s32 32, %v2513_v7  ;;  %v2518_v28 = vsub.s32 4294967266, %v2513_v7  ;;  %v4204_v3 = vadd.s32 3, %v2531_v0  ;;  %v3171_v11 = vor.u32 8388608, %v11136_v52  ;;  %v11232_v52 = vpop.f32.mrb[9].mxu1 }
 0x250   : > { %9203 = vsinq.f32 %v11088_v61  ;;  %v11220_v15 = vand.u32 3, %v11115_v10  ;;  %v2703_v42 = vmul.u32 %v11119_v55, %v2687_v32  ;;  %v2707_v9 = vsel %vm2705_vm6, %v2706_v63, %v11197_v48  ;;  %v11257_v32 = vpop.f32.mrb[10].mxu1 }
 0x251   : > { %v11228_v22 = vand.u32 3, %v4308_v45  ;;  %v2516_v12 = vshrl.u32 %v2498_v53, %v2514_v29  ;;  %v2519_v57 = vadd.s32 127, %v2518_v28  ;;  %v3178_v46 = vsub.s32 32, %v3177_v40  ;;  %v11234_v61 = vpop.eup %9199 }
 0x252   : > { %v11238_v10 = vsel %vm2431_vm1, nan, %v2440_v27  ;;  %v11242_v55 = vsel %vm2431_vm1, nan, %v4109_v36  ;;  %v2515_v14 = vshll.u32 %v11156_v13, %v2513_v7  ;;  %v2708_v2 = vadd.s32 %v2707_v9, %v2703_v42  ;;  %v11255_v27 = vpop.f32.mrb[10].mxu0 }
 0x253   : > { %13201 = vst [vmem:[#allocation28_spill] sm:$0xff] %v11238_v10  ;;  %13202 = vst [vmem:[#allocation29_spill] sm:$0xff] %v11242_v55  ;;  %v2520_v17 = vshll.u32 %v2519_v57, 23  ;;  %v11245_v21 = vand.u32 3, %v2531_v0  ;;  %v11247_v48 = vand.u32 3, %v4204_v3  ;;  %v11249_v18 = vshll.u32 %v3171_v11, 8 }
 0x254   : > { %vm2643_vm9 = vcmp.eq.s32.totalorder %v11220_v15, 2  ;;  %v2517_v56 = vor.u32 %v2516_v12, %v2515_v14  ;;  %v2709_v45 = vadd.s32 536870912, %v2708_v2  ;;  %v11252_v53 = vshrl.u32 %v3175_v44, 5  ;;  %v11265_v29 = vpop.f32.mrb[11].mxu0  ;;  %v11267_v44 = vpop.f32.mrb[11].mxu1 }
 0x255   : > { %13203 = vst [vmem:[#allocation30_spill] sm:$0xff] %v11245_v21  ;;  %13204 = vst [vmem:[#allocation31_spill] sm:$0xff] %v11247_v48  ;;  %v3180_v16 = vshll.u32 %v13153_v49, %v3177_v40  ;;  %v11259_v13 = vpop.eup %9201  ;;  %vm2640_vm10 = vcmp.eq.s32.totalorder %v11220_v15, 0  ;;  %v2521_v0 = vor.u32 4788187, %v2520_v17  ;;  %v3181_v36 = vshrl.u32 %v13162_v5, %v3178_v46 }
 0x256   : > { %v3183_v7 = vshll.u32 %v13162_v5, %v3177_v40  ;;  %v3184_v63 = vshrl.u32 %v13163_v37, %v3178_v46  ;;  %vm2650_vm11 = vcmp.lt.s32.totalorder %v10372_v34, 0  ;;  %v2710_v28 = vshrl.u32 %v2709_v45, 30 }
 0x257   : > { %v3186_v3 = vshll.u32 %v13163_v37, %v3177_v40  ;;  %v3187_v11 = vshrl.u32 %v13175_v41, %v3178_v46  ;;  %v3189_v42 = vshll.u32 %v13175_v41, %v3177_v40  ;;  %v2644_v9 = vxor.u32 2147483648, %v11234_v61 }
 0x258   : > { %v3190_v12 = vshrl.u32 %v13176_v23, %v3178_v46  ;;  %v3192_v57 = vshll.u32 %v13176_v23, %v3177_v40  ;;  %v2641_v17 = vxor.u32 2147483648, %v11259_v13  ;;  %v2522_v55 = vand.u32 2147483647, %v2521_v0 }
 0x259   : > { %v2711_v48 = vshll.u32 %v2710_v28, 30  ;;  %v3193_v45 = vshrl.u32 %v13171_v54, %v3178_v46  ;;  %v3179_v10 = vshrl.u32 %v13153_v49, %v3178_v46  ;;  %v3182_v21 = vor.u32 %v3181_v36, %v3180_v16 }
 0x25a   : > { %v3185_v51 = vor.u32 %v3184_v63, %v3183_v7  ;;  %v3191_v39 = vor.u32 %v3190_v12, %v3189_v42  ;;  %v11280_v24 = vpop.eup %9203  ;;  %vm4311_vm3 = vcmp.eq.s32.totalorder %v11228_v22, 0  ;;  %vm4314_vm13 = vcmp.eq.s32.totalorder %v11228_v22, 2 }
 0x25b   : > { %13205 = vst [vmem:[#allocation32_spill] sm:$0xff] %v11280_v24  ;;  %v2524_v40 = vcvt.s32.f32 %v2517_v56  ;;  %v11284_v62 = vsub.s32 %v2708_v2, %v2711_v48  ;;  %v3188_v14 = vor.u32 %v3187_v11, %v3186_v3  ;;  %vm3195_vm8 = vcmp.lt.s32.totalorder %v11252_v53, 1 }
 0x25c   : > { %vm2639_vm14 = vcmp.lt.s32.totalorder %v11220_v15, 2  ;;  %v13206_v0 = vand.u32 2147483647, %v10372_v34  ;;  %v2734_v16 = vsub.s32 4, %v2710_v28  ;;  %v3194_v36 = vor.u32 %v3193_v45, %v3192_v57 }
 0x25d   : > { %vm3198_vm15 = vcmp.lt.s32.totalorder %v11252_v53, 4  ;;  %v3372_v7 = vand.u32 2139095040, %v10586_v26  ;;  %v2525_v56 = vmul.f32 %v2524_v40, %v2522_v55  ;;  %v2714_v2 = vsub.s32 0, %v11284_v62 }
 0x25e   : > { %vm11290_vm5 = vcmp.le.f32.partialorder %v13206_v0, 0.7853982  ;;  %vm3197_vm0 = vcmp.lt.s32.totalorder %v11252_v53, 3  ;;  %v3200_v48 = vsel %vm3198_vm15, %v3188_v14, 2102212464  ;;  %v2645_v63 = vsel %vm2643_vm9, %v2644_v9, %v11259_v13 }
 0x25f   : > { %vm4310_vm1 = vcmp.lt.s32.totalorder %v11228_v22, 2  ;;  %vm3196_vm2 = vcmp.lt.s32.totalorder %v11252_v53, 2  ;;  %v3203_v3 = vsel %vm3195_vm8, %v3182_v21, %v3185_v51  ;;  %v3204_v55 = vsel %vm3198_vm15, %v3191_v39, 920167782 }
 0x260   : > { %vm2637_vm4 = vweird.f32 %v10289_v60  ;;  %v2642_v11 = vsel %vm2640_vm10, %v11234_v61, %v2641_v17  ;;  %v8027_v42 = vmin.u32 %v2714_v2, %v11284_v62  ;;  %v3199_v12 = vsel %vm3195_vm8, %v3179_v10, %v3182_v21 }
 0x261   : > { %v3201_v57 = vsel %vm3197_vm0, %v3185_v51, %v3200_v48  ;;  %v2735_v45 = vsel %vm2650_vm11, %v2734_v16, %v2710_v28  ;;  %v3205_v40 = vsel %vm3197_vm0, %v3188_v14, %v3204_v55  ;;  %v3207_v0 = vsel %vm3195_vm8, %v3185_v51, %v3188_v14 }
 0x262   : > { %v3208_v24 = vsel %vm3198_vm15, %v3194_v36, 1326507024  ;;  %v2526_v47 = vxor.u32 2147483648, %v2525_v56  ;;  %v2716_v2 = vclz %v8027_v42  ;;  %v3206_v10 = vsel %vm3196_vm2, %v3203_v3, %v3205_v40 }
 0x263   : > { %v3209_v21 = vsel %vm3197_vm0, %v3191_v39, %v3208_v24  ;;  %v3202_v28 = vsel %vm3196_vm2, %v3199_v12, %v3201_v57  ;;  %v11335_v48 = vmul.u32.u64.low %v11249_v18, %v3206_v10  ;;  %v11336_v51 = vmul.u32.u64.high %v11249_v18, %v3206_v10, %v11335_v48 }
 0x264   : > { %v3210_v16 = vsel %vm3196_vm2, %v3207_v0, %v3209_v21  ;;  %v8028_v14 = vadd.s32 4294967294, %v2716_v2  ;;  %v3373_v3 = vshrl.u32 %v3372_v7, 23  ;;  %v4313_v24 = vsel %vm4311_vm3, %v11234_v61, %v2641_v17 }
 0x265   : > { %v11340_v36 = vmul.u32.u64.low %v11249_v18, %v3210_v16  ;;  %v11341_v55 = vmul.u32.u64.high %v11249_v18, %v3210_v16, %v11340_v36  ;;  %v4316_v39 = vsel %vm4314_vm13, %v2644_v9, %v11259_v13  ;;  %v2704_v53 = vadd.s32 %v11196_v50, %v11189_v58 }
 0x266   : > { %v13209_v42 = vand.u32 2147483647, %v10586_v26  ;;  %v2646_v57 = vsel %vm2639_vm14, %v2642_v11, %v2645_v63  ;;  %vm8029_vm6 = vcmp.lt.s32.totalorder %v8028_v14, 0  ;;  %v2737_v7 = vsel %vm11290_vm5, 0, %v2735_v45 }
 0x267   : > { %v8054_v40 = vadd.s32 4294967169, %v3373_v3  ;;  %v2527_v61 = vsel %vm2444_vm12, %v2526_v47, %v2525_v56  ;;  %v2719_v17 = vsel %vm8029_vm6, 0, %v8028_v14  ;;  %v3218_v13 = vmul.u32 %v11249_v18, %v3202_v28 }
 0x268   : > { %v11353_v12 = vand.u32 8388607, %v13209_v42  ;;  %v3221_v58 = vadd.s32 1, %v11336_v51  ;;  %v4317_v50 = vsel %vm4310_vm1, %v4313_v24, %v4316_v39  ;;  %v2720_v9 = vsub.s32 32, %v2719_v17 }
 0x269   : > { %v2724_v0 = vsub.s32 4294967266, %v2719_v17  ;;  %v3269_v15 = vand.u32 2139095040, %v10719_v33  ;;  %v11368_v63 = vsel %vm2637_vm4, nan, %v2646_v57  ;;  %v4412_v11 = vadd.s32 3, %v2737_v7 }
 0x26a   : > { %13210 = vst [vmem:[#allocation33_spill] sm:$0xff] %v11368_v63  ;;  %vm3165_vm9 = vcmp.lt.s32.totalorder %v10483_v59, 0  ;;  %vm3220_vm12 = vc.u32 %v11341_v55, %v11335_v48  ;;  %v3379_v47 = vadd.s32 1, %v8054_v40  ;;  %v2530_v22 = vsel %vm11152_vm7, %v10298_v25, %v2527_v61 }
 0x26b   : > { %v2722_v18 = vshrl.u32 %v2704_v53, %v2720_v9  ;;  %v2725_v56 = vadd.s32 127, %v2724_v0  ;;  %v3222_v45 = vsel %vm3220_vm12, %v3221_v58, %v11336_v51  ;;  %v2721_v2 = vshll.u32 %v11284_v62, %v2719_v17  ;;  %v11389_v51 = vpop.f32.mrb[12].mxu0  ;;  %v11391_v62 = vpop.f32.mrb[12].mxu1 }
 0x26c   : > { %v3223_v10 = vadd.s32 %v3222_v45, %v3218_v13  ;;  %vm3380_vm10 = vcmp.gt.s32.totalorder %v3379_v47, 0  ;;  %v13092_v21 = vand.u32 2147483647, %v10719_v33  ;;  %v11381_v28 = vsel %vm2637_vm4, nan, %v4317_v50  ;;  %13215 = vst [vmem:[#allocation35_spill] sm:$0xff] %v11391_v62  ;;  %v11395_v42 = vpop.f32.mrb[13].mxu0 }
 0x26d   : > { %13211 = vst [vmem:[#allocation34_spill] sm:$0xff] %v11381_v28  ;;  %v2726_v16 = vshll.u32 %v2725_v56, 23  ;;  %v13212_v14 = vand.u32 2147483647, %v10483_v59  ;;  %v3381_v36 = vsel %vm3380_vm10, %v3379_v47, 0  ;;  %v3270_v3 = vshrl.u32 %v3269_v15, 23 }
 0x26e   : > { %v2723_v24 = vor.u32 %v2722_v18, %v2721_v2  ;;  %v11393_v39 = vand.u32 3, %v2737_v7  ;;  %v3224_v53 = vadd.s32 536870912, %v3223_v10  ;;  %v3383_v60 = vand.u32 31, %v3381_v36  ;;  %13217 = vst [vmem:[#allocation37_spill] sm:$0xff] %v11395_v42  ;;  %v11397_v57 = vpop.f32.mrb[13].mxu1  ;;  %v11402_v13 = vpop.f32.mrb[14].mxu0 }
 0x26f   : > { %vm11385_vm3 = vcmp.le.f32.partialorder %v13212_v14, 0.7853982  ;;  %13218 = vst [vmem:[#allocation38_spill] sm:$0xff] %v11397_v57  ;;  %9205 = vcosq.f32 %v2530_v22  ;;  %v2727_v40 = vor.u32 4788187, %v2726_v16  ;;  %v11399_v61 = vand.u32 3, %v4412_v11 }
 0x270   : > { %13216 = vst [vmem:[#allocation36_spill] sm:$0xff] %v11393_v39  ;;  %v3377_v17 = vor.u32 8388608, %v11353_v12  ;;  %13220 = vst [vmem:[#allocation40_spill] sm:$0xff] %v11402_v13  ;;  %v11404_v58 = vpop.f32.mrb[14].mxu1  ;;  %9207 = vsinq.f32 %v2530_v22  ;;  %v3225_v50 = vshrl.u32 %v3224_v53, 30  ;;  %v3384_v7 = vsub.s32 32, %v3383_v60 }
 0x271   : > { %13219 = vst [vmem:[#allocation39_spill] sm:$0xff] %v11399_v61  ;;  %13221 = vst [vmem:[#allocation41_spill] sm:$0xff] %v11404_v58  ;;  %v11407_v0 = vpop.f32.mrb[15].mxu0  ;;  %v11409_v15 = vpop.f32.mrb[15].mxu1  ;;  %v2728_v47 = vand.u32 2147483647, %v2727_v40  ;;  %v2730_v12 = vcvt.s32.f32 %v2723_v24  ;;  %v3386_v22 = vshll.u32 %v13153_v49, %v3383_v60  ;;  %v3389_v14 = vshll.u32 %v13162_v5, %v3383_v60 }
 0x272   : > { %13222 = vst [vmem:[#allocation42_spill] sm:$0xff] %v11407_v0  ;;  %13223 = vst [vmem:[#allocation43_spill] sm:$0xff] %v11409_v15  ;;  %v3382_v18 = vshrl.u32 %v3381_v36, 5  ;;  %v8050_v56 = vadd.s32 4294967169, %v3270_v3  ;;  %v11413_v11 = vand.u32 8388607, %v13092_v21  ;;  %v3387_v16 = vshrl.u32 %v13162_v5, %v3384_v7 }
 0x273   : > { %v3226_v45 = vshll.u32 %v3225_v50, 30  ;;  %v3249_v2 = vsub.s32 4, %v3225_v50  ;;  %v3392_v53 = vshll.u32 %v13163_v37, %v3383_v60  ;;  %v3395_v9 = vshll.u32 %v13175_v41, %v3383_v60 }
 0x274   : > { %v3390_v36 = vshrl.u32 %v13163_v37, %v3384_v7  ;;  %v3396_v3 = vshrl.u32 %v13176_v23, %v3384_v7  ;;  %v3398_v24 = vshll.u32 %v13176_v23, %v3383_v60  ;;  %v2731_v21 = vmul.f32 %v2730_v12, %v2728_v47 }
 0x275   : > { %v11420_v40 = vsub.s32 %v3223_v10, %v3226_v45  ;;  %v3250_v28 = vsel %vm3165_vm9, %v3249_v2, %v3225_v50  ;;  %v3393_v61 = vshrl.u32 %v13175_v41, %v3384_v7  ;;  %v3399_v63 = vshrl.u32 %v13171_v54, %v3384_v7 }
 0x276   : > { %v3219_v39 = vadd.s32 %v11335_v48, %v11341_v55  ;;  %v11432_v45 = vshll.u32 %v3377_v17, 8  ;;  %v3475_v15 = vand.u32 2139095040, %v10797_v30  ;;  %v3385_v0 = vshrl.u32 %v13153_v49, %v3384_v7 }
 0x277   : > { %v3229_v10 = vsub.s32 0, %v11420_v40  ;;  %v3388_v60 = vor.u32 %v3387_v16, %v3386_v22  ;;  %v3274_v47 = vor.u32 8388608, %v11413_v11  ;;  %v3276_v12 = vadd.s32 1, %v8050_v56 }
 0x278   : > { %v3252_v2 = vsel %vm11385_vm3, 0, %v3250_v28  ;;  %v3391_v25 = vor.u32 %v3390_v36, %v3389_v14  ;;  %v3397_v58 = vor.u32 %v3396_v3, %v3395_v9  ;;  %v2732_v55 = vxor.u32 2147483648, %v2731_v21 }
 0x279   : > { %v8047_v50 = vmin.u32 %v3229_v10, %v11420_v40  ;;  %v11440_v48 = vpop.eup %9205  ;;  %v3394_v17 = vor.u32 %v3393_v61, %v3392_v53  ;;  %v3400_v13 = vor.u32 %v3399_v63, %v3398_v24  ;;  %vm3401_vm7 = vcmp.lt.s32.totalorder %v3382_v18, 1 }
 0x27a   : > { %13224 = vst [vmem:[#allocation44_spill] sm:$0xff] %v11440_v48  ;;  %v11442_v57 = vpop.eup %9207  ;;  %vm3403_vm13 = vcmp.lt.s32.totalorder %v3382_v18, 3  ;;  %vm3404_vm8 = vcmp.lt.s32.totalorder %v3382_v18, 4  ;;  %v3476_v11 = vshrl.u32 %v3475_v15, 23  ;;  %v4932_v56 = vadd.s32 3, %v3252_v2 }
 0x27b   : > { %13225 = vst [vmem:[#allocation45_spill] sm:$0xff] %v11442_v57  ;;  %v3231_v7 = vclz %v8047_v50  ;;  %vm3402_vm14 = vcmp.lt.s32.totalorder %v3382_v18, 2  ;;  %v3405_v22 = vsel %vm3401_vm7, %v3385_v0, %v3388_v60  ;;  %v3406_v16 = vsel %vm3404_vm8, %v3394_v17, 2102212464 }
 0x27c   : > { %v3407_v9 = vsel %vm3403_vm13, %v3391_v25, %v3406_v16  ;;  %v3409_v14 = vsel %vm3401_vm7, %v3388_v60, %v3391_v25  ;;  %v3410_v36 = vsel %vm3404_vm8, %v3397_v58, 920167782  ;;  %v2733_v63 = vsel %vm2650_vm11, %v2732_v55, %v2731_v21 }
 0x27d   : > { %v8048_v28 = vadd.s32 4294967294, %v3231_v7  ;;  %v3411_v61 = vsel %vm3403_vm13, %v3394_v17, %v3410_v36  ;;  %v3413_v53 = vsel %vm3401_vm7, %v3391_v25, %v3394_v17  ;;  %v3414_v3 = vsel %vm3404_vm8, %v3400_v13, 1326507024 }
 0x27e   : > { %v3408_v15 = vsel %vm3402_vm14, %v3405_v22, %v3407_v9  ;;  %v3412_v0 = vsel %vm3402_vm14, %v3409_v14, %v3411_v61  ;;  %v3415_v24 = vsel %vm3403_vm13, %v3397_v58, %v3414_v3  ;;  %vm3277_vm11 = vcmp.gt.s32.totalorder %v3276_v12, 0 }
 0x27f   : > { %vm8049_vm15 = vcmp.lt.s32.totalorder %v8048_v28, 0  ;;  %v3416_v50 = vsel %vm3402_vm14, %v3413_v53, %v3415_v24  ;;  %v11456_v60 = vmul.u32.u64.low %v11432_v45, %v3412_v0  ;;  %v11457_v7 = vmul.u32.u64.high %v11432_v45, %v3412_v0, %v11456_v60 }
 0x280   : > { %v3234_v10 = vsel %vm8049_vm15, 0, %v8048_v28  ;;  %v11462_v13 = vmul.u32.u64.low %v11432_v45, %v3416_v50  ;;  %v11463_v17 = vmul.u32.u64.high %v11432_v45, %v3416_v50, %v11462_v13  ;;  %v3278_v22 = vsel %vm3277_vm11, %v3276_v12, 0 }
 0x281   : > { %v3235_v21 = vsub.s32 32, %v3234_v10  ;;  %v3236_v55 = vshll.u32 %v11420_v40, %v3234_v10  ;;  %v3239_v25 = vsub.s32 4294967266, %v3234_v10  ;;  %v11465_v16 = vshll.u32 %v3274_v47, 8 }
 0x282   : > { %v11467_v28 = vand.u32 3, %v3252_v2  ;;  %v3280_v9 = vand.u32 31, %v3278_v22  ;;  %v11472_v14 = vsel %vm11290_vm5, %v10372_v34, %v2733_v63  ;;  %v11474_v40 = vand.u32 3, %v4932_v56 }
 0x283   : > { %v3237_v58 = vshrl.u32 %v3219_v39, %v3235_v21  ;;  %v3240_v18 = vadd.s32 127, %v3239_v25  ;;  %v3424_v36 = vmul.u32 %v11432_v45, %v3408_v15  ;;  %v3427_v61 = vadd.s32 1, %v11457_v7 }
 0x284   : > { %vm3371_vm0 = vcmp.lt.s32.totalorder %v10586_v26, 0  ;;  %v3281_v39 = vsub.s32 32, %v3280_v9  ;;  %v8058_v47 = vadd.s32 4294967169, %v3476_v11  ;;  %v13226_v2 = vand.u32 2147483647, %v10586_v26 }
 0x285   : > { %v3238_v53 = vor.u32 %v3237_v58, %v3236_v55  ;;  %v3241_v12 = vshll.u32 %v3240_v18, 23  ;;  %vm3426_vm5 = vc.u32 %v11463_v17, %v11456_v60  ;;  %v3279_v46 = vshrl.u32 %v3278_v22, 5 }
 0x286   : > { %vm11481_vm1 = vcmp.le.f32.partialorder %v13226_v2, 0.7853982  ;;  %v3283_v45 = vshll.u32 %v13153_v49, %v3280_v9  ;;  %v3286_v56 = vshll.u32 %v13162_v5, %v3280_v9  ;;  %v3428_v0 = vsel %vm3426_vm5, %v3427_v61, %v11457_v7 }
 0x287   : > { %v3242_v63 = vor.u32 4788187, %v3241_v12  ;;  %v3245_v15 = vcvt.s32.f32 %v3238_v53  ;;  %v3289_v11 = vshll.u32 %v13163_v37, %v3280_v9  ;;  %v3429_v24 = vadd.s32 %v3428_v0, %v3424_v36 }
 0x288   : > { %v3284_v10 = vshrl.u32 %v13162_v5, %v3281_v39  ;;  %v3287_v50 = vshrl.u32 %v13163_v37, %v3281_v39  ;;  %v3290_v21 = vshrl.u32 %v13175_v41, %v3281_v39  ;;  %v3292_v25 = vshll.u32 %v13175_v41, %v3280_v9 }
 0x289   : > { %v3243_v55 = vand.u32 2147483647, %v3242_v63  ;;  %v3293_v13 = vshrl.u32 %v13176_v23, %v3281_v39  ;;  %v3295_v22 = vshll.u32 %v13176_v23, %v3280_v9  ;;  %v3430_v58 = vadd.s32 536870912, %v3429_v24 }
 0x28a   : > { %v3282_v18 = vshrl.u32 %v13153_v49, %v3281_v39  ;;  %v3285_v7 = vor.u32 %v3284_v10, %v3283_v45  ;;  %v3288_v61 = vor.u32 %v3287_v50, %v3286_v56  ;;  %v3296_v12 = vshrl.u32 %v13171_v54, %v3281_v39 }
 0x28b   : > { %v3246_v53 = vmul.f32 %v3245_v15, %v3243_v55  ;;  %v3294_v36 = vor.u32 %v3293_v13, %v3292_v25  ;;  %vm3298_vm2 = vcmp.lt.s32.totalorder %v3279_v46, 1  ;;  %v3431_v2 = vshrl.u32 %v3430_v58, 30 }
 0x28c   : > { %v3291_v0 = vor.u32 %v3290_v21, %v3289_v11  ;;  %vm3301_vm4 = vcmp.lt.s32.totalorder %v3279_v46, 4  ;;  %v13229_v63 = vand.u32 2147483647, %v10797_v30  ;;  %v3297_v57 = vor.u32 %v3296_v12, %v3295_v22 }
 0x28d   : > { %v3247_v48 = vxor.u32 2147483648, %v3246_v53  ;;  %vm3300_vm6 = vcmp.lt.s32.totalorder %v3279_v46, 3  ;;  %v3482_v9 = vadd.s32 1, %v8058_v47  ;;  %v3432_v42 = vshll.u32 %v3431_v2, 30 }
 0x28e   : > { %v3479_v34 = vand.u32 8388607, %v13229_v63  ;;  %v3455_v62 = vsub.s32 4, %v3431_v2  ;;  %vm3299_vm12 = vcmp.lt.s32.totalorder %v3279_v46, 2  ;;  %v3306_v45 = vsel %vm3298_vm2, %v3285_v7, %v3288_v61 }
 0x28f   : > { %v3248_v56 = vsel %vm3165_vm9, %v3247_v48, %v3246_v53  ;;  %v3302_v39 = vsel %vm3298_vm2, %v3282_v18, %v3285_v7  ;;  %v3303_v15 = vsel %vm3301_vm4, %v3291_v0, 2102212464  ;;  %v3307_v11 = vsel %vm3301_vm4, %v3294_v36, 920167782 }
 0x290   : > { %v3251_v10 = vsel %vm11385_vm3, %v10483_v59, %v3248_v56  ;;  %v11510_v50 = vsub.s32 %v3429_v24, %v3432_v42  ;;  %v3456_v47 = vsel %vm3371_vm0, %v3455_v62, %v3431_v2  ;;  %v3308_v21 = vsel %vm3300_vm6, %v3291_v0, %v3307_v11 }
 0x291   : > { %9209 = vcosq.f32 %v3251_v10  ;;  %v3458_v48 = vsel %vm11481_vm1, 0, %v3456_v47  ;;  %v3309_v55 = vsel %vm3299_vm12, %v3306_v45, %v3308_v21  ;;  %v3311_v25 = vsel %vm3301_vm4, %v3297_v57, 1326507024  ;;  %v13237_v21 = vld [vmem:[#allocation23_spill] sm:$0xff] }
 0x292   : > { %9211 = vsinq.f32 %v3251_v10  ;;  %v3435_v13 = vsub.s32 0, %v11510_v50  ;;  %v3304_v6 = vsel %vm3300_vm6, %v3288_v61, %v3303_v15  ;;  %v3310_v42 = vsel %vm3298_vm2, %v3288_v61, %v3291_v0 }
 0x293   : > { %9213 = vcosq.f32 %v11472_v14  ;;  %v3312_v62 = vsel %vm3300_vm6, %v3294_v36, %v3311_v25  ;;  %v11525_v24 = vmul.u32.u64.low %v11465_v16, %v3309_v55  ;;  %v11526_v22 = vmul.u32.u64.high %v11465_v16, %v3309_v55, %v11525_v24 }
 0x294   : > { %9215 = vsinq.f32 %v11472_v14  ;;  %v8055_v58 = vmin.u32 %v3435_v13, %v11510_v50  ;;  %v5140_v57 = vadd.s32 3, %v3458_v48  ;;  %v1879_v18 = vmul.f32 -0.5, %v11224_v35 }
 0x295   : > { %vm3261_vm9 = vcmp.eq.s32.totalorder %v11467_v28, 2  ;;  %v3305_v7 = vsel %vm3299_vm12, %v3302_v39, %v3304_v6  ;;  %v3313_v61 = vsel %vm3299_vm12, %v3310_v42, %v3312_v62  ;;  %v3480_v53 = vor.u32 8388608, %v3479_v34 }
 0x296   : > { %vm3483_vm10 = vcmp.gt.s32.totalorder %v3482_v9, 0  ;;  %vm3258_vm3 = vcmp.eq.s32.totalorder %v11467_v28, 0  ;;  %vm4935_vm7 = vcmp.eq.s32.totalorder %v11474_v40, 0  ;;  %v3437_v36 = vclz %v8055_v58 }
 0x297   : > { %v11537_v14 = vmul.u32.u64.low %v11465_v16, %v3313_v61  ;;  %v11538_v12 = vmul.u32.u64.high %v11465_v16, %v3313_v61, %v11537_v14  ;;  %v3484_v2 = vsel %vm3483_vm10, %v3482_v9, 0  ;;  %vm3257_vm13 = vcmp.lt.s32.totalorder %v11467_v28, 2 }
 0x298   : > { %vm4938_vm8 = vcmp.eq.s32.totalorder %v11474_v40, 2  ;;  %v3425_v35 = vadd.s32 %v11456_v60, %v11463_v17  ;;  %v11544_v46 = vand.u32 3, %v3458_v48  ;;  %v3324_v34 = vadd.s32 1, %v11526_v22 }
 0x299   : > { %vm4934_vm14 = vcmp.lt.s32.totalorder %v11474_v40, 2  ;;  %v8056_v0 = vadd.s32 4294967294, %v3437_v36  ;;  %v11548_v63 = vand.u32 3, %v5140_v57  ;;  %v3321_v45 = vmul.u32 %v11465_v16, %v3305_v7 }
 0x29a   : > { %v3486_v56 = vand.u32 31, %v3484_v2  ;;  %v11551_v9 = vshrl.u32 %v3484_v2, 5  ;;  %v11553_v39 = vshll.u32 %v3480_v53, 8  ;;  %v11555_v15 = vmul.f32 1.442695, %v1879_v18 }
 0x29b   : > { %v11558_v60 = vmul.f32 -0.5, %v11226_v4  ;;  %vm3255_vm15 = vweird.f32 %v10483_v59  ;;  %vm8057_vm11 = vcmp.lt.s32.totalorder %v8056_v0, 0  ;;  %vm3268_vm5 = vcmp.lt.s32.totalorder %v10719_v33, 0  ;;  %v9210_v11 = vpop.eup %9209 }
 0x29c   : > { %vm3323_vm2 = vc.u32 %v11538_v12, %v11525_v24  ;;  %v3487_v17 = vsub.s32 32, %v3486_v56  ;;  %v11564_v16 = vmul.f32 -0.5, %v11230_v1  ;;  %v3440_v10 = vsel %vm8057_vm11, 0, %v8056_v0  ;;  %v9212_v25 = vpop.eup %9211 }
 0x29d   : > { %v13230_v47 = vand.u32 2147483647, %v10719_v33  ;;  %v11573_v4 = vadd.s32 %v11525_v24, %v11538_v12  ;;  %v3325_v48 = vsel %vm3323_vm2, %v3324_v34, %v11526_v22  ;;  %v11577_v55 = vmul.f32 -0.5, %v11232_v52  ;;  %v11580_v62 = vpop.eup %9213 }
 0x29e   : > { %v3262_v13 = vxor.u32 2147483648, %v9210_v11  ;;  %v3441_v1 = vsub.s32 32, %v3440_v10  ;;  %v3442_v6 = vshll.u32 %v11510_v50, %v3440_v10  ;;  %v3445_v42 = vsub.s32 4294967266, %v3440_v10  ;;  %v11584_v7 = vpop.eup %9215 }
 0x29f   : > { %vm11568_vm4 = vcmp.le.f32.partialorder %v13230_v47, 0.7853982  ;;  %v3259_v58 = vxor.u32 2147483648, %v9212_v25  ;;  %v3326_v57 = vadd.s32 %v3325_v48, %v3321_v45  ;;  %v3489_v18 = vshll.u32 %v13153_v49, %v3486_v56 }
 0x2a0   : > { %v3490_v24 = vshrl.u32 %v13162_v5, %v3487_v17  ;;  %v3263_v52 = vsel %vm3261_vm9, %v3262_v13, %v9212_v25  ;;  %v4940_v22 = vsel %vm4938_vm8, %v3262_v13, %v9212_v25  ;;  %v3443_v61 = vshrl.u32 %v3425_v35, %v3441_v1 }
 0x2a1   : > { %v3446_v53 = vadd.s32 127, %v3445_v42  ;;  %v3260_v50 = vsel %vm3258_vm3, %v9210_v11, %v3259_v58  ;;  %v4937_v36 = vsel %vm4935_vm7, %v9210_v11, %v3259_v58  ;;  %v3327_v14 = vadd.s32 536870912, %v3326_v57 }
 0x2a2   : > { %v3492_v12 = vshll.u32 %v13162_v5, %v3486_v56  ;;  %v3264_v2 = vsel %vm3257_vm13, %v3260_v50, %v3263_v52  ;;  %v3444_v34 = vor.u32 %v3443_v61, %v3442_v6  ;;  %v3488_v45 = vshrl.u32 %v13153_v49, %v3487_v17 }
 0x2a3   : > { %v3447_v0 = vshll.u32 %v3446_v53, 23  ;;  %v4941_v35 = vsel %vm4934_vm14, %v4937_v36, %v4940_v22  ;;  %v3328_v10 = vshrl.u32 %v3327_v14, 30  ;;  %v3491_v47 = vor.u32 %v3490_v24, %v3489_v18 }
 0x2a4   : > { %v3493_v48 = vshrl.u32 %v13163_v37, %v3487_v17  ;;  %v3451_v13 = vcvt.s32.f32 %v3444_v34  ;;  %v3495_v11 = vshll.u32 %v13163_v37, %v3486_v56  ;;  %v3496_v5 = vshrl.u32 %v13175_v41, %v3487_v17 }
 0x2a5   : > { %v3448_v25 = vor.u32 4788187, %v3447_v0  ;;  %v11605_v28 = vsel %vm3255_vm15, nan, %v3264_v2  ;;  %v3329_v1 = vshll.u32 %v3328_v10, 30  ;;  %v3352_v6 = vsub.s32 4, %v3328_v10 }
 0x2a6   : > { %v3498_v49 = vshll.u32 %v13175_v41, %v3486_v56  ;;  %v3494_v42 = vor.u32 %v3493_v48, %v3492_v12  ;;  %v3499_v58 = vshrl.u32 %v13176_v23, %v3487_v17  ;;  %v3501_v18 = vshll.u32 %v13176_v23, %v3486_v56 }
 0x2a7   : > { %v3449_v40 = vand.u32 2147483647, %v3448_v25  ;;  %v11610_v24 = vsub.s32 %v3326_v57, %v3329_v1  ;;  %v3353_v37 = vsel %vm3268_vm5, %v3352_v6, %v3328_v10  ;;  %v3497_v52 = vor.u32 %v3496_v5, %v3495_v11 }
 0x2a8   : > { %v3502_v22 = vshrl.u32 %v13171_v54, %v3487_v17  ;;  %v3355_v53 = vsel %vm11568_vm4, 0, %v3353_v37  ;;  %v3500_v50 = vor.u32 %v3499_v58, %v3498_v49  ;;  %vm3504_vm6 = vcmp.lt.s32.totalorder %v11551_v9, 1 }
 0x2a9   : > { %v3452_v61 = vmul.f32 %v3451_v13, %v3449_v40  ;;  %v11620_v41 = vsel %vm3255_vm15, nan, %v4941_v35  ;;  %v3332_v23 = vsub.s32 0, %v11610_v24  ;;  %vm3505_vm12 = vcmp.lt.s32.totalorder %v11551_v9, 2 }
 0x2aa   : > { %v3503_v56 = vor.u32 %v3502_v22, %v3501_v18  ;;  %vm3506_vm9 = vcmp.lt.s32.totalorder %v11551_v9, 3  ;;  %vm3507_vm10 = vcmp.lt.s32.totalorder %v11551_v9, 4  ;;  %v3508_v54 = vsel %vm3504_vm6, %v3488_v45, %v3491_v47 }
 0x2ab   : > { %v3453_v57 = vxor.u32 2147483648, %v3452_v61  ;;  %v8051_v17 = vmin.u32 %v3332_v23, %v11610_v24  ;;  %v11629_v36 = vand.u32 3, %v3355_v53  ;;  %v3509_v59 = vsel %vm3507_vm10, %v3497_v52, 2102212464 }
 0x2ac   : > { %v3512_v14 = vsel %vm3504_vm6, %v3491_v47, %v3494_v42  ;;  %v3510_v2 = vsel %vm3506_vm9, %v3494_v42, %v3509_v59  ;;  %v3513_v34 = vsel %vm3507_vm10, %v3500_v50, 920167782  ;;  %v3516_v0 = vsel %vm3504_vm6, %v3494_v42, %v3497_v52 }
 0x2ad   : > { %v3454_v12 = vsel %vm3371_vm0, %v3453_v57, %v3452_v61  ;;  %v3334_v35 = vclz %v8051_v17  ;;  %v3511_v10 = vsel %vm3505_vm12, %v3508_v54, %v3510_v2  ;;  %v3514_v47 = vsel %vm3506_vm9, %v3497_v52, %v3513_v34 }
 0x2ae   : > { %v3457_v45 = vsel %vm11481_vm1, %v10586_v26, %v3454_v12  ;;  %v5036_v48 = vadd.s32 3, %v3355_v53  ;;  %v3515_v25 = vsel %vm3505_vm12, %v3512_v14, %v3514_v47  ;;  %v3517_v13 = vsel %vm3507_vm10, %v3503_v56, 1326507024 }
 0x2af   : > { %9217 = vcosq.f32 %v3457_v45  ;;  %v8052_v11 = vadd.s32 4294967294, %v3334_v35  ;;  %v3518_v3 = vsel %vm3506_vm9, %v3500_v50, %v3517_v13  ;;  %v3527_v5 = vmul.u32 %v11553_v39, %v3511_v10 }
 0x2b0   : > { %9219 = vsinq.f32 %v3457_v45  ;;  %v3519_v1 = vsel %vm3505_vm12, %v3516_v0, %v3518_v3  ;;  %v11660_v6 = vmul.u32.u64.low %v11553_v39, %v3515_v25  ;;  %v11661_v49 = vmul.u32.u64.high %v11553_v39, %v3515_v25, %v11660_v6 }
 0x2b1   : > { %v1899_v40 = vmul.f32 1.442695, %v11558_v60  ;;  %vm8053_vm0 = vcmp.lt.s32.totalorder %v8052_v11, 0  ;;  %v11665_v42 = vmul.u32.u64.low %v11553_v39, %v3519_v1  ;;  %v11666_v58 = vmul.u32.u64.high %v11553_v39, %v3519_v1, %v11665_v42 }
 0x2b2   : > { %9221 = vpow2.f32 %v11555_v15  ;;  %vm3467_vm1 = vcmp.eq.s32.totalorder %v11544_v46, 2  ;;  %vm5146_vm3 = vcmp.eq.s32.totalorder %v11548_v63, 2  ;;  %v3337_v18 = vsel %vm8053_vm0, 0, %v8052_v11 }
 0x2b3   : > { %v1897_v9 = vmul.f32 1.442695, %v11564_v16  ;;  %v1901_v37 = vmul.f32 1.442695, %v11577_v55  ;;  %v1887_v52 = vmul.f32 -0.5, %v11255_v27  ;;  %vm3464_vm7 = vcmp.eq.s32.totalorder %v11544_v46, 0 }
 0x2b4   : > { %vm5143_vm13 = vcmp.eq.s32.totalorder %v11548_v63, 0  ;;  %v3338_v60 = vsub.s32 32, %v3337_v18  ;;  %v3339_v39 = vshll.u32 %v11610_v24, %v3337_v18  ;;  %v3342_v22 = vsub.s32 4294967266, %v3337_v18  ;;  %v11900_v24 = vld [vmem:[%s13048_s2 + $0x20] sm:$0xff] }
 0x2b5   : > { %v1889_v15 = vmul.f32 -0.5, %v11257_v32  ;;  %vm3463_vm8 = vcmp.lt.s32.totalorder %v11544_v46, 2  ;;  %vm5142_vm14 = vcmp.lt.s32.totalorder %v11548_v63, 2  ;;  %v3530_v16 = vadd.s32 1, %v11661_v49 }
 0x2b6   : > { %9223 = vpow2.f32 %v1899_v40  ;;  %v1911_v55 = vmul.f32 1.442695, %v1887_v52  ;;  %v1888_v27 = vmul.f32 -0.5, %v11265_v29  ;;  %vm3461_vm15 = vweird.f32 %v10586_v26 }
 0x2b7   : > { %v3340_v61 = vshrl.u32 %v11573_v4, %v3338_v60  ;;  %v3343_v53 = vadd.s32 127, %v3342_v22  ;;  %vm3474_vm11 = vcmp.lt.s32.totalorder %v10797_v30, 0  ;;  %vm3529_vm2 = vc.u32 %v11666_v58, %v11660_v6 }
 0x2b8   : > { %9225 = vpow2.f32 %v1897_v9  ;;  %v13233_v32 = vand.u32 2147483647, %v10797_v30  ;;  %v3531_v50 = vsel %vm3529_vm2, %v3530_v16, %v11661_v49  ;;  %v1915_v29 = vmul.f32 1.442695, %v1889_v15 }
 0x2b9   : > { %9227 = vpow2.f32 %v1901_v37  ;;  %v1913_v23 = vmul.f32 1.442695, %v1888_v27  ;;  %v3341_v56 = vor.u32 %v3340_v61, %v3339_v39  ;;  %v3344_v57 = vshll.u32 %v3343_v53, 23  ;;  %v9218_v54 = vpop.eup %9217 }
 0x2ba   : > { %vm11688_vm6 = vcmp.le.f32.partialorder %v13233_v32, 0.7853982  ;;  %v3532_v4 = vadd.s32 %v3531_v50, %v3527_v5  ;;  %9229 = vpow2.f32 %v1911_v55  ;;  %v11693_v17 = vand.u32 3, %v5036_v48  ;;  %v9220_v12 = vpop.eup %9219 }
 0x2bb   : > { %v11696_v59 = vadd.s32 %v11660_v6, %v11666_v58  ;;  %9231 = vpow2.f32 %v1915_v29  ;;  %v1890_v14 = vmul.f32 -0.5, %v11267_v44  ;;  %v3468_v2 = vxor.u32 2147483648, %v9218_v54 }
 0x2bc   : > { %v3345_v34 = vor.u32 4788187, %v3344_v57  ;;  %v3348_v0 = vcvt.s32.f32 %v3341_v56  ;;  %v3533_v45 = vadd.s32 536870912, %v3532_v4  ;;  %vm2124_vm12 = vcmp.lt.s32.totalorder %v10403_v19, 2  ;;  %v11702_v47 = vpop.eup %9221  ;;  %v13236_v57 = vld [vmem:[#allocation24_spill] sm:$0xff] }
 0x2bd   : > { %v3465_v35 = vxor.u32 2147483648, %v9220_v12  ;;  %9233 = vpow2.f32 %v1913_v23  ;;  %v1917_v10 = vmul.f32 1.442695, %v1890_v14  ;;  %vm2122_vm9 = vweird.f32 %v10065_v31 }
 0x2be   : > { %vm2125_vm10 = vcmp.eq.s32.totalorder %v10403_v19, 0  ;;  %v3469_v48 = vsel %vm3467_vm1, %v3468_v2, %v9220_v12  ;;  %v5148_v44 = vsel %vm5146_vm3, %v3468_v2, %v9220_v12  ;;  %v3346_v25 = vand.u32 2147483647, %v3345_v34 }
 0x2bf   : > { %v3534_v13 = vshrl.u32 %v3533_v45, 30  ;;  %v3466_v11 = vsel %vm3464_vm7, %v9218_v54, %v3465_v35  ;;  %v5145_v3 = vsel %vm5143_vm13, %v9218_v54, %v3465_v35  ;;  %9235 = vpow2.f32 %v1917_v10  ;;  %v13239_v10 = vld [vmem:[#allocation14_spill] sm:$0xff] }
 0x2c0   : > { %v2126_v5 = vxor.u32 2147483648, %v10677_v20  ;;  %v3470_v1 = vsel %vm3463_vm8, %v3466_v11, %v3469_v48  ;;  %v5149_v6 = vsel %vm5142_vm14, %v5145_v3, %v5148_v44  ;;  %v3349_v49 = vmul.f32 %v3348_v0, %v3346_v25  ;;  %v11717_v42 = vpop.eup %9223  ;;  %v13238_v0 = vld [vmem:[#allocation5_spill] sm:$0xff]  ;;  %v13241_v11 = vld [vmem:[#allocation16_spill] sm:$0xff] }
 0x2c1   : > { %v3535_v40 = vshll.u32 %v3534_v13, 30  ;;  %v11721_v58 = vsel %vm3461_vm15, nan, %v3470_v1  ;;  %v11725_v18 = vsel %vm3461_vm15, nan, %v5149_v6  ;;  %v3558_v9 = vsub.s32 4, %v3534_v13  ;;  %v13240_v48 = vld [vmem:[#allocation17_spill] sm:$0xff] }
 0x2c2   : > { %v2127_v46 = vsel %vm2125_vm10, %v10661_v8, %v2126_v5  ;;  %v11732_v63 = vpop.eup %9225  ;;  %v3350_v37 = vxor.u32 2147483648, %v3349_v49  ;;  %vm2128_vm0 = vcmp.eq.s32.totalorder %v10403_v19, 2  ;;  %v2129_v60 = vxor.u32 2147483648, %v10661_v8 }
 0x2c3   : > { %v11734_v52 = vsub.s32 %v3532_v4, %v3535_v40  ;;  %v11738_v39 = vpop.eup %9227  ;;  %v3559_v26 = vsel %vm3474_vm11, %v3558_v9, %v3534_v13  ;;  %vm2946_vm1 = vweird.f32 %v10080_v38  ;;  %vm2948_vm3 = vcmp.lt.s32.totalorder %v10830_v43, 2  ;;  %v13243_v40 = vld [vmem:[#allocation25_spill] sm:$0xff]  ;;  %v13255_v38 = vld [vmem:[#allocation11_spill] sm:$0xff] }
 0x2c4   : > { %vm2949_vm7 = vcmp.eq.s32.totalorder %v10830_v43, 0  ;;  %v11745_v22 = vpop.eup %9229  ;;  %v3351_v15 = vsel %vm3268_vm5, %v3350_v37, %v3349_v49  ;;  %v3561_v55 = vsel %vm11688_vm6, 0, %v3559_v26  ;;  %v2130_v27 = vsel %vm2128_vm0, %v2129_v60, %v10677_v20  ;;  %v13242_v49 = vld [vmem:[#allocation6_spill] sm:$0xff]  ;;  %v13244_v26 = vld [vmem:[#allocation32_spill] sm:$0xff] }
 0x2c5   : > { %v3538_v16 = vsub.s32 0, %v11734_v52  ;;  %v11755_v61 = vpop.eup %9231  ;;  %v3354_v53 = vsel %vm11568_vm4, %v10719_v33, %v3351_v15  ;;  %v11760_v32 = vand.u32 3, %v3561_v55  ;;  %v5244_v50 = vadd.s32 3, %v3561_v55 }
 0x2c6   : > { %v2131_v29 = vsel %vm2124_vm12, %v2127_v46, %v2130_v27  ;;  %9237 = vcosq.f32 %v3354_v53  ;;  %v2950_v4 = vxor.u32 2147483648, %v13236_v57  ;;  %vm2952_vm5 = vcmp.eq.s32.totalorder %v10830_v43, 2 }
 0x2c7   : > { %v8059_v23 = vmin.u32 %v3538_v16, %v11734_v52  ;;  %v2132_v56 = vsel %vm2122_vm9, nan, %v2131_v29  ;;  %v11768_v54 = vpop.eup %9233  ;;  %9239 = vsinq.f32 %v3354_v53  ;;  %v11770_v14 = vand.u32 3, %v5244_v50  ;;  %v13245_v29 = vld [vmem:[#allocation27_spill] sm:$0xff] }
 0x2c8   : > { %v2953_v12 = vxor.u32 2147483648, %v13237_v21  ;;  %v2951_v19 = vsel %vm2949_vm7, %v13237_v21, %v2950_v4  ;;  %v3576_v34 = vmul.f32 %v11732_v63, %v2132_v56  ;;  %vm2328_vm4 = vweird.f32 %v13238_v0  ;;  %v13258_v0 = vld [vmem:[#allocation22_spill] sm:$0xff] }
 0x2c9   : > { %v3540_v2 = vclz %v8059_v23  ;;  %v11781_v45 = vpop.eup %9235  ;;  %vm2330_vm13 = vcmp.lt.s32.totalorder %v13239_v10, 2  ;;  %vm2331_vm8 = vcmp.eq.s32.totalorder %v13239_v10, 0  ;;  %v2332_v44 = vxor.u32 2147483648, %v13240_v48 }
 0x2ca   : > { %v2954_v35 = vsel %vm2952_vm5, %v2953_v12, %v13236_v57  ;;  %vm2334_vm14 = vcmp.eq.s32.totalorder %v13239_v10, 2  ;;  %v13101_v3 = vxor.u32 2147483648, %v13241_v11  ;;  %vm3152_vm15 = vweird.f32 %v13242_v49  ;;  %v13259_v49 = vld [vmem:[#allocation35_spill] sm:$0xff] }
 0x2cb   : > { %v8060_v25 = vadd.s32 4294967294, %v3540_v2  ;;  %v2955_v13 = vsel %vm2948_vm3, %v2951_v19, %v2954_v35  ;;  %v2333_v6 = vsel %vm2331_vm8, %v13241_v11, %v2332_v44  ;;  %vm3154_vm2 = vcmp.lt.s32.totalorder %v13243_v40, 2  ;;  %v13246_v2 = vld [vmem:[#allocation10_spill] sm:$0xff] }
 0x2cc   : > { %v2956_v1 = vsel %vm2946_vm1, nan, %v2955_v13  ;;  %v2336_v43 = vsel %vm2334_vm14, %v13101_v3, %v13240_v48  ;;  %vm3155_vm10 = vcmp.eq.s32.totalorder %v13243_v40, 0  ;;  %v3156_v15 = vxor.u32 2147483648, %v13244_v26  ;;  %v13247_v13 = vld [vmem:[#allocation18_spill] sm:$0xff] }
 0x2cd   : > { %vm8061_vm12 = vcmp.lt.s32.totalorder %v8060_v25, 0  ;;  %v3584_v9 = vmul.f32 %v11768_v54, %v2956_v1  ;;  %v2337_v37 = vsel %vm2330_vm13, %v2333_v6, %v2336_v43  ;;  %vm3158_vm0 = vcmp.eq.s32.totalorder %v13243_v40, 2 }
 0x2ce   : > { %v3543_v46 = vsel %vm8061_vm12, 0, %v8060_v25  ;;  %v2338_v50 = vsel %vm2328_vm4, nan, %v2337_v37  ;;  %v3157_v23 = vsel %vm3155_vm10, %v13245_v29, %v3156_v15  ;;  %v3159_v56 = vxor.u32 2147483648, %v13245_v29 }
 0x2cf   : > { %v3544_v16 = vsub.s32 32, %v3543_v46  ;;  %v3545_v55 = vshll.u32 %v11734_v52, %v3543_v46  ;;  %v3548_v27 = vsub.s32 4294967266, %v3543_v46  ;;  %v8872_v53 = vpack.c.bf16 %v3584_v9, %v3576_v34  ;;  %v13248_v9 = vld [vmem:[#allocation12_spill] sm:$0xff]  ;;  %v13249_v46 = vld [vmem:[#allocation21_spill] sm:$0xff] }
 0x2d0   : > { %v3575_v19 = vmul.f32 %v11702_v47, %v13246_v2  ;;  %v11816_v35 = vpop.eup %9237  ;;  %v3578_v52 = vmul.f32 %v11738_v39, %v2338_v50  ;;  %v3583_v34 = vmul.f32 %v11745_v22, %v13247_v13  ;;  %v3160_v6 = vsel %vm3158_vm0, %v3159_v56, %v13244_v26 }
 0x2d1   : > { %v3546_v10 = vshrl.u32 %v11696_v59, %v3544_v16  ;;  %v3549_v25 = vadd.s32 127, %v3548_v27  ;;  %8873 = vmatprep.subr.bf16.mxu0 %v8872_v53  ;;  %v11822_v1 = vpop.eup %9239  ;;  %v3577_v43 = vmul.f32 %v11717_v42, %v13248_v9  ;;  %v3585_v37 = vmul.f32 %v11755_v61, %v13249_v46  ;;  %v13250_v59 = vld [vmem:[#allocation9_spill] sm:$0xff] }
 0x2d2   : > { %vm3790_vm3 = vcmp.lt.s32.totalorder %v13250_v59, 2  ;;  %v3161_v53 = vsel %vm3154_vm2, %v3157_v23, %v3160_v6  ;;  %v8874_v50 = vpack.c.bf16 %v3583_v34, %v3575_v19  ;;  %vm3791_vm7 = vcmp.eq.s32.totalorder %v13250_v59, 0  ;;  %v13251_v23 = vld [vmem:[#allocation20_spill] sm:$0xff] }
 0x2d3   : > { %v3547_v16 = vor.u32 %v3546_v10, %v3545_v55  ;;  %v3550_v27 = vshll.u32 %v3549_v25, 23  ;;  %v3162_v2 = vsel %vm3152_vm15, nan, %v3161_v53  ;;  %v8882_v13 = vpack.c.bf16 %v3585_v37, %v3577_v43 }
 0x2d4   : > { %vm3794_vm5 = vcmp.eq.s32.totalorder %v13250_v59, 2  ;;  %v3586_v46 = vmul.f32 %v11781_v45, %v3162_v2  ;;  %8875 = vmatpush1.bf16.msra.mxu0 %v8874_v50  ;;  %v3793_v55 = vsel %vm3791_vm7, %v10661_v8, %v2126_v5  ;;  %vm4622_vm13 = vcmp.lt.s32.totalorder %v13251_v23, 2  ;;  %v13256_v59 = vld [vmem:[#allocation19_spill] sm:$0xff]  ;;  %v13257_v50 = vld [vmem:[#allocation13_spill] sm:$0xff] }
 0x2d5   : > { %v3551_v9 = vor.u32 4788187, %v3550_v27  ;;  %v3554_v3 = vcvt.s32.f32 %v3547_v16  ;;  %v3796_v40 = vsel %vm3794_vm5, %v2129_v60, %v10677_v20  ;;  %vm4623_vm8 = vcmp.eq.s32.totalorder %v13251_v23, 0  ;;  %v13252_v20 = vld [vmem:[#allocation15_spill] sm:$0xff] }
 0x2d6   : > { %vm4626_vm14 = vcmp.eq.s32.totalorder %v13251_v23, 2  ;;  %v8880_v10 = vpack.c.bf16 %v3586_v46, %v3578_v52  ;;  %v3797_v25 = vsel %vm3790_vm3, %v3793_v55, %v3796_v40  ;;  %v4625_v34 = vsel %vm4623_vm8, %v13237_v21, %v2950_v4  ;;  %v11910_v55 = vld [vmem:[%s13048_s2 + $0x28] sm:$0xff] }
 0x2d7   : > { %v3552_v19 = vand.u32 2147483647, %v3551_v9  ;;  %v3798_v5 = vsel %vm2122_vm9, nan, %v3797_v25  ;;  %v4628_v8 = vsel %vm4626_vm14, %v2953_v12, %v13236_v57  ;;  %vm3998_vm2 = vcmp.lt.s32.totalorder %v13252_v20, 2  ;;  %v13253_v57 = vld [vmem:[#allocation26_spill] sm:$0xff]  ;;  %v13260_v9 = vld [vmem:[#allocation37_spill] sm:$0xff] }
 0x2d8   : > { %vm3999_vm12 = vcmp.eq.s32.totalorder %v13252_v20, 0  ;;  %8881 = vmatprep.subr.bf16.mxu1 %v8880_v10  ;;  %v4629_v52 = vsel %vm4622_vm13, %v4625_v34, %v4628_v8  ;;  %v5256_v6 = vmul.f32 %v11732_v63, %v3798_v5  ;;  %vm4002_vm9 = vcmp.eq.s32.totalorder %v13252_v20, 2  ;;  %v13261_v40 = vld [vmem:[#allocation38_spill] sm:$0xff]  ;;  %v13263_v25 = vld [vmem:[#allocation41_spill] sm:$0xff] }
 0x2d9   : > { %v3555_v60 = vmul.f32 %v3554_v3, %v3552_v19  ;;  %v4001_v4 = vsel %vm3999_vm12, %v13241_v11, %v2332_v44  ;;  %8883 = vmatpush1.bf16.msra.mxu1 %v8882_v13  ;;  %v4630_v31 = vsel %vm2946_vm1, nan, %v4629_v52  ;;  %vm4830_vm10 = vcmp.lt.s32.totalorder %v13253_v57, 2  ;;  %v13262_v19 = vld [vmem:[#allocation40_spill] sm:$0xff] }
 0x2da   : > { %vm4831_vm0 = vcmp.eq.s32.totalorder %v13253_v57, 0  ;;  %v5264_v12 = vmul.f32 %v11768_v54, %v4630_v31  ;;  %v13254_v63 = vxor.u32 2147483648, %v13241_v11  ;;  %vm4834_vm1 = vcmp.eq.s32.totalorder %v13253_v57, 2  ;;  %v13266_v57 = vld [vmem:[#allocation43_spill] sm:$0xff] }
 0x2db   : > { %v3556_v21 = vxor.u32 2147483648, %v3555_v60  ;;  %v4833_v43 = vsel %vm4831_vm0, %v13245_v29, %v3156_v15  ;;  %v5255_v37 = vmul.f32 %v11702_v47, %v13255_v38  ;;  %v5263_v16 = vmul.f32 %v11745_v22, %v13256_v59  ;;  %v13269_v38 = vld [vmem:[#allocation44_spill] sm:$0xff]  ;;  %v11935_v59 = vld [vmem:[%s13048_s2 + $0x30] sm:$0xff] }
 0x2dc   : > { %v4004_v3 = vsel %vm4002_vm9, %v13254_v63, %v13240_v48  ;;  %v8876_v27 = vpack.c.bf16 %v5264_v12, %v5256_v6  ;;  %v4836_v11 = vsel %vm4834_vm1, %v3159_v56, %v13244_v26  ;;  %v5257_v2 = vmul.f32 %v11717_v42, %v13257_v50  ;;  %v13264_v6 = vld [vmem:[#allocation7_spill] sm:$0xff]  ;;  %v13267_v12 = vld [vmem:[#allocation30_spill] sm:$0xff]  ;;  %v13268_v63 = vld [vmem:[#allocation45_spill] sm:$0xff] }
 0x2dd   : > { %v4005_v44 = vsel %vm3998_vm2, %v4001_v4, %v4004_v3  ;;  %v3557_v54 = vsel %vm3474_vm11, %v3556_v21, %v3555_v60  ;;  %v4837_v29 = vsel %vm4830_vm10, %v4833_v43, %v4836_v11  ;;  %v8878_v47 = vpack.c.bf16 %v5263_v16, %v5255_v37  ;;  %v13265_v4 = vld [vmem:[#allocation42_spill] sm:$0xff]  ;;  %v13271_v50 = vld [vmem:[#allocation36_spill] sm:$0xff] }
 0x2de   : > { %v4006_v48 = vsel %vm2328_vm4, nan, %v4005_v44  ;;  %v3560_v15 = vsel %vm11688_vm6, %v10797_v30, %v3557_v54  ;;  %8877 = vmatprep.subr.bf16.mxu0 %v8876_v27  ;;  %v4838_v22 = vsel %vm3152_vm15, nan, %v4837_v29  ;;  %v5265_v13 = vmul.f32 %v11755_v61, %v13258_v0 }
 0x2df   : > { %v5258_v53 = vmul.f32 %v11738_v39, %v4006_v48  ;;  %9241 = vcosq.f32 %v3560_v15  ;;  %v5266_v26 = vmul.f32 %v11781_v45, %v4838_v22  ;;  %8879 = vmatpush1.bf16.msra.mxu0 %v8878_v47  ;;  %vm5299_vm11 = vcmask 261120  }
 0x2e0   : > { %9243 = vsinq.f32 %v3560_v15  ;;  %v8886_v39 = vpack.c.bf16 %v5265_v13, %v5257_v2  ;;  %v13102_v56 = vmov 0.0   ;;  %v1883_v42 = vmul.f32 -0.5, %v11389_v51  ;;  %v11972_v2 = vld [vmem:[%s13048_s2 + $0x38] sm:$0xff] }
 0x2e1   : > { %5376 = vmatprep.mubr.f32.mxu0 %v13102_v56  ;;  %5465 = vmatprep.mubr.f32.mxu1 %v13102_v56  ;;  %v1885_v61 = vmul.f32 -0.5, %v13259_v49  ;;  %v1884_v46 = vmul.f32 -0.5, %v13260_v9  ;;  %v8884_v45 = vpack.c.bf16 %v5266_v26, %v5258_v53  ;;  %v1886_v23 = vmul.f32 -0.5, %v13261_v40  ;;  %v13270_v53 = vld [vmem:[#allocation8_spill] sm:$0xff] }
 0x2e2   : > { %v1891_v10 = vmul.f32 -0.5, %v13262_v19  ;;  %v1893_v34 = vmul.f32 -0.5, %v13263_v25  ;;  %8126 = vmatmul.mubr.msk.f32.vlgmr.msra.gmra.mrb[16].mxu0 %vm5299_vm11, %v11900_v24  ;;  %v1903_v51 = vmul.f32 1.442695, %v1883_v42  ;;  %vm2534_vm6 = vweird.f32 %v13264_v6 }
 0x2e3   : > { %v1907_v5 = vmul.f32 1.442695, %v1885_v61  ;;  %v1905_v8 = vmul.f32 1.442695, %v1884_v46  ;;  %8885 = vmatprep.subr.bf16.mxu1 %v8884_v45  ;;  %5382 = vmatprep.mubr.f32.mxu0 %v13102_v56  ;;  %v1909_v20 = vmul.f32 1.442695, %v1886_v23  ;;  %vm3358_vm15 = vweird.f32 %v10719_v33 }
 0x2e4   : > { %v1919_v60 = vmul.f32 1.442695, %v1891_v10  ;;  %v1923_v52 = vmul.f32 1.442695, %v1893_v34  ;;  %8887 = vmatpush1.bf16.msra.mxu1 %v8886_v39  ;;  %9245 = vpow2.f32 %v1903_v51  ;;  %v1892_v31 = vmul.f32 -0.5, %v13265_v4  ;;  %v13272_v23 = vld [vmem:[#allocation28_spill] sm:$0xff] }
 0x2e5   : > { %v1894_v21 = vmul.f32 -0.5, %v13266_v57  ;;  %vm2536_vm4 = vcmp.lt.s32.totalorder %v13267_v12, 2  ;;  %9247 = vpow2.f32 %v1907_v5  ;;  %vm2537_vm3 = vcmp.eq.s32.totalorder %v13267_v12, 0  ;;  %v13273_v10 = vld [vmem:[#allocation31_spill] sm:$0xff] }
 0x2e6   : > { %v2538_v3 = vxor.u32 2147483648, %v13268_v63  ;;  %vm2540_vm7 = vcmp.eq.s32.totalorder %v13267_v12, 2  ;;  %8127 = vmatmul.mubr.msk.f32.gmra.mrb[18].mxu0 %vm5299_vm11, %v11910_v55  ;;  %9249 = vpow2.f32 %v1905_v8  ;;  %v1921_v43 = vmul.f32 1.442695, %v1892_v31  ;;  %v13274_v8 = vld [vmem:[#allocation33_spill] sm:$0xff] }
 0x2e7   : > { %v1925_v44 = vmul.f32 1.442695, %v1894_v21  ;;  %v2541_v37 = vxor.u32 2147483648, %v13269_v38  ;;  %8130 = vmatmul.mubr.msk.f32.vlgmr.msra.gmra.mrb[16].mxu1 %vm5299_vm11, %v11900_v24  ;;  %5388 = vmatprep.mubr.f32.mxu0 %v13102_v56  ;;  %9251 = vpow2.f32 %v1909_v20  ;;  %vm3360_vm5 = vcmp.lt.s32.totalorder %v11629_v36, 2 }
 0x2e8   : > { %v2539_v16 = vsel %vm2537_vm3, %v13269_v38, %v2538_v3  ;;  %vm3361_vm13 = vcmp.eq.s32.totalorder %v11629_v36, 0  ;;  %5471 = vmatprep.mubr.f32.mxu1 %v13102_v56  ;;  %9253 = vpow2.f32 %v1919_v60  ;;  %v3362_v48 = vxor.u32 2147483648, %v11822_v1 }
 0x2e9   : > { %v11942_v54 = vpop.eup %9241  ;;  %v2542_v27 = vsel %vm2540_vm7, %v2541_v37, %v13268_v63  ;;  %vm3364_vm8 = vcmp.eq.s32.totalorder %v11629_v36, 2  ;;  %9255 = vpow2.f32 %v1923_v52  ;;  %v3365_v29 = vxor.u32 2147483648, %v11816_v35 }
 0x2ea   : > { %v11952_v11 = vpop.eup %9243  ;;  %v2543_v15 = vsel %vm2536_vm4, %v2539_v16, %v2542_v27  ;;  %vm2740_vm14 = vweird.f32 %v13270_v53  ;;  %8128 = vmatmul.mubr.msk.f32.gmra.mrb[20].mxu0 %vm5299_vm11, %v11935_v59  ;;  %9257 = vpow2.f32 %v1921_v43  ;;  %v3363_v22 = vsel %vm3361_vm13, %v11816_v35, %v3362_v48  ;;  %v12089_v53 = vld [vmem:[%s13049_s3 + $0x10] sm:$0xff] }
 0x2eb   : > { %v2544_v47 = vsel %vm2534_vm6, nan, %v2543_v15  ;;  %vm2742_vm2 = vcmp.lt.s32.totalorder %v13271_v50, 2  ;;  %8131 = vmatmul.mubr.msk.f32.gmra.mrb[18].mxu1 %vm5299_vm11, %v11910_v55  ;;  %5394 = vmatprep.mubr.f32.mxu0 %v13102_v56  ;;  %9259 = vpow2.f32 %v1925_v44  ;;  %v3366_v0 = vsel %vm3364_vm8, %v3365_v29, %v11822_v1 }
 0x2ec   : > { %vm2743_vm12 = vcmp.eq.s32.totalorder %v13271_v50, 0  ;;  %v2744_v13 = vxor.u32 2147483648, %v11584_v7  ;;  %5477 = vmatprep.mubr.f32.mxu1 %v13102_v56  ;;  %v3367_v26 = vsel %vm3360_vm5, %v3363_v22, %v3366_v0  ;;  %vm2746_vm9 = vcmp.eq.s32.totalorder %v13271_v50, 2 }
 0x2ed   : > { %v2747_v39 = vxor.u32 2147483648, %v11580_v62  ;;  %vm3564_vm10 = vweird.f32 %v10797_v30  ;;  %v3368_v42 = vsel %vm3358_vm15, nan, %v3367_v26  ;;  %vm3566_vm0 = vcmp.lt.s32.totalorder %v11760_v32, 2  ;;  %v13275_v26 = vld [vmem:[#allocation39_spill] sm:$0xff]  ;;  %v12104_v30 = vld [vmem:[%s13049_s3 + $0x8] sm:$0xff] }
 0x2ee   : > { %v2745_v49 = vsel %vm2743_vm12, %v11580_v62, %v2744_v13  ;;  %vm3567_vm1 = vcmp.eq.s32.totalorder %v11760_v32, 0  ;;  %v11992_v61 = vpop.eup %9245  ;;  %8129 = vmatmul.mubr.msk.f32.gmra.mrb[22].mxu0 %vm5299_vm11, %v11972_v2  ;;  %v3568_v9 = vxor.u32 2147483648, %v11952_v11  ;;  %vm3570_vm4 = vcmp.eq.s32.totalorder %v11760_v32, 2 }
 0x2ef   : > { %v2748_v36 = vsel %vm2746_vm9, %v2747_v39, %v11584_v7  ;;  %v3571_v46 = vxor.u32 2147483648, %v11942_v54  ;;  %v12002_v45 = vpop.eup %9247  ;;  %8132 = vmatmul.mubr.msk.f32.gmra.mrb[20].mxu1 %vm5299_vm11, %v11935_v59  ;;  %v3579_v19 = vmul.f32 %v11992_v61, %v13272_v23  ;;  %vm4206_vm3 = vcmp.lt.s32.totalorder %v13273_v10, 2  ;;  %5554 = vmatprep.mubr.f32.mxu0 %v13102_v56 }
 0x2f0   : > { %v2749_v40 = vsel %vm2742_vm2, %v2745_v49, %v2748_v36  ;;  %vm4207_vm7 = vcmp.eq.s32.totalorder %v13273_v10, 0  ;;  %v9250_v25 = vpop.eup %9249  ;;  %5483 = vmatprep.mubr.f32.mxu1 %v13102_v56  ;;  %v3569_v51 = vsel %vm3567_vm1, %v11942_v54, %v3568_v9  ;;  %v3581_v20 = vmul.f32 %v12002_v45, %v13274_v8  ;;  %v12084_v36 = vld [vmem:[%s13049_s3] sm:$0xff] }
 0x2f1   : > { %v2750_v34 = vsel %vm2740_vm14, nan, %v2749_v40  ;;  %v3572_v5 = vsel %vm3570_vm4, %v3571_v46, %v11952_v11  ;;  %v9252_v60 = vpop.eup %9251  ;;  %v3580_v52 = vmul.f32 %v9250_v25, %v2544_v47  ;;  %v4209_v31 = vsel %vm4207_vm7, %v13269_v38, %v2538_v3 }
 0x2f2   : > { %v3573_v4 = vsel %vm3566_vm0, %v3569_v51, %v3572_v5  ;;  %vm4210_vm5 = vcmp.eq.s32.totalorder %v13273_v10, 2  ;;  %v9254_v57 = vpop.eup %9253  ;;  %v3582_v12 = vmul.f32 %v9252_v60, %v2750_v34  ;;  %vm5038_vm13 = vcmp.lt.s32.totalorder %v11693_v17, 2 }
 0x2f3   : > { %v3574_v21 = vsel %vm3564_vm10, nan, %v3573_v4  ;;  %v4212_v43 = vsel %vm4210_vm5, %v2541_v37, %v13268_v63  ;;  %v9256_v44 = vpop.eup %9255  ;;  %8133 = vmatmul.mubr.msk.f32.gmra.mrb[22].mxu1 %vm5299_vm11, %v11972_v2  ;;  %v3587_v32 = vmul.f32 %v9254_v57, %v11605_v28  ;;  %vm5039_vm8 = vcmp.eq.s32.totalorder %v11693_v17, 0 }
 0x2f4   : > { %v4213_v3 = vsel %vm4206_vm3, %v4209_v31, %v4212_v43  ;;  %vm5042_vm2 = vcmp.eq.s32.totalorder %v11693_v17, 2  ;;  %v9258_v16 = vpop.eup %9257  ;;  %v3589_v27 = vmul.f32 %v9256_v44, %v11721_v58  ;;  %v5041_v38 = vsel %vm5039_vm8, %v11816_v35, %v3362_v48  ;;  %5643 = vmatprep.mubr.f32.mxu1 %v13102_v56 }
 0x2f5   : > { %v4214_v63 = vsel %vm2534_vm6, nan, %v4213_v3  ;;  %v5044_v28 = vsel %vm5042_vm2, %v3365_v29, %v11822_v1  ;;  %v9260_v37 = vpop.eup %9259  ;;  %v3588_v15 = vmul.f32 %v9258_v16, %v3368_v42  ;;  %v8890_v47 = vpack.c.bf16 %v3587_v32, %v3579_v19 }
 0x2f6   : > { %v5045_v22 = vsel %vm5038_vm13, %v5041_v38, %v5044_v28  ;;  %v5260_v58 = vmul.f32 %v9250_v25, %v4214_v63  ;;  %v3590_v50 = vmul.f32 %v9260_v37, %v3574_v21  ;;  %v8898_v6 = vpack.c.bf16 %v3589_v27, %v3581_v20 }
 0x2f7   : > { %v5046_v0 = vsel %vm3358_vm15, nan, %v5045_v22  ;;  %vm4414_vm6 = vcmp.lt.s32.totalorder %v13275_v26, 2  ;;  %v8888_v48 = vpack.c.bf16 %v3588_v15, %v3580_v52  ;;  %vm4415_vm12 = vcmp.eq.s32.totalorder %v13275_v26, 0 }
 0x2f8   : > { %v5268_v49 = vmul.f32 %v9258_v16, %v5046_v0  ;;  %vm4418_vm9 = vcmp.eq.s32.totalorder %v13275_v26, 2  ;;  %v8896_v35 = vpack.c.bf16 %v3590_v50, %v3582_v12  ;;  %v4417_v17 = vsel %vm4415_vm12, %v11580_v62, %v2744_v13 }
 0x2f9   : > { %v4420_v1 = vsel %vm4418_vm9, %v2747_v39, %v11584_v7  ;;  %vm5246_vm0 = vcmp.lt.s32.totalorder %v11770_v14, 2  ;;  %8889 = vmatprep.subr.bf16.mxu0 %v8888_v48  ;;  %vm5247_vm15 = vcmp.eq.s32.totalorder %v11770_v14, 0  ;;  %vm5250_vm1 = vcmp.eq.s32.totalorder %v11770_v14, 2  ;;  %v13276_v7 = vld [vmem:[#allocation29_spill] sm:$0xff] }
 0x2fa   : > { %v8892_v33 = vpack.c.bf16 %v5268_v49, %v5260_v58  ;;  %v4421_v29 = vsel %vm4414_vm6, %v4417_v17, %v4420_v1  ;;  %8897 = vmatprep.subr.bf16.mxu1 %v8896_v35  ;;  %8891 = vmatpush1.bf16.msra.mxu0 %v8890_v47  ;;  %v5249_v13 = vsel %vm5247_vm15, %v11942_v54, %v3568_v9  ;;  %v9352_v19 = vmov 0  }
 0x2fb   : > { %v4422_v42 = vsel %vm2740_vm14, nan, %v4421_v29  ;;  %v5252_v62 = vsel %vm5250_vm1, %v3571_v46, %v11952_v11  ;;  %v5259_v39 = vmul.f32 %v11992_v61, %v13276_v7  ;;  %8899 = vmatpush1.bf16.msra.mxu1 %v8898_v6  ;;  %v5267_v11 = vmul.f32 %v9254_v57, %v11620_v41  ;;  %v13277_v46 = vld [vmem:[#allocation34_spill] sm:$0xff]  ;;  %9149 = vset.pattern.permute.xlu0 %v9352_v19 }
 0x2fc   : > { %8893 = vmatprep.subr.bf16.mxu0 %v8892_v33  ;;  %v5253_v9 = vsel %vm5246_vm0, %v5249_v13, %v5252_v62  ;;  %v5262_v54 = vmul.f32 %v9252_v60, %v4422_v42  ;;  %v5261_v40 = vmul.f32 %v12002_v45, %v13277_v46  ;;  %v5269_v23 = vmul.f32 %v9256_v44, %v11725_v18  ;;  %v12109_v18 = vld [vmem:[%s13049_s3 + $0x18] sm:$0xff] }
 0x2fd   : > { %v5254_v61 = vsel %vm3564_vm10, nan, %v5253_v9  ;;  %9150 = vset.pattern.permute.xlu1 %v9352_v19  ;;  %v8894_v25 = vpack.c.bf16 %v5267_v11, %v5259_v39  ;;  %5281 = vperm.xlu0 %9149, %v12084_v36   ;;  %v9353_v45 = vmov 1  }
 0x2fe   : > { %v5270_v10 = vmul.f32 %v9260_v37, %v5254_v61  ;;  %5291 = vperm.xlu1 %9150, %v12089_v53   ;;  %v8902_v14 = vpack.c.bf16 %v5269_v23, %v5261_v40 }
 0x2ff   : > { %8895 = vmatpush1.bf16.msra.mxu0 %v8894_v25 }
 0x300   : > { %v8900_v41 = vpack.c.bf16 %v5270_v10, %v5262_v54 }
 0x301   : > { %5286 = vperm.xlu0 %9149, %v12104_v30  }
 0x302   : > { %8901 = vmatprep.subr.bf16.mxu1 %v8900_v41  ;;  %8134 = vmatmul.mubr.msk.f32.vlgmr.msra.gmra.mrb[24].mxu0 %vm5299_vm11, %v11900_v24 }
 0x303   : > { %8903 = vmatpush1.bf16.msra.mxu1 %v8902_v14  ;;  %5560 = vmatprep.mubr.f32.mxu0 %v13102_v56 }
 0x304   : > { %5296 = vperm.xlu1 %9150, %v12109_v18  }
 0x305   : > { %9151 = vset.pattern.permute.xlu0 %v9353_v45 }
 0x306   : > { %8138 = vmatmul.mubr.msk.f32.vlgmr.msra.gmra.mrb[24].mxu1 %vm5299_vm11, %v11900_v24  ;;  %8135 = vmatmul.mubr.msk.f32.gmra.mrb[26].mxu0 %vm5299_vm11, %v11910_v55  ;;  %v9354_v24 = vmov 2  }
 0x307   : > { %5649 = vmatprep.mubr.f32.mxu1 %v13102_v56  ;;  %5566 = vmatprep.mubr.f32.mxu0 %v13102_v56 }
 0x308   : > { %9152 = vset.pattern.permute.xlu1 %v9353_v45  ;;  %5974 = vperm.xlu0 %9151, %v12084_v36  }
 0x309   : > { %5978 = vperm.xlu1 %9152, %v12104_v30  }
 0x30a   : > { %8139 = vmatmul.mubr.msk.f32.gmra.mrb[26].mxu1 %vm5299_vm11, %v11910_v55  ;;  %8136 = vmatmul.mubr.msk.f32.gmra.mrb[28].mxu0 %vm5299_vm11, %v11935_v59 }
 0x30b   : > { %5655 = vmatprep.mubr.f32.mxu1 %v13102_v56  ;;  %5572 = vmatprep.mubr.f32.mxu0 %v13102_v56 }
 0x30c   : > { %9154 = vset.pattern.permute.xlu0 %v9354_v24 }
 0x30d   : > { %9153 = vset.pattern.permute.xlu1 %v9354_v24  ;;  %6026 = vperm.xlu0 %9154, %v12104_v30  }
 0x30e   : > { %8140 = vmatmul.mubr.msk.f32.gmra.mrb[28].mxu1 %vm5299_vm11, %v11935_v59  ;;  %6022 = vperm.xlu1 %9153, %v12084_v36  }
 0x30f   : > { %5661 = vmatprep.mubr.f32.mxu1 %v13102_v56  ;;  %8137 = vmatmul.mubr.msk.f32.gmra.mrb[30].mxu0 %vm5299_vm11, %v11972_v2 }
 0x310   : > { %6165 = vmatprep.mubr.f32.mxu0 %v13102_v56 }
 0x311   : > { %6030 = vperm.xlu0 %9154, %v12089_v53  }
 0x312   : > { %8141 = vmatmul.mubr.msk.f32.gmra.mrb[30].mxu1 %vm5299_vm11, %v11972_v2  ;;  %9155 = vset.pattern.permute.xlu1 %v9353_v45 }
 0x313   : > { %5982 = vperm.xlu1 %9155, %v12089_v53   ;;  %6254 = vmatprep.mubr.f32.mxu1 %v13102_v56 }
 0x317   : > { %5986 = vperm.xlu1 %9155, %v12109_v18  }
 0x31b   : > { %9156 = vset.pattern.permute.xlu1 %v9354_v24 }
 0x31c   : > { %6034 = vperm.xlu1 %9156, %v12109_v18  }
 0x37c   : > { %v12145_v55 = vpop.permute.xlu0 %5281 }
 0x37d   : > { %v12151_v8 = vpop.permute.xlu1 %5291 }
 0x380   : > { %v12149_v5 = vpop.permute.xlu0 %5286 }
 0x383   : > { %v12174_v50 = vpop.permute.xlu1 %5296 }
 0x3b5   : > { %v5378_v59 = vpop.f32.mrb[16].mxu0 }
 0x3b6   : > { %v5379_v34 = vadd.f32 %v5378_v59, %v12145_v55  ;;  %v5380_v51 = vpop.f32.mrb[17].mxu0 }
 0x3b7   : > { %v5381_v2 = vadd.f32 %v5380_v51, %v12145_v55 }
 0x3b8   : > { %v12153_v60 = vmax.f32 %v5379_v34, 0.0 }
 0x3b9   : > { %v5384_v20 = vpop.f32.mrb[18].mxu0  ;;  %v12157_v21 = vmax.f32 %v5381_v2, 0.0 }
 0x3ba   : > { %v5467_v52 = vpop.f32.mrb[16].mxu1  ;;  %v5385_v4 = vadd.f32 %v5384_v20, %v12149_v5  ;;  %v5386_v31 = vpop.f32.mrb[19].mxu0 }
 0x3bb   : > { %v5468_v57 = vadd.f32 %v5467_v52, %v12145_v55  ;;  %v5469_v12 = vpop.f32.mrb[17].mxu1  ;;  %v5387_v43 = vadd.f32 %v5386_v31, %v12149_v5 }
 0x3bc   : > { %v5470_v44 = vadd.f32 %v5469_v12, %v12145_v55  ;;  %v12161_v32 = vmax.f32 %v5385_v4, 0.0 }
 0x3bd   : > { %v12163_v3 = vmax.f32 %v5387_v43, 0.0  ;;  %v5390_v16 = vpop.f32.mrb[20].mxu0  ;;  %v12168_v37 = vmax.f32 %v5468_v57, 0.0 }
 0x3be   : > { %v5700_v27 = vadd.f32 %v12161_v32, %v12153_v60  ;;  %v5473_v63 = vpop.f32.mrb[18].mxu1  ;;  %v5391_v38 = vadd.f32 %v5390_v16, %v12151_v8  ;;  %v5392_v28 = vpop.f32.mrb[21].mxu0  ;;  %v12176_v6 = vmax.f32 %v5470_v44, 0.0 }
 0x3bf   : > { %13278 = vst [vmem:[#allocation24_spill] sm:$0xff] %v12168_v37  ;;  %v5474_v15 = vadd.f32 %v5473_v63, %v12149_v5  ;;  %v5709_v47 = vadd.f32 %v12163_v3, %v12157_v21  ;;  %v5475_v22 = vpop.f32.mrb[19].mxu1  ;;  %v5393_v58 = vadd.f32 %v5392_v28, %v12151_v8  ;;  %v9355_v63 = vmov 3  }
 0x3c0   : > { %13279 = vst [vmem:[#allocation23_spill] sm:$0xff] %v12176_v6  ;;  %v5476_v0 = vadd.f32 %v5475_v22, %v12149_v5  ;;  %v12179_v26 = vmax.f32 %v5391_v38, 0.0  ;;  %9158 = vset.pattern.permute.xlu1 %v9355_v63  ;;  %9157 = vset.pattern.permute.xlu0 %v9355_v63 }
 0x3c1   : > { %v12181_v48 = vmax.f32 %v5474_v15, 0.0  ;;  %v12183_v49 = vmax.f32 %v5393_v58, 0.0  ;;  %v5396_v35 = vpop.f32.mrb[22].mxu0  ;;  %6078 = vperm.xlu1 %9158, %v12104_v30   ;;  %6074 = vperm.xlu0 %9157, %v12084_v36  }
 0x3c2   : > { %13280 = vst [vmem:[#allocation5_spill] sm:$0xff] %v12179_v26  ;;  %v12185_v17 = vmax.f32 %v5476_v0, 0.0  ;;  %v5701_v1 = vadd.f32 %v5700_v27, %v12179_v26  ;;  %v5479_v33 = vpop.f32.mrb[20].mxu1  ;;  %v5397_v29 = vadd.f32 %v5396_v35, %v12174_v50  ;;  %v5398_v42 = vpop.f32.mrb[23].mxu0 }
 0x3c3   : > { %13281 = vst [vmem:[#allocation14_spill] sm:$0xff] %v12181_v48  ;;  %13282 = vst [vmem:[#allocation17_spill] sm:$0xff] %v12183_v49  ;;  %v5718_v13 = vadd.f32 %v12181_v48, %v12168_v37  ;;  %v5480_v62 = vadd.f32 %v5479_v33, %v12151_v8  ;;  %v5710_v7 = vadd.f32 %v5709_v47, %v12183_v49  ;;  %v5481_v39 = vpop.f32.mrb[21].mxu1 }
 0x3c4   : > { %13283 = vst [vmem:[#allocation16_spill] sm:$0xff] %v12185_v17  ;;  %v5399_v9 = vadd.f32 %v5398_v42, %v12174_v50  ;;  %v5727_v54 = vadd.f32 %v12185_v17, %v12176_v6  ;;  %v5482_v11 = vadd.f32 %v5481_v39, %v12151_v8  ;;  %v12197_v61 = vmax.f32 %v5397_v29, 0.0 }
 0x3c5   : > { %v12199_v46 = vmax.f32 %v5480_v62, 0.0  ;;  %6082 = vperm.xlu1 %9158, %v12089_v53   ;;  %6086 = vperm.xlu0 %9157, %v12109_v18  }
 0x3c6   : > { %13284 = vst [vmem:[#allocation6_spill] sm:$0xff] %v12197_v61  ;;  %v12201_v40 = vmax.f32 %v5399_v9, 0.0  ;;  %v12203_v23 = vmax.f32 %v5482_v11, 0.0  ;;  %v5702_v19 = vadd.f32 %v5701_v1, %v12197_v61  ;;  %v5485_v10 = vpop.f32.mrb[22].mxu1 }
 0x3c7   : > { %13285 = vst [vmem:[#allocation25_spill] sm:$0xff] %v12199_v46  ;;  %v5719_v25 = vadd.f32 %v5718_v13, %v12199_v46  ;;  %v5486_v14 = vadd.f32 %v5485_v10, %v12174_v50  ;;  %v5487_v45 = vpop.f32.mrb[23].mxu1 }
 0x3c8   : > { %13286 = vst [vmem:[#allocation32_spill] sm:$0xff] %v12201_v40  ;;  %13287 = vst [vmem:[#allocation27_spill] sm:$0xff] %v12203_v23  ;;  %v5711_v41 = vadd.f32 %v5710_v7, %v12201_v40  ;;  %v5728_v24 = vadd.f32 %v5727_v54, %v12203_v23  ;;  %v5703_v59 = vrot.slane %v5702_v19, 4  ;;  %v5488_v34 = vadd.f32 %v5487_v45, %v12174_v50 }
 0x3c9   : > { %v12211_v51 = vmax.f32 %v5486_v14, 0.0 }
 0x3ca   : > { %v5712_v2 = vrot.slane %v5711_v41, 4  ;;  %v5704_v20 = vadd.f32 %v5703_v59, %v5702_v19  ;;  %v12213_v52 = vmax.f32 %v5488_v34, 0.0 }
 0x3cb   : > { %13288 = vst [vmem:[#allocation10_spill] sm:$0xff] %v12211_v51  ;;  %v5720_v4 = vadd.f32 %v5719_v25, %v12211_v51 }
 0x3cc   : > { %13289 = vst [vmem:[#allocation18_spill] sm:$0xff] %v12213_v52  ;;  %v5713_v31 = vadd.f32 %v5712_v2, %v5711_v41  ;;  %v5705_v57 = vrot.slane %v5704_v20, 2  ;;  %v5729_v12 = vadd.f32 %v5728_v24, %v12213_v52 }
 0x3cd   : > { %v5721_v43 = vrot.slane %v5720_v4, 4 }
 0x3ce   : > { %v5714_v44 = vrot.slane %v5713_v31, 2  ;;  %v5706_v16 = vadd.f32 %v5705_v57, %v5704_v20  ;;  %v5730_v27 = vrot.slane %v5729_v12, 4 }
 0x3cf   : > { %v5722_v38 = vadd.f32 %v5721_v43, %v5720_v4 }
 0x3d0   : > { %v5715_v28 = vadd.f32 %v5714_v44, %v5713_v31  ;;  %v5707_v15 = vrot.slane %v5706_v16, 1  ;;  %v5731_v47 = vadd.f32 %v5730_v27, %v5729_v12 }
 0x3d1   : > { %v5723_v22 = vrot.slane %v5722_v38, 2 }
 0x3d2   : > { %v5716_v58 = vrot.slane %v5715_v28, 1  ;;  %v5708_v0 = vadd.f32 %v5707_v15, %v5706_v16  ;;  %v5732_v35 = vrot.slane %v5731_v47, 2 }
 0x3d3   : > { %v5724_v1 = vadd.f32 %v5723_v22, %v5722_v38 }
 0x3d4   : > { %v5717_v33 = vadd.f32 %v5716_v58, %v5715_v28  ;;  %v5773_v29 = vmul.f32 0.03125, %v5708_v0  ;;  %v5733_v62 = vadd.f32 %v5732_v35, %v5731_v47 }
 0x3d5   : > { %v5725_v42 = vrot.slane %v5724_v1, 1  ;;  %v5556_v7 = vpop.f32.mrb[24].mxu0 }
 0x3d6   : > { %v5774_v13 = vmul.f32 0.03125, %v5717_v33  ;;  %v12222_v30 = vsub.f32 %v12153_v60, %v5773_v29  ;;  %v12225_v36 = vsub.f32 %v12161_v32, %v5773_v29  ;;  %v12228_v39 = vsub.f32 %v12179_v26, %v5773_v29  ;;  %v5558_v53 = vpop.f32.mrb[25].mxu0 }
 0x3d7   : > { %v12231_v9 = vsub.f32 %v12197_v61, %v5773_v29  ;;  %v5726_v54 = vadd.f32 %v5725_v42, %v5724_v1  ;;  %v5734_v12 = vrot.slane %v5733_v62, 1  ;;  %v5557_v43 = vadd.f32 %v5556_v7, %v12145_v55 }
 0x3d8   : > { %v12234_v18 = vsub.f32 %v12157_v21, %v5774_v13  ;;  %v12237_v11 = vsub.f32 %v12163_v3, %v5774_v13  ;;  %v12240_v19 = vsub.f32 %v12183_v49, %v5774_v13  ;;  %v5813_v10 = vmul.f32 %v12222_v30, %v12222_v30 }
 0x3d9   : > { %v5821_v25 = vmul.f32 %v12225_v36, %v12225_v36  ;;  %v5829_v14 = vmul.f32 %v12228_v39, %v12228_v39  ;;  %v5837_v41 = vmul.f32 %v12231_v9, %v12231_v9  ;;  %v5645_v45 = vpop.f32.mrb[24].mxu1  ;;  %v5775_v24 = vmul.f32 0.03125, %v5726_v54  ;;  %v5562_v4 = vpop.f32.mrb[26].mxu0 }
 0x3da   : > { %v12251_v59 = vsub.f32 %v12201_v40, %v5774_v13  ;;  %v5814_v34 = vmul.f32 %v12234_v18, %v12234_v18  ;;  %v5822_v2 = vmul.f32 %v12237_v11, %v12237_v11  ;;  %v5647_v20 = vpop.f32.mrb[25].mxu1  ;;  %v5830_v57 = vmul.f32 %v12240_v19, %v12240_v19  ;;  %v5564_v44 = vpop.f32.mrb[27].mxu0 }
 0x3db   : > { %v5845_v31 = vadd.f32 %v5821_v25, %v5813_v10  ;;  %v12261_v16 = vsub.f32 %v12168_v37, %v5775_v24  ;;  %v12264_v27 = vsub.f32 %v12181_v48, %v5775_v24  ;;  %v12267_v63 = vsub.f32 %v12199_v46, %v5775_v24 }
 0x3dc   : > { %v12270_v38 = vsub.f32 %v12211_v51, %v5775_v24  ;;  %v5838_v15 = vmul.f32 %v12251_v59, %v12251_v59  ;;  %v5854_v47 = vadd.f32 %v5822_v2, %v5814_v34  ;;  %v5735_v22 = vadd.f32 %v5734_v12, %v5733_v62 }
 0x3dd   : > { %v5846_v28 = vadd.f32 %v5845_v31, %v5829_v14  ;;  %v5651_v58 = vpop.f32.mrb[26].mxu1  ;;  %v5815_v0 = vmul.f32 %v12261_v16, %v12261_v16  ;;  %v5823_v35 = vmul.f32 %v12264_v27, %v12264_v27  ;;  %v5831_v1 = vmul.f32 %v12267_v63, %v12267_v63  ;;  %v5568_v29 = vpop.f32.mrb[28].mxu0 }
 0x3de   : > { %v5653_v33 = vpop.f32.mrb[27].mxu1  ;;  %v5855_v13 = vadd.f32 %v5854_v47, %v5830_v57  ;;  %v5776_v7 = vmul.f32 0.03125, %v5735_v22  ;;  %v5570_v54 = vpop.f32.mrb[29].mxu0  ;;  %v5839_v10 = vmul.f32 %v12270_v38, %v12270_v38  ;;  %v12282_v25 = vmax.f32 %v5557_v43, 0.0 }
 0x3df   : > { %v5847_v42 = vadd.f32 %v5846_v28, %v5837_v41  ;;  %v5863_v62 = vadd.f32 %v5823_v35, %v5815_v0  ;;  %v5646_v14 = vadd.f32 %v5645_v45, %v12145_v55  ;;  %v5559_v43 = vadd.f32 %v5558_v53, %v12145_v55 }
 0x3e0   : > { %13290 = vst [vmem:[#allocation12_spill] sm:$0xff] %v12282_v25  ;;  %v5856_v34 = vadd.f32 %v5855_v13, %v5838_v15  ;;  %v12286_v2 = vsub.f32 %v12176_v6, %v5776_v7  ;;  %v12289_v31 = vsub.f32 %v12185_v17, %v5776_v7  ;;  %v12292_v12 = vsub.f32 %v12203_v23, %v5776_v7 }
 0x3e1   : > { %v5848_v24 = vrot.slane %v5847_v42, 4  ;;  %v5657_v41 = vpop.f32.mrb[28].mxu1  ;;  %v5864_v57 = vadd.f32 %v5863_v62, %v5831_v1  ;;  %v12295_v28 = vsub.f32 %v12213_v52, %v5776_v7  ;;  %v12306_v7 = vmax.f32 %v5646_v14, 0.0 }
 0x3e2   : > { %v5659_v47 = vpop.f32.mrb[29].mxu1  ;;  %v12298_v45 = vpop.f32.mrb[30].mxu0  ;;  %v5857_v22 = vrot.slane %v5856_v34, 4  ;;  %v5816_v0 = vmul.f32 %v12286_v2, %v12286_v2  ;;  %v5824_v35 = vmul.f32 %v12289_v31, %v12289_v31  ;;  %v5832_v62 = vmul.f32 %v12292_v12, %v12292_v12 }
 0x3e3   : > { %v5849_v15 = vadd.f32 %v5848_v24, %v5847_v42  ;;  %v5576_v1 = vpop.f32.mrb[31].mxu0  ;;  %v5865_v13 = vadd.f32 %v5864_v57, %v5839_v10  ;;  %13291 = vst [vmem:[#allocation21_spill] sm:$0xff] %v12306_v7  ;;  %v5648_v53 = vadd.f32 %v5647_v20, %v12145_v55  ;;  %v5840_v42 = vmul.f32 %v12295_v28, %v12295_v28 }
 0x3e4   : > { %v5858_v52 = vadd.f32 %v5857_v22, %v5856_v34  ;;  %v5872_v24 = vadd.f32 %v5824_v35, %v5816_v0  ;;  %v5563_v46 = vadd.f32 %v5562_v4, %v12149_v5  ;;  %v5652_v40 = vadd.f32 %v5651_v58, %v12149_v5 }
 0x3e5   : > { %v5850_v56 = vrot.slane %v5849_v15, 2  ;;  %v5663_v23 = vpop.f32.mrb[30].mxu1  ;;  %v5866_v51 = vrot.slane %v5865_v13, 4  ;;  %v5565_v10 = vadd.f32 %v5564_v44, %v12149_v5  ;;  %v5654_v55 = vadd.f32 %v5653_v33, %v12149_v5 }
 0x3e6   : > { %v5665_v57 = vpop.f32.mrb[31].mxu1  ;;  %v5859_v14 = vrot.slane %v5858_v52, 2  ;;  %v5873_v61 = vadd.f32 %v5872_v24, %v5832_v62  ;;  %v12315_v34 = vmax.f32 %v5559_v43, 0.0  ;;  %v12317_v22 = vmax.f32 %v5563_v46, 0.0 }
 0x3e7   : > { %v5851_v49 = vadd.f32 %v5850_v56, %v5849_v15  ;;  %v5867_v20 = vadd.f32 %v5866_v51, %v5865_v13  ;;  %v12319_v0 = vmax.f32 %v5652_v40, 0.0  ;;  %v12321_v17 = vmax.f32 %v5648_v53, 0.0 }
 0x3e8   : > { %13292 = vst [vmem:[#allocation9_spill] sm:$0xff] %v12315_v34  ;;  %13293 = vst [vmem:[#allocation20_spill] sm:$0xff] %v12317_v22  ;;  %v5860_v26 = vadd.f32 %v5859_v14, %v5858_v52  ;;  %v5874_v4 = vadd.f32 %v5873_v61, %v5840_v42  ;;  %v5736_v56 = vadd.f32 %v12317_v22, %v12282_v25  ;;  %v12325_v44 = vmax.f32 %v5565_v10, 0.0 }
 0x3e9   : > { %13294 = vst [vmem:[#allocation15_spill] sm:$0xff] %v12319_v0  ;;  %v5852_v35 = vrot.slane %v5851_v49, 1  ;;  %13295 = vst [vmem:[#allocation26_spill] sm:$0xff] %v12321_v17  ;;  %v5868_v58 = vrot.slane %v5867_v20, 2  ;;  %v12327_v15 = vmax.f32 %v5654_v55, 0.0  ;;  %v5754_v46 = vadd.f32 %v12319_v0, %v12306_v7 }
 0x3ea   : > { %13296 = vst [vmem:[#allocation11_spill] sm:$0xff] %v12325_v44  ;;  %v5861_v51 = vrot.slane %v5860_v26, 1  ;;  %v5875_v33 = vrot.slane %v5874_v4, 4  ;;  %v5569_v52 = vadd.f32 %v5568_v29, %v12151_v8  ;;  %v5658_v61 = vadd.f32 %v5657_v41, %v12151_v8 }
 0x3eb   : > { %13297 = vst [vmem:[#allocation19_spill] sm:$0xff] %v12327_v15  ;;  %v5853_v5 = vadd.f32 %v5852_v35, %v5851_v49  ;;  %v5869_v40 = vadd.f32 %v5868_v58, %v5867_v20  ;;  %v5571_v43 = vadd.f32 %v5570_v54, %v12151_v8  ;;  %v5660_v42 = vadd.f32 %v5659_v47, %v12151_v8 }
 0x3ec   : > { %v5862_v62 = vadd.f32 %v5861_v51, %v5860_v26  ;;  %v5876_v53 = vadd.f32 %v5875_v33, %v5874_v4  ;;  %v5745_v49 = vadd.f32 %v12325_v44, %v12315_v34  ;;  %v12337_v10 = vmax.f32 %v5569_v52, 0.0 }
 0x3ed   : > { %v5917_v13 = vmul.f32 0.03125, %v5853_v5  ;;  %v5870_v24 = vrot.slane %v5869_v40, 1  ;;  %v12339_v14 = vmax.f32 %v5658_v61, 0.0  ;;  %v12341_v35 = vmax.f32 %v5571_v43, 0.0 }
 0x3ee   : > { %13298 = vst [vmem:[#allocation13_spill] sm:$0xff] %v12337_v10  ;;  %v5918_v20 = vmul.f32 0.03125, %v5862_v62  ;;  %v5877_v29 = vrot.slane %v5876_v53, 2  ;;  %v5763_v26 = vadd.f32 %v12327_v15, %v12321_v17  ;;  %v5737_v54 = vadd.f32 %v5736_v56, %v12337_v10 }
 0x3ef   : > { %13299 = vst [vmem:[#allocation22_spill] sm:$0xff] %v12339_v14  ;;  %v5925_v55 = vadd.f32 1e-05, %v5917_v13  ;;  %13300 = vst [vmem:[#allocation35_spill] sm:$0xff] %v12341_v35  ;;  %v5871_v41 = vadd.f32 %v5870_v24, %v5869_v40  ;;  %v12346_v8 = vmax.f32 %v5660_v42, 0.0  ;;  %v5755_v58 = vadd.f32 %v5754_v46, %v12339_v14 }
 0x3f0   : > { %v5926_v47 = vadd.f32 1e-05, %v5918_v20  ;;  %v5878_v4 = vadd.f32 %v5877_v29, %v5876_v53  ;;  %v5575_v51 = vadd.f32 %v12298_v45, %v12174_v50  ;;  %v5664_v33 = vadd.f32 %v5663_v23, %v12174_v50 }
 0x3f1   : > { %13301 = vst [vmem:[#allocation37_spill] sm:$0xff] %v12346_v8  ;;  %9261 = vrsqrt.f32 %v5925_v55  ;;  %v5919_v5 = vmul.f32 0.03125, %v5871_v41  ;;  %v5577_v40 = vadd.f32 %v5576_v1, %v12174_v50  ;;  %v5746_v61 = vadd.f32 %v5745_v49, %v12341_v35 }
 0x3f2   : > { %9263 = vrsqrt.f32 %v5926_v47  ;;  %v5879_v52 = vrot.slane %v5878_v4, 1  ;;  %v5666_v56 = vadd.f32 %v5665_v57, %v12174_v50  ;;  %v12355_v13 = vmax.f32 %v5575_v51, 0.0  ;;  %v12368_v51 = vpop.permute.xlu1 %5978 }
 0x3f3   : > { %v5927_v43 = vadd.f32 1e-05, %v5919_v5  ;;  %v12357_v62 = vmax.f32 %v5664_v33, 0.0  ;;  %v12359_v46 = vmax.f32 %v5577_v40, 0.0  ;;  %v5764_v45 = vadd.f32 %v5763_v26, %v12346_v8  ;;  %v12373_v33 = vpop.permute.xlu0 %5974 }
 0x3f4   : > { %13302 = vst [vmem:[#allocation38_spill] sm:$0xff] %v12355_v13  ;;  %v5880_v53 = vadd.f32 %v5879_v52, %v5878_v4  ;;  %v12362_v42 = vmax.f32 %v5666_v56, 0.0  ;;  %v5738_v23 = vadd.f32 %v5737_v54, %v12355_v13 }
 0x3f5   : > { %13303 = vst [vmem:[#allocation40_spill] sm:$0xff] %v12357_v62  ;;  %13304 = vst [vmem:[#allocation41_spill] sm:$0xff] %v12359_v46  ;;  %9265 = vrsqrt.f32 %v5927_v43  ;;  %v5756_v1 = vadd.f32 %v5755_v58, %v12357_v62  ;;  %v5747_v24 = vadd.f32 %v5746_v61, %v12359_v46 }
 0x3f6   : > { %13305 = vst [vmem:[#allocation7_spill] sm:$0xff] %v12362_v42  ;;  %v5920_v50 = vmul.f32 0.03125, %v5880_v53  ;;  %v5765_v57 = vadd.f32 %v5764_v45, %v12362_v42  ;;  %v5739_v49 = vrot.slane %v5738_v23, 4 }
 0x3f7   : > { %v5757_v55 = vrot.slane %v5756_v1, 4  ;;  %v5748_v20 = vrot.slane %v5747_v24, 4 }
 0x3f8   : > { %v5928_v29 = vadd.f32 1e-05, %v5920_v50  ;;  %v5766_v41 = vrot.slane %v5765_v57, 4  ;;  %v5740_v47 = vadd.f32 %v5739_v49, %v5738_v23 }
 0x3f9   : > { %v5758_v4 = vadd.f32 %v5757_v55, %v5756_v1  ;;  %v5749_v26 = vadd.f32 %v5748_v20, %v5747_v24 }
 0x3fa   : > { %9267 = vrsqrt.f32 %v5928_v29  ;;  %v5767_v54 = vadd.f32 %v5766_v41, %v5765_v57  ;;  %v5741_v40 = vrot.slane %v5740_v47, 2 }
 0x3fb   : > { %v9262_v5 = vpop.eup %9261  ;;  %v5759_v52 = vrot.slane %v5758_v4, 2  ;;  %v5750_v61 = vrot.slane %v5749_v26, 2 }
 0x3fc   : > { %v12371_v58 = vmul.f32 %v9262_v5, %v12231_v9  ;;  %v12375_v56 = vpop.eup %9263  ;;  %v5768_v43 = vrot.slane %v5767_v54, 2  ;;  %v5941_v53 = vmul.f32 %v9262_v5, %v12222_v30  ;;  %v5949_v45 = vmul.f32 %v9262_v5, %v12225_v36 }
 0x3fd   : > { %v12380_v23 = vmul.f32 %v9262_v5, %v12228_v39  ;;  %v12384_v1 = vmul.f32 %v12375_v56, %v12251_v59  ;;  %v5742_v9 = vadd.f32 %v5741_v40, %v5740_v47  ;;  %v5760_v24 = vadd.f32 %v5759_v52, %v5758_v4  ;;  %v12398_v47 = vpop.permute.xlu1 %6022 }
 0x3fe   : > { %v5751_v50 = vadd.f32 %v5750_v61, %v5749_v26  ;;  %v5769_v57 = vadd.f32 %v5768_v43, %v5767_v54  ;;  %v5942_v49 = vmul.f32 %v12375_v56, %v12234_v18  ;;  %v5950_v55 = vmul.f32 %v12375_v56, %v12237_v11  ;;  %v12402_v26 = vpop.permute.xlu0 %6026 }
 0x3ff   : > { %v5989_v30 = vmul.f32 %v12373_v33, %v5941_v53  ;;  %v12391_v36 = vpop.eup %9265  ;;  %v5743_v39 = vrot.slane %v5742_v9, 1  ;;  %v5761_v20 = vrot.slane %v5760_v24, 1  ;;  %v5997_v59 = vmul.f32 %v12368_v51, %v5949_v45 }
 0x400   : > { %v5752_v29 = vrot.slane %v5751_v50, 1  ;;  %v12396_v41 = vmul.f32 %v12391_v36, %v12270_v38  ;;  %v5770_v4 = vrot.slane %v5769_v57, 1  ;;  %v5990_v18 = vmul.f32 %v12373_v33, %v5942_v49 }
 0x401   : > { %v5998_v11 = vmul.f32 %v12368_v51, %v5950_v55  ;;  %v5744_v5 = vadd.f32 %v5743_v39, %v5742_v9  ;;  %v5762_v54 = vadd.f32 %v5761_v20, %v5760_v24  ;;  %v6037_v52 = vadd.f32 %v12398_v47, %v5989_v30 }
 0x402   : > { %v5753_v40 = vadd.f32 %v5752_v29, %v5751_v50  ;;  %v5771_v61 = vadd.f32 %v5770_v4, %v5769_v57  ;;  %v6038_v43 = vadd.f32 %v12398_v47, %v5990_v18  ;;  %v6045_v53 = vadd.f32 %v12402_v26, %v5997_v59  ;;  %v12439_v4 = vpop.permute.xlu1 %5982 }
 0x403   : > { %v6046_v38 = vadd.f32 %v12402_v26, %v5998_v11  ;;  %v5777_v45 = vmul.f32 0.03125, %v5744_v5  ;;  %v5779_v6 = vmul.f32 0.03125, %v5762_v54  ;;  %v5943_v49 = vmul.f32 %v12391_v36, %v12261_v16 }
 0x404   : > { %v5778_v48 = vmul.f32 0.03125, %v5753_v40  ;;  %v12410_v55 = vpop.eup %9267  ;;  %v5780_v9 = vmul.f32 0.03125, %v5771_v61  ;;  %v8906_v50 = vpack.c.bf16 %v6045_v53, %v6037_v52  ;;  %v5951_v57 = vmul.f32 %v12391_v36, %v12264_v27 }
 0x405   : > { %v8904_v24 = vpack.c.bf16 %v6046_v38, %v6038_v43  ;;  %v12416_v30 = vmul.f32 %v12410_v55, %v12295_v28  ;;  %v12419_v39 = vsub.f32 %v12282_v25, %v5777_v45  ;;  %v12422_v20 = vsub.f32 %v12317_v22, %v5777_v45 }
 0x406   : > { %v12425_v16 = vsub.f32 %v12337_v10, %v5777_v45  ;;  %v12428_v29 = vsub.f32 %v12355_v13, %v5777_v45  ;;  %v12431_v59 = vsub.f32 %v12306_v7, %v5779_v6  ;;  %v12434_v27 = vsub.f32 %v12319_v0, %v5779_v6 }
 0x407   : > { %v12437_v28 = vsub.f32 %v12339_v14, %v5779_v6  ;;  %8905 = vmatprep.subr.bf16.mxu0 %v8904_v24  ;;  %v5817_v18 = vmul.f32 %v12419_v39, %v12419_v39  ;;  %v5825_v11 = vmul.f32 %v12422_v20, %v12422_v20  ;;  %v12448_v54 = vsub.f32 %v12357_v62, %v5779_v6 }
 0x408   : > { %v5833_v5 = vmul.f32 %v12425_v16, %v12425_v16  ;;  %8907 = vmatpush1.bf16.msra.mxu0 %v8906_v50  ;;  %v5841_v40 = vmul.f32 %v12428_v29, %v12428_v29  ;;  %v5819_v52 = vmul.f32 %v12431_v59, %v12431_v59  ;;  %v5827_v61 = vmul.f32 %v12434_v27, %v12434_v27 }
 0x409   : > { %v5835_v43 = vmul.f32 %v12437_v28, %v12437_v28  ;;  %v5881_v38 = vadd.f32 %v5825_v11, %v5817_v18  ;;  %v5843_v53 = vmul.f32 %v12448_v54, %v12448_v54  ;;  %v12461_v6 = vsub.f32 %v12315_v34, %v5778_v48 }
 0x40a   : > { %v12464_v45 = vsub.f32 %v12325_v44, %v5778_v48  ;;  %v5899_v24 = vadd.f32 %v5827_v61, %v5819_v52  ;;  %v12467_v50 = vsub.f32 %v12341_v35, %v5778_v48  ;;  %v12470_v62 = vsub.f32 %v12359_v46, %v5778_v48 }
 0x40b   : > { %v12473_v14 = vsub.f32 %v12321_v17, %v5780_v9  ;;  %v5882_v18 = vadd.f32 %v5881_v38, %v5833_v5  ;;  %v5818_v11 = vmul.f32 %v12461_v6, %v12461_v6  ;;  %v12480_v10 = vsub.f32 %v12327_v15, %v5780_v9  ;;  %v12489_v5 = vpop.permute.xlu1 %5986 }
 0x40c   : > { %v5826_v13 = vmul.f32 %v12464_v45, %v12464_v45  ;;  %v5900_v52 = vadd.f32 %v5899_v24, %v5835_v43  ;;  %v5834_v61 = vmul.f32 %v12467_v50, %v12467_v50  ;;  %v5842_v48 = vmul.f32 %v12470_v62, %v12470_v62 }
 0x40d   : > { %v12487_v46 = vsub.f32 %v12346_v8, %v5780_v9  ;;  %v5883_v38 = vadd.f32 %v5882_v18, %v5841_v40  ;;  %v12492_v17 = vsub.f32 %v12362_v42, %v5780_v9  ;;  %v5820_v15 = vmul.f32 %v12473_v14, %v12473_v14 }
 0x40e   : > { %v5890_v35 = vadd.f32 %v5826_v13, %v5818_v11  ;;  %v5901_v43 = vadd.f32 %v5900_v52, %v5843_v53  ;;  %v5828_v24 = vmul.f32 %v12480_v10, %v12480_v10  ;;  %v5944_v8 = vmul.f32 %v12410_v55, %v12286_v2 }
 0x40f   : > { %v5836_v0 = vmul.f32 %v12487_v46, %v12487_v46  ;;  %v5884_v7 = vrot.slane %v5883_v38, 4  ;;  %v5844_v13 = vmul.f32 %v12492_v17, %v12492_v17  ;;  %v5952_v9 = vmul.f32 %v12410_v55, %v12289_v31  ;;  %v12512_v37 = vpop.permute.xlu1 %6034 }
 0x410   : > { %v5891_v44 = vadd.f32 %v5890_v35, %v5834_v61  ;;  %v5902_v40 = vrot.slane %v5901_v43, 4  ;;  %v5908_v18 = vadd.f32 %v5828_v24, %v5820_v15  ;;  %v5992_v53 = vmul.f32 %v12373_v33, %v5944_v8 }
 0x411   : > { %v5991_v11 = vmul.f32 %v12373_v33, %v5943_v49  ;;  %v5885_v52 = vadd.f32 %v5884_v7, %v5883_v38  ;;  %v6000_v34 = vmul.f32 %v12368_v51, %v5952_v9  ;;  %v5999_v2 = vmul.f32 %v12368_v51, %v5951_v57  ;;  %v12520_v57 = vpop.permute.xlu0 %6030 }
 0x412   : > { %v5892_v42 = vadd.f32 %v5891_v44, %v5842_v48  ;;  %v5903_v22 = vadd.f32 %v5902_v40, %v5901_v43  ;;  %v5909_v35 = vadd.f32 %v5908_v18, %v5836_v0  ;;  %v6040_v61 = vadd.f32 %v12398_v47, %v5992_v53 }
 0x413   : > { %v6039_v25 = vadd.f32 %v12398_v47, %v5991_v11  ;;  %v5886_v31 = vrot.slane %v5885_v52, 2  ;;  %v6048_v8 = vadd.f32 %v12402_v26, %v6000_v34  ;;  %v6047_v49 = vadd.f32 %v12402_v26, %v5999_v2 }
 0x414   : > { %v5893_v15 = vrot.slane %v5892_v42, 4  ;;  %v5904_v7 = vrot.slane %v5903_v22, 2  ;;  %v5910_v44 = vadd.f32 %v5909_v35, %v5844_v13  ;;  %v5958_v48 = vmul.f32 %v12375_v56, %v12240_v19 }
 0x415   : > { %v6014_v0 = vmul.f32 %v12489_v5, %v12384_v1  ;;  %v5887_v38 = vadd.f32 %v5886_v31, %v5885_v52  ;;  %v8912_v24 = vpack.c.bf16 %v6048_v8, %v6040_v61  ;;  %v8914_v9 = vpack.c.bf16 %v6047_v49, %v6039_v25 }
 0x416   : > { %v5894_v43 = vadd.f32 %v5893_v15, %v5892_v42  ;;  %v5905_v40 = vadd.f32 %v5904_v7, %v5903_v22  ;;  %v5911_v18 = vrot.slane %v5910_v44, 4  ;;  %v6006_v34 = vmul.f32 %v12439_v4, %v5958_v48 }
 0x417   : > { %v6062_v53 = vadd.f32 %v12512_v37, %v6014_v0  ;;  %v5888_v11 = vrot.slane %v5887_v38, 1  ;;  %8913 = vmatprep.subr.bf16.mxu1 %v8912_v24  ;;  %v5960_v19 = vmul.f32 %v12410_v55, %v12292_v12  ;;  %v6016_v56 = vmul.f32 %v12489_v5, %v12416_v30 }
 0x418   : > { %v5895_v13 = vrot.slane %v5894_v43, 2  ;;  %v5906_v1 = vrot.slane %v5905_v40, 1  ;;  %v5912_v52 = vadd.f32 %v5911_v18, %v5910_v44  ;;  %8915 = vmatpush1.bf16.msra.mxu1 %v8914_v9  ;;  %v6054_v25 = vadd.f32 %v12520_v57, %v6006_v34 }
 0x419   : > { %v6005_v22 = vmul.f32 %v12439_v4, %v12380_v23  ;;  %v5889_v42 = vadd.f32 %v5888_v11, %v5887_v38  ;;  %v6008_v35 = vmul.f32 %v12439_v4, %v5960_v19  ;;  %v6064_v61 = vadd.f32 %v12512_v37, %v6016_v56 }
 0x41a   : > { %v5896_v2 = vadd.f32 %v5895_v13, %v5894_v43  ;;  %v5907_v31 = vadd.f32 %v5906_v1, %v5905_v40  ;;  %v5913_v15 = vrot.slane %v5912_v52, 2  ;;  %v8908_v12 = vpack.c.bf16 %v6062_v53, %v6054_v25  ;;  %v12556_v25 = vld [vmem:[%s13048_s2 + $0x48] sm:$0xff] }
 0x41b   : > { %v6013_v55 = vmul.f32 %v12489_v5, %v12371_v58  ;;  %v5921_v30 = vmul.f32 0.03125, %v5889_v42  ;;  %v6056_v49 = vadd.f32 %v12520_v57, %v6008_v35  ;;  %v6053_v7 = vadd.f32 %v12520_v57, %v6005_v22  ;;  %v12567_v22 = vld [vmem:[%s13048_s2 + $0x50] sm:$0xff] }
 0x41c   : > { %v5897_v8 = vrot.slane %v5896_v2, 1  ;;  %v5923_v44 = vmul.f32 0.03125, %v5907_v31  ;;  %v5914_v23 = vadd.f32 %v5913_v15, %v5912_v52  ;;  %8909 = vmatprep.subr.bf16.mxu0 %v8908_v12  ;;  %v5959_v0 = vmul.f32 %v12391_v36, %v12267_v63  ;;  %v12548_v36 = vld [vmem:[%s13048_s2 + $0x40] sm:$0xff] }
 0x41d   : > { %v6061_v48 = vadd.f32 %v12512_v37, %v6013_v55  ;;  %v5929_v38 = vadd.f32 1e-05, %v5921_v30  ;;  %v8916_v24 = vpack.c.bf16 %v6064_v61, %v6056_v49  ;;  %v6015_v58 = vmul.f32 %v12489_v5, %v12396_v41 }
 0x41e   : > { %v5898_v43 = vadd.f32 %v5897_v8, %v5896_v2  ;;  %v5931_v9 = vadd.f32 1e-05, %v5923_v44  ;;  %v5915_v40 = vrot.slane %v5914_v23, 1  ;;  %v6007_v34 = vmul.f32 %v12439_v4, %v5959_v0 }
 0x41f   : > { %v8910_v18 = vpack.c.bf16 %v6061_v48, %v6053_v7  ;;  %9269 = vrsqrt.f32 %v5929_v38  ;;  %8917 = vmatprep.subr.bf16.mxu1 %v8916_v24  ;;  %v6063_v11 = vadd.f32 %v12512_v37, %v6015_v58  ;;  %v13306_v52 = vmov 0.0  }
 0x420   : > { %v5922_v53 = vmul.f32 0.03125, %v5898_v43  ;;  %9271 = vrsqrt.f32 %v5931_v9  ;;  %v5916_v13 = vadd.f32 %v5915_v40, %v5914_v23  ;;  %v6055_v63 = vadd.f32 %v12520_v57, %v6007_v34 }
 0x421   : > { %8911 = vmatpush1.bf16.msra.mxu0 %v8910_v18 }
 0x422   : > { %v5930_v41 = vadd.f32 1e-05, %v5922_v53  ;;  %v5924_v19 = vmul.f32 0.03125, %v5916_v13  ;;  %v8918_v56 = vpack.c.bf16 %v6063_v11, %v6055_v63 }
 0x424   : > { %9273 = vrsqrt.f32 %v5930_v41  ;;  %8142 = vmatmul.mubr.msk.f32.vlgmr.msra.gmra.mrb[32].mxu0 %vm5299_vm11, %v12548_v36  ;;  %v5932_v1 = vadd.f32 1e-05, %v5924_v19  ;;  %8919 = vmatpush1.bf16.msra.mxu1 %v8918_v56 }
 0x425   : > { %6171 = vmatprep.mubr.f32.mxu0 %v13306_v52 }
 0x426   : > { %9275 = vrsqrt.f32 %v5932_v1 }
 0x427   : > { %8146 = vmatmul.mubr.msk.f32.vlgmr.msra.gmra.mrb[32].mxu1 %vm5299_vm11, %v12548_v36 }
 0x428   : > { %8143 = vmatmul.mubr.msk.f32.gmra.mrb[34].mxu0 %vm5299_vm11, %v12556_v25  ;;  %6260 = vmatprep.mubr.f32.mxu1 %v13306_v52 }
 0x429   : > { %6177 = vmatprep.mubr.f32.mxu0 %v13306_v52  ;;  %v9270_v42 = vpop.eup %9269 }
 0x42a   : > { %v9272_v2 = vpop.eup %9271  ;;  %v5969_v35 = vmul.f32 %v9270_v42, %v12428_v29  ;;  %v5945_v61 = vmul.f32 %v9270_v42, %v12419_v39  ;;  %v5953_v31 = vmul.f32 %v9270_v42, %v12422_v20  ;;  %v5961_v15 = vmul.f32 %v9270_v42, %v12425_v16  ;;  %v12585_v39 = vld [vmem:[%s13048_s2 + $0x58] sm:$0xff] }
 0x42b   : > { %v5971_v12 = vmul.f32 %v9272_v2, %v12448_v54  ;;  %8147 = vmatmul.mubr.msk.f32.gmra.mrb[34].mxu1 %vm5299_vm11, %v12556_v25  ;;  %v5947_v55 = vmul.f32 %v9272_v2, %v12431_v59  ;;  %v5955_v30 = vmul.f32 %v9272_v2, %v12434_v27 }
 0x42c   : > { %8144 = vmatmul.mubr.msk.f32.gmra.mrb[36].mxu0 %vm5299_vm11, %v12567_v22  ;;  %6266 = vmatprep.mubr.f32.mxu1 %v13306_v52  ;;  %v5993_v20 = vmul.f32 %v12373_v33, %v5945_v61  ;;  %v6001_v16 = vmul.f32 %v12368_v51, %v5953_v31  ;;  %v6017_v54 = vmul.f32 %v12489_v5, %v5969_v35 }
 0x42d   : > { %6183 = vmatprep.mubr.f32.mxu0 %v13306_v52  ;;  %v6019_v59 = vmul.f32 %v12489_v5, %v5971_v12  ;;  %v5995_v27 = vmul.f32 %v12373_v33, %v5947_v55  ;;  %v6003_v8 = vmul.f32 %v12368_v51, %v5955_v30  ;;  %v6009_v38 = vmul.f32 %v12439_v4, %v5961_v15 }
 0x42e   : > { %v9274_v29 = vpop.eup %9273  ;;  %v6041_v23 = vadd.f32 %v12398_v47, %v5993_v20  ;;  %v6049_v48 = vadd.f32 %v12402_v26, %v6001_v16  ;;  %v5963_v61 = vmul.f32 %v9272_v2, %v12437_v28  ;;  %v12664_v28 = vld [vmem:[%s13049_s3] sm:$0xff] }
 0x42f   : > { %v5970_v49 = vmul.f32 %v9274_v29, %v12470_v62  ;;  %v5946_v7 = vmul.f32 %v9274_v29, %v12461_v6  ;;  %v5954_v44 = vmul.f32 %v9274_v29, %v12464_v45  ;;  %8148 = vmatmul.mubr.msk.f32.gmra.mrb[36].mxu1 %vm5299_vm11, %v12567_v22  ;;  %v6043_v0 = vadd.f32 %v12398_v47, %v5995_v27 }
 0x430   : > { %8145 = vmatmul.mubr.msk.f32.gmra.mrb[38].mxu0 %vm5299_vm11, %v12585_v39  ;;  %v9276_v43 = vpop.eup %9275  ;;  %6272 = vmatprep.mubr.f32.mxu1 %v13306_v52  ;;  %v5962_v45 = vmul.f32 %v9274_v29, %v12467_v50  ;;  %v6051_v18 = vadd.f32 %v12402_v26, %v6003_v8  ;;  %v8922_v11 = vpack.c.bf16 %v6049_v48, %v6041_v23 }
 0x431   : > { %v5994_v62 = vmul.f32 %v12373_v33, %v5946_v7  ;;  %v6002_v6 = vmul.f32 %v12368_v51, %v5954_v44  ;;  %v6018_v24 = vmul.f32 %v12489_v5, %v5970_v49  ;;  %v5972_v58 = vmul.f32 %v9276_v43, %v12492_v17  ;;  %6343 = vmatprep.mubr.f32.mxu0 %v13306_v52 }
 0x432   : > { %v5948_v9 = vmul.f32 %v9276_v43, %v12473_v14  ;;  %v5956_v40 = vmul.f32 %v9276_v43, %v12480_v10  ;;  %v6010_v13 = vmul.f32 %v12439_v4, %v5962_v45  ;;  %v5964_v50 = vmul.f32 %v9276_v43, %v12487_v46 }
 0x433   : > { %v6042_v34 = vadd.f32 %v12398_v47, %v5994_v62  ;;  %v6050_v53 = vadd.f32 %v12402_v26, %v6002_v6  ;;  %8149 = vmatmul.mubr.msk.f32.gmra.mrb[38].mxu1 %vm5299_vm11, %v12585_v39  ;;  %v6066_v10 = vadd.f32 %v12512_v37, %v6018_v24  ;;  %v6020_v19 = vmul.f32 %v12489_v5, %v5972_v58 }
 0x434   : > { %v5996_v17 = vmul.f32 %v12373_v33, %v5948_v9  ;;  %v6004_v14 = vmul.f32 %v12368_v51, %v5956_v40  ;;  %v6058_v41 = vadd.f32 %v12520_v57, %v6010_v13  ;;  %v6057_v56 = vadd.f32 %v12520_v57, %v6009_v38  ;;  %6432 = vmatprep.mubr.f32.mxu1 %v13306_v52 }
 0x435   : > { %v8920_v63 = vpack.c.bf16 %v6050_v53, %v6042_v34  ;;  %v6012_v33 = vmul.f32 %v12439_v4, %v5964_v50  ;;  %v6065_v51 = vadd.f32 %v12512_v37, %v6017_v54  ;;  %v6068_v46 = vadd.f32 %v12512_v37, %v6020_v19 }
 0x436   : > { %v6044_v1 = vadd.f32 %v12398_v47, %v5996_v17  ;;  %v6052_v42 = vadd.f32 %v12402_v26, %v6004_v14  ;;  %v8924_v35 = vpack.c.bf16 %v6066_v10, %v6058_v41  ;;  %v8930_v15 = vpack.c.bf16 %v6051_v18, %v6043_v0 }
 0x437   : > { %8921 = vmatprep.subr.bf16.mxu0 %v8920_v63  ;;  %v6060_v5 = vadd.f32 %v12520_v57, %v6012_v33  ;;  %v6011_v47 = vmul.f32 %v12439_v4, %v5963_v61  ;;  %v6067_v26 = vadd.f32 %v12512_v37, %v6019_v59  ;;  %v8926_v55 = vpack.c.bf16 %v6065_v51, %v6057_v56  ;;  %v12670_v4 = vld [vmem:[%s13049_s3 + $0x8] sm:$0xff] }
 0x438   : > { %v8928_v31 = vpack.c.bf16 %v6052_v42, %v6044_v1  ;;  %8923 = vmatpush1.bf16.msra.mxu0 %v8922_v11  ;;  %v9356_v37 = vmov 4  }
 0x439   : > { %8925 = vmatprep.subr.bf16.mxu0 %v8924_v35  ;;  %v8932_v12 = vpack.c.bf16 %v6068_v46, %v6060_v5  ;;  %v6059_v30 = vadd.f32 %v12520_v57, %v6011_v47  ;;  %9159 = vset.pattern.permute.xlu1 %v9356_v37  ;;  %v12676_v57 = vld [vmem:[%s13049_s3 + $0x10] sm:$0xff] }
 0x43a   : > { %8929 = vmatprep.subr.bf16.mxu1 %v8928_v31  ;;  %9160 = vset.pattern.permute.xlu0 %v9356_v37 }
 0x43b   : > { %8931 = vmatpush1.bf16.msra.mxu1 %v8930_v15  ;;  %v8934_v20 = vpack.c.bf16 %v6067_v26, %v6059_v30  ;;  %6494 = vperm.xlu1 %9159, %v12664_v28  }
 0x43c   : > { %8933 = vmatprep.subr.bf16.mxu1 %v8932_v12  ;;  %8927 = vmatpush1.bf16.msra.mxu0 %v8926_v55 }
 0x43d   : > { %6498 = vperm.xlu0 %9160, %v12670_v4  }
 0x43f   : > { %8935 = vmatpush1.bf16.msra.mxu1 %v8934_v20  ;;  %8150 = vmatmul.mubr.msk.f32.vlgmr.msra.gmra.mrb[40].mxu0 %vm5299_vm11, %v12548_v36 }
 0x440   : > { %6349 = vmatprep.mubr.f32.mxu0 %v13306_v52  ;;  %6502 = vperm.xlu1 %9159, %v12676_v57   ;;  %v12687_v2 = vpop.permute.xlu1 %6078 }
 0x442   : > { %8154 = vmatmul.mubr.msk.f32.vlgmr.msra.gmra.mrb[40].mxu1 %vm5299_vm11, %v12548_v36  ;;  %v12682_v36 = vld [vmem:[%s13049_s3 + $0x18] sm:$0xff] }
 0x443   : > { %6438 = vmatprep.mubr.f32.mxu1 %v13306_v52  ;;  %8151 = vmatmul.mubr.msk.f32.gmra.mrb[42].mxu0 %vm5299_vm11, %v12556_v25 }
 0x444   : > { %6355 = vmatprep.mubr.f32.mxu0 %v13306_v52  ;;  %6506 = vperm.xlu1 %9159, %v12682_v36   ;;  %v12695_v38 = vpop.permute.xlu1 %6082 }
 0x446   : > { %8155 = vmatmul.mubr.msk.f32.gmra.mrb[42].mxu1 %vm5299_vm11, %v12556_v25  ;;  %v12685_v25 = vpop.permute.xlu0 %6074 }
 0x447   : > { %6444 = vmatprep.mubr.f32.mxu1 %v13306_v52  ;;  %8152 = vmatmul.mubr.msk.f32.gmra.mrb[44].mxu0 %vm5299_vm11, %v12567_v22 }
 0x448   : > { %6361 = vmatprep.mubr.f32.mxu0 %v13306_v52 }
 0x44a   : > { %8156 = vmatmul.mubr.msk.f32.gmra.mrb[44].mxu1 %vm5299_vm11, %v12567_v22  ;;  %v12700_v17 = vpop.permute.xlu0 %6086 }
 0x44b   : > { %6450 = vmatprep.mubr.f32.mxu1 %v13306_v52  ;;  %8153 = vmatmul.mubr.msk.f32.gmra.mrb[46].mxu0 %vm5299_vm11, %v12585_v39 }
 0x44c   : > { %6585 = vmatprep.mubr.f32.mxu0 %v13306_v52 }
 0x44e   : > { %8157 = vmatmul.mubr.msk.f32.gmra.mrb[46].mxu1 %vm5299_vm11, %v12585_v39 }
 0x44f   : > { %6674 = vmatprep.mubr.f32.mxu1 %v13306_v52 }
 0x4f7   : > { %v6167_v22 = vpop.f32.mrb[32].mxu0 }
 0x4f8   : > { %v6169_v39 = vpop.f32.mrb[33].mxu0  ;;  %v6168_v16 = vadd.f32 %v6167_v22, %v12685_v25 }
 0x4f9   : > { %v6170_v29 = vadd.f32 %v6169_v39, %v12685_v25 }
 0x4fa   : > { %v6256_v54 = vpop.f32.mrb[32].mxu1  ;;  %v6457_v7 = vmax.f32 %v6168_v16, 0.0 }
 0x4fb   : > { %v6173_v59 = vpop.f32.mrb[34].mxu0  ;;  %v6258_v27 = vpop.f32.mrb[33].mxu1  ;;  %v6257_v44 = vadd.f32 %v6256_v54, %v12685_v25  ;;  %v6458_v48 = vmax.f32 %v6170_v29, 0.0  ;;  %v12712_v54 = vld [vmem:[%s13048_s2 + $0x60] sm:$0xff] }
 0x4fc   : > { %v6175_v8 = vpop.f32.mrb[35].mxu0  ;;  %v6174_v49 = vadd.f32 %v6173_v59, %v12687_v2  ;;  %v6259_v0 = vadd.f32 %v6258_v27, %v12685_v25  ;;  %v12720_v27 = vld [vmem:[%s13048_s2 + $0x68] sm:$0xff] }
 0x4fd   : > { %v6176_v23 = vadd.f32 %v6175_v8, %v12687_v2  ;;  %v6459_v18 = vmax.f32 %v6257_v44, 0.0 }
 0x4fe   : > { %v6465_v43 = vmax.f32 %v6174_v49, 0.0  ;;  %v6262_v62 = vpop.f32.mrb[34].mxu1  ;;  %v6460_v13 = vmax.f32 %v6259_v0, 0.0 }
 0x4ff   : > { %v6466_v6 = vmax.f32 %v6176_v23, 0.0  ;;  %v6179_v45 = vpop.f32.mrb[36].mxu0  ;;  %v6264_v24 = vpop.f32.mrb[35].mxu1  ;;  %v6263_v40 = vadd.f32 %v6262_v62, %v12687_v2 }
 0x500   : > { %v6181_v58 = vpop.f32.mrb[37].mxu0  ;;  %v8938_v9 = vpack.c.bf16 %v6465_v43, %v6457_v7  ;;  %v6180_v34 = vadd.f32 %v6179_v45, %v12695_v38  ;;  %v6265_v11 = vadd.f32 %v6264_v24, %v12687_v2  ;;  %v12731_v7 = vld [vmem:[%s13048_s2 + $0x70] sm:$0xff]  ;;  %v12745_v45 = vld [vmem:[%s13048_s2 + $0x78] sm:$0xff] }
 0x501   : > { %v8936_v53 = vpack.c.bf16 %v6466_v6, %v6458_v48  ;;  %v6182_v14 = vadd.f32 %v6181_v58, %v12695_v38  ;;  %v6467_v10 = vmax.f32 %v6263_v40, 0.0 }
 0x502   : > { %v6468_v50 = vmax.f32 %v6265_v11, 0.0  ;;  %v6268_v63 = vpop.f32.mrb[36].mxu1  ;;  %v6473_v33 = vmax.f32 %v6180_v34, 0.0 }
 0x503   : > { %v6185_v41 = vpop.f32.mrb[38].mxu0  ;;  %8937 = vmatprep.subr.bf16.mxu0 %v8936_v53  ;;  %v6270_v19 = vpop.f32.mrb[37].mxu1  ;;  %v8946_v1 = vpack.c.bf16 %v6467_v10, %v6459_v18  ;;  %v6269_v51 = vadd.f32 %v6268_v63, %v12695_v38  ;;  %v6474_v61 = vmax.f32 %v6182_v14, 0.0 }
 0x504   : > { %v6187_v56 = vpop.f32.mrb[39].mxu0  ;;  %8939 = vmatpush1.bf16.msra.mxu0 %v8938_v9  ;;  %v6186_v42 = vadd.f32 %v6185_v41, %v12700_v17  ;;  %v8944_v35 = vpack.c.bf16 %v6468_v50, %v6460_v13  ;;  %v6271_v31 = vadd.f32 %v6270_v19, %v12695_v38 }
 0x505   : > { %v6188_v46 = vadd.f32 %v6187_v56, %v12700_v17  ;;  %v6475_v30 = vmax.f32 %v6269_v51, 0.0 }
 0x506   : > { %v6481_v5 = vmax.f32 %v6186_v42, 0.0  ;;  %v6274_v15 = vpop.f32.mrb[38].mxu1  ;;  %8945 = vmatprep.subr.bf16.mxu1 %v8944_v35  ;;  %v6476_v22 = vmax.f32 %v6271_v31, 0.0 }
 0x507   : > { %v6482_v47 = vmax.f32 %v6188_v46, 0.0  ;;  %v6276_v26 = vpop.f32.mrb[39].mxu1  ;;  %8947 = vmatpush1.bf16.msra.mxu1 %v8946_v1  ;;  %v6275_v55 = vadd.f32 %v6274_v15, %v12700_v17 }
 0x508   : > { %v8942_v12 = vpack.c.bf16 %v6481_v5, %v6473_v33  ;;  %v6277_v37 = vadd.f32 %v6276_v26, %v12700_v17 }
 0x509   : > { %v8940_v20 = vpack.c.bf16 %v6482_v47, %v6474_v61  ;;  %v6483_v39 = vmax.f32 %v6275_v55, 0.0 }
 0x50a   : > { %v6484_v16 = vmax.f32 %v6277_v37, 0.0 }
 0x50b   : > { %8941 = vmatprep.subr.bf16.mxu0 %v8940_v20  ;;  %v8950_v29 = vpack.c.bf16 %v6483_v39, %v6475_v30 }
 0x50c   : > { %8943 = vmatpush1.bf16.msra.mxu0 %v8942_v12  ;;  %v8948_v59 = vpack.c.bf16 %v6484_v16, %v6476_v22 }
 0x50e   : > { %8949 = vmatprep.subr.bf16.mxu1 %v8948_v59 }
 0x50f   : > { %8158 = vmatmul.mubr.msk.f32.vlgmr.msra.gmra.mrb[48].mxu0 %vm5299_vm11, %v12712_v54  ;;  %8951 = vmatpush1.bf16.msra.mxu1 %v8950_v29 }
 0x510   : > { %6591 = vmatprep.mubr.f32.mxu0 %v13306_v52 }
 0x512   : > { %v6345_v8 = vpop.f32.mrb[40].mxu0  ;;  %8162 = vmatmul.mubr.msk.f32.vlgmr.msra.gmra.mrb[48].mxu1 %vm5299_vm11, %v12712_v54 }
 0x513   : > { %8159 = vmatmul.mubr.msk.f32.gmra.mrb[50].mxu0 %vm5299_vm11, %v12720_v27  ;;  %v6347_v49 = vpop.f32.mrb[41].mxu0  ;;  %6680 = vmatprep.mubr.f32.mxu1 %v13306_v52  ;;  %v6346_v44 = vadd.f32 %v6345_v8, %v12685_v25 }
 0x514   : > { %6597 = vmatprep.mubr.f32.mxu0 %v13306_v52  ;;  %v6348_v48 = vadd.f32 %v6347_v49, %v12685_v25 }
 0x515   : > { %v6434_v23 = vpop.f32.mrb[40].mxu1  ;;  %v6461_v9 = vmax.f32 %v6346_v44, 0.0 }
 0x516   : > { %v6436_v0 = vpop.f32.mrb[41].mxu1  ;;  %v6351_v43 = vpop.f32.mrb[42].mxu0  ;;  %8163 = vmatmul.mubr.msk.f32.gmra.mrb[50].mxu1 %vm5299_vm11, %v12720_v27  ;;  %v6435_v24 = vadd.f32 %v6434_v23, %v12685_v25  ;;  %v6462_v53 = vmax.f32 %v6348_v48, 0.0 }
 0x517   : > { %8160 = vmatmul.mubr.msk.f32.gmra.mrb[52].mxu0 %vm5299_vm11, %v12731_v7  ;;  %v6352_v62 = vadd.f32 %v6351_v43, %v12687_v2  ;;  %v6353_v6 = vpop.f32.mrb[43].mxu0  ;;  %6686 = vmatprep.mubr.f32.mxu1 %v13306_v52  ;;  %v6437_v40 = vadd.f32 %v6436_v0, %v12685_v25  ;;  %v12799_v43 = vpop.permute.xlu0 %6498 }
 0x518   : > { %6603 = vmatprep.mubr.f32.mxu0 %v13306_v52  ;;  %v6354_v58 = vadd.f32 %v6353_v6, %v12687_v2  ;;  %v6463_v25 = vmax.f32 %v6435_v24, 0.0 }
 0x519   : > { %v6469_v18 = vmax.f32 %v6352_v62, 0.0  ;;  %v6440_v34 = vpop.f32.mrb[42].mxu1  ;;  %v6464_v1 = vmax.f32 %v6437_v40, 0.0 }
 0x51a   : > { %v6441_v11 = vadd.f32 %v6440_v34, %v12687_v2  ;;  %v6470_v13 = vmax.f32 %v6354_v58, 0.0  ;;  %v6442_v14 = vpop.f32.mrb[43].mxu1  ;;  %v6357_v10 = vpop.f32.mrb[44].mxu0  ;;  %8164 = vmatmul.mubr.msk.f32.gmra.mrb[52].mxu1 %vm5299_vm11, %v12731_v7 }
 0x51b   : > { %8161 = vmatmul.mubr.msk.f32.gmra.mrb[54].mxu0 %vm5299_vm11, %v12745_v45  ;;  %v8954_v50 = vpack.c.bf16 %v6469_v18, %v6461_v9  ;;  %v6443_v63 = vadd.f32 %v6442_v14, %v12687_v2  ;;  %v6359_v41 = vpop.f32.mrb[45].mxu0  ;;  %6692 = vmatprep.mubr.f32.mxu1 %v13306_v52  ;;  %v6358_v33 = vadd.f32 %v6357_v10, %v12695_v38 }
 0x51c   : > { %v6471_v19 = vmax.f32 %v6441_v11, 0.0  ;;  %v8952_v56 = vpack.c.bf16 %v6470_v13, %v6462_v53  ;;  %6763 = vmatprep.mubr.f32.mxu0 %v13306_v52  ;;  %v6360_v46 = vadd.f32 %v6359_v41, %v12695_v38 }
 0x51d   : > { %v6472_v42 = vmax.f32 %v6443_v63, 0.0  ;;  %v6446_v51 = vpop.f32.mrb[44].mxu1  ;;  %v6477_v12 = vmax.f32 %v6358_v33, 0.0  ;;  %v13309_v33 = vld [vmem:[#allocation23_spill] sm:$0xff] }
 0x51e   : > { %v8962_v35 = vpack.c.bf16 %v6471_v19, %v6463_v25  ;;  %v6448_v61 = vpop.f32.mrb[45].mxu1  ;;  %v6363_v31 = vpop.f32.mrb[46].mxu0  ;;  %8953 = vmatprep.subr.bf16.mxu0 %v8952_v56  ;;  %8165 = vmatmul.mubr.msk.f32.gmra.mrb[54].mxu1 %vm5299_vm11, %v12745_v45  ;;  %v6447_v47 = vadd.f32 %v6446_v51, %v12695_v38  ;;  %v6478_v37 = vmax.f32 %v6360_v46, 0.0  ;;  %v13307_v56 = vld [vmem:[#allocation24_spill] sm:$0xff] }
 0x51f   : > { %v8960_v2 = vpack.c.bf16 %v6472_v42, %v6464_v1  ;;  %v6364_v5 = vadd.f32 %v6363_v31, %v12700_v17  ;;  %v6365_v15 = vpop.f32.mrb[47].mxu0  ;;  %8955 = vmatpush1.bf16.msra.mxu0 %v8954_v50  ;;  %6852 = vmatprep.mubr.f32.mxu1 %v13306_v52  ;;  %v6449_v55 = vadd.f32 %v6448_v61, %v12695_v38  ;;  %v13308_v1 = vld [vmem:[#allocation14_spill] sm:$0xff] }
 0x520   : > { %v6366_v26 = vadd.f32 %v6365_v15, %v12700_v17  ;;  %v6479_v8 = vmax.f32 %v6447_v47, 0.0 }
 0x521   : > { %v6485_v30 = vmax.f32 %v6364_v5, 0.0  ;;  %v6452_v20 = vpop.f32.mrb[46].mxu1  ;;  %8961 = vmatprep.subr.bf16.mxu1 %v8960_v2  ;;  %v6480_v23 = vmax.f32 %v6449_v55, 0.0  ;;  %v13311_v55 = vld [vmem:[#allocation5_spill] sm:$0xff] }
 0x522   : > { %v6453_v22 = vadd.f32 %v6452_v20, %v12700_v17  ;;  %v6486_v39 = vmax.f32 %v6366_v26, 0.0  ;;  %v6454_v16 = vpop.f32.mrb[47].mxu1  ;;  %8963 = vmatpush1.bf16.msra.mxu1 %v8962_v35 }
 0x523   : > { %v8958_v29 = vpack.c.bf16 %v6485_v30, %v6477_v12  ;;  %v6455_v59 = vadd.f32 %v6454_v16, %v12700_v17  ;;  %v9357_v17 = vmov 5  }
 0x524   : > { %v6487_v49 = vmax.f32 %v6453_v22, 0.0  ;;  %v8956_v44 = vpack.c.bf16 %v6486_v39, %v6478_v37  ;;  %9162 = vset.pattern.permute.xlu1 %v9357_v17  ;;  %9161 = vset.pattern.permute.xlu0 %v9357_v17  ;;  %v13312_v37 = vld [vmem:[#allocation6_spill] sm:$0xff]  ;;  %v13313_v39 = vld [vmem:[#allocation17_spill] sm:$0xff] }
 0x525   : > { %v6488_v48 = vmax.f32 %v6455_v59, 0.0  ;;  %6918 = vperm.xlu1 %9162, %v12670_v4   ;;  %6914 = vperm.xlu0 %9161, %v12664_v28   ;;  %v13315_v17 = vld [vmem:[#allocation25_spill] sm:$0xff] }
 0x526   : > { %v8966_v0 = vpack.c.bf16 %v6487_v49, %v6479_v8  ;;  %8957 = vmatprep.subr.bf16.mxu0 %v8956_v44  ;;  %v13314_v8 = vld [vmem:[#allocation32_spill] sm:$0xff] }
 0x527   : > { %v8964_v38 = vpack.c.bf16 %v6488_v48, %v6480_v23  ;;  %8959 = vmatpush1.bf16.msra.mxu0 %v8958_v29 }
 0x529   : > { %8965 = vmatprep.subr.bf16.mxu1 %v8964_v38  ;;  %6922 = vperm.xlu1 %9162, %v12676_v57  }
 0x52a   : > { %8967 = vmatpush1.bf16.msra.mxu1 %v8966_v0  ;;  %8166 = vmatmul.mubr.msk.f32.vlgmr.msra.gmra.mrb[56].mxu0 %vm5299_vm11, %v12712_v54 }
 0x52b   : > { %6769 = vmatprep.mubr.f32.mxu0 %v13306_v52  ;;  %6926 = vperm.xlu0 %9161, %v12682_v36  }
 0x52d   : > { %8170 = vmatmul.mubr.msk.f32.vlgmr.msra.gmra.mrb[56].mxu1 %vm5299_vm11, %v12712_v54  ;;  %v12797_v54 = vpop.permute.xlu1 %6494 }
 0x52e   : > { %6858 = vmatprep.mubr.f32.mxu1 %v13306_v52  ;;  %8167 = vmatmul.mubr.msk.f32.gmra.mrb[58].mxu0 %vm5299_vm11, %v12720_v27 }
 0x52f   : > { %6775 = vmatprep.mubr.f32.mxu0 %v13306_v52 }
 0x531   : > { %8171 = vmatmul.mubr.msk.f32.gmra.mrb[58].mxu1 %vm5299_vm11, %v12720_v27  ;;  %v12802_v6 = vpop.permute.xlu1 %6502 }
 0x532   : > { %6864 = vmatprep.mubr.f32.mxu1 %v13306_v52  ;;  %8168 = vmatmul.mubr.msk.f32.gmra.mrb[60].mxu0 %vm5299_vm11, %v12731_v7 }
 0x533   : > { %6781 = vmatprep.mubr.f32.mxu0 %v13306_v52 }
 0x535   : > { %8172 = vmatmul.mubr.msk.f32.gmra.mrb[60].mxu1 %vm5299_vm11, %v12731_v7 }
 0x536   : > { %6870 = vmatprep.mubr.f32.mxu1 %v13306_v52  ;;  %8169 = vmatmul.mubr.msk.f32.gmra.mrb[62].mxu0 %vm5299_vm11, %v12745_v45 }
 0x537   : > { %7005 = vmatprep.mubr.f32.mxu0 %v13306_v52 }
 0x539   : > { %8173 = vmatmul.mubr.msk.f32.gmra.mrb[62].mxu1 %vm5299_vm11, %v12745_v45 }
 0x53a   : > { %7094 = vmatprep.mubr.f32.mxu1 %v13306_v52 }
 0x5e2   : > { %v6587_v27 = vpop.f32.mrb[48].mxu0 }
 0x5e3   : > { %v6589_v7 = vpop.f32.mrb[49].mxu0  ;;  %v6588_v62 = vadd.f32 %v6587_v27, %v12797_v54 }
 0x5e4   : > { %v6590_v24 = vadd.f32 %v6589_v7, %v12797_v54  ;;  %v13316_v7 = vld [vmem:[#allocation10_spill] sm:$0xff] }
 0x5e5   : > { %v6676_v45 = vpop.f32.mrb[48].mxu1  ;;  %v6877_v9 = vadd.f32 %v6588_v62, %v12153_v60  ;;  %v12815_v60 = vpop.permute.xlu1 %6506 }
 0x5e6   : > { %v6593_v4 = vpop.f32.mrb[50].mxu0  ;;  %v6678_v58 = vpop.f32.mrb[49].mxu1  ;;  %v6677_v40 = vadd.f32 %v6676_v45, %v12797_v54  ;;  %v6878_v34 = vadd.f32 %v6590_v24, %v12157_v21  ;;  %v13317_v45 = vld [vmem:[#allocation27_spill] sm:$0xff] }
 0x5e7   : > { %v6594_v28 = vadd.f32 %v6593_v4, %v12799_v43  ;;  %v6595_v57 = vpop.f32.mrb[51].mxu0  ;;  %v6679_v53 = vadd.f32 %v6678_v58, %v12797_v54  ;;  %v13318_v4 = vld [vmem:[#allocation18_spill] sm:$0xff] }
 0x5e8   : > { %v6596_v36 = vadd.f32 %v6595_v57, %v12799_v43  ;;  %v12840_v57 = vld [vmem:[%s13048_s2 + $0x80] sm:$0xff] }
 0x5e9   : > { %v6885_v18 = vadd.f32 %v6594_v28, %v12161_v32  ;;  %v6682_v11 = vpop.f32.mrb[50].mxu1  ;;  %v6879_v32 = vadd.f32 %v6677_v40, %v13307_v56  ;;  %v6880_v51 = vadd.f32 %v6679_v53, %v13309_v33  ;;  %v13319_v56 = vld [vmem:[#allocation12_spill] sm:$0xff] }
 0x5ea   : > { %v6886_v13 = vadd.f32 %v6596_v36, %v12163_v3  ;;  %v6599_v14 = vpop.f32.mrb[52].mxu0  ;;  %v6683_v50 = vadd.f32 %v6682_v11, %v12799_v43  ;;  %v6684_v63 = vpop.f32.mrb[51].mxu1  ;;  %v13310_v3 = vld [vmem:[#allocation16_spill] sm:$0xff] }
 0x5eb   : > { %v8970_v10 = vpack.c.bf16 %v6885_v18, %v6877_v9  ;;  %v6601_v41 = vpop.f32.mrb[53].mxu0  ;;  %v6685_v25 = vadd.f32 %v6684_v63, %v12799_v43  ;;  %v6600_v42 = vadd.f32 %v6599_v14, %v12802_v6  ;;  %v12848_v9 = vld [vmem:[%s13048_s2 + $0x88] sm:$0xff] }
 0x5ec   : > { %v8968_v19 = vpack.c.bf16 %v6886_v13, %v6878_v34  ;;  %v6887_v21 = vadd.f32 %v6683_v50, %v13308_v1  ;;  %v6602_v61 = vadd.f32 %v6601_v41, %v12802_v6  ;;  %v12859_v34 = vld [vmem:[%s13048_s2 + $0x90] sm:$0xff] }
 0x5ed   : > { %v6888_v35 = vadd.f32 %v6685_v25, %v13310_v3  ;;  %v6688_v46 = vpop.f32.mrb[52].mxu1  ;;  %v6893_v30 = vadd.f32 %v6600_v42, %v13311_v55 }
 0x5ee   : > { %v6605_v31 = vpop.f32.mrb[54].mxu0  ;;  %8969 = vmatprep.subr.bf16.mxu0 %v8968_v19  ;;  %v8978_v2 = vpack.c.bf16 %v6887_v21, %v6879_v32  ;;  %v6690_v5 = vpop.f32.mrb[53].mxu1  ;;  %v6689_v20 = vadd.f32 %v6688_v46, %v12802_v6  ;;  %v6894_v16 = vadd.f32 %v6602_v61, %v13313_v39  ;;  %v12875_v19 = vld [vmem:[%s13048_s2 + $0x98] sm:$0xff]  ;;  %v13322_v46 = vld [vmem:[#allocation11_spill] sm:$0xff] }
 0x5ef   : > { %v6606_v15 = vadd.f32 %v6605_v31, %v12815_v60  ;;  %v6607_v47 = vpop.f32.mrb[55].mxu0  ;;  %8971 = vmatpush1.bf16.msra.mxu0 %v8970_v10  ;;  %v8976_v26 = vpack.c.bf16 %v6888_v35, %v6880_v51  ;;  %v6691_v29 = vadd.f32 %v6690_v5, %v12802_v6  ;;  %v13320_v21 = vld [vmem:[#allocation20_spill] sm:$0xff]  ;;  %v13321_v51 = vld [vmem:[#allocation9_spill] sm:$0xff] }
 0x5f0   : > { %v6608_v12 = vadd.f32 %v6607_v47, %v12815_v60  ;;  %v6895_v27 = vadd.f32 %v6689_v20, %v13315_v17  ;;  %v13325_v20 = vld [vmem:[#allocation26_spill] sm:$0xff]  ;;  %v13327_v17 = vld [vmem:[#allocation13_spill] sm:$0xff] }
 0x5f1   : > { %v6901_v22 = vadd.f32 %v6606_v15, %v13312_v37  ;;  %v6694_v59 = vpop.f32.mrb[54].mxu1  ;;  %8977 = vmatprep.subr.bf16.mxu1 %v8976_v26  ;;  %v6896_v24 = vadd.f32 %v6691_v29, %v13317_v45 }
 0x5f2   : > { %v6902_v49 = vadd.f32 %v6608_v12, %v13314_v8  ;;  %v6695_v23 = vadd.f32 %v6694_v59, %v12815_v60  ;;  %v6696_v48 = vpop.f32.mrb[55].mxu1  ;;  %8979 = vmatpush1.bf16.msra.mxu1 %v8978_v2  ;;  %v13324_v12 = vld [vmem:[#allocation15_spill] sm:$0xff] }
 0x5f3   : > { %v8974_v44 = vpack.c.bf16 %v6901_v22, %v6893_v30  ;;  %v6697_v0 = vadd.f32 %v6696_v48, %v12815_v60  ;;  %v13326_v22 = vld [vmem:[#allocation19_spill] sm:$0xff] }
 0x5f4   : > { %v8972_v38 = vpack.c.bf16 %v6902_v49, %v6894_v16  ;;  %v6903_v62 = vadd.f32 %v6695_v23, %v13316_v7 }
 0x5f5   : > { %v6904_v58 = vadd.f32 %v6697_v0, %v13318_v4  ;;  %v13329_v4 = vld [vmem:[#allocation35_spill] sm:$0xff] }
 0x5f6   : > { %8973 = vmatprep.subr.bf16.mxu0 %v8972_v38  ;;  %v8982_v28 = vpack.c.bf16 %v6903_v62, %v6895_v27  ;;  %v13328_v62 = vld [vmem:[#allocation38_spill] sm:$0xff] }
 0x5f7   : > { %8975 = vmatpush1.bf16.msra.mxu0 %v8974_v44  ;;  %v8980_v36 = vpack.c.bf16 %v6904_v58, %v6896_v24 }
 0x5f9   : > { %8981 = vmatprep.subr.bf16.mxu1 %v8980_v36  ;;  %v13330_v36 = vld [vmem:[#allocation41_spill] sm:$0xff] }
 0x5fa   : > { %8174 = vmatmul.mubr.msk.f32.vlgmr.msra.gmra.mrb[64].mxu0 %vm5299_vm11, %v12840_v57  ;;  %8983 = vmatpush1.bf16.msra.mxu1 %v8982_v28 }
 0x5fb   : > { %7011 = vmatprep.mubr.f32.mxu0 %v13306_v52 }
 0x5fd   : > { %v6765_v40 = vpop.f32.mrb[56].mxu0  ;;  %8178 = vmatmul.mubr.msk.f32.vlgmr.msra.gmra.mrb[64].mxu1 %vm5299_vm11, %v12840_v57 }
 0x5fe   : > { %v6767_v18 = vpop.f32.mrb[57].mxu0  ;;  %8175 = vmatmul.mubr.msk.f32.gmra.mrb[66].mxu0 %vm5299_vm11, %v12848_v9  ;;  %7100 = vmatprep.mubr.f32.mxu1 %v13306_v52  ;;  %v6766_v53 = vadd.f32 %v6765_v40, %v12797_v54 }
 0x5ff   : > { %7017 = vmatprep.mubr.f32.mxu0 %v13306_v52  ;;  %v6768_v13 = vadd.f32 %v6767_v18, %v12797_v54 }
 0x600   : > { %v6854_v11 = vpop.f32.mrb[56].mxu1  ;;  %v6881_v32 = vadd.f32 %v6766_v53, %v13319_v56 }
 0x601   : > { %v6856_v14 = vpop.f32.mrb[57].mxu1  ;;  %v6771_v10 = vpop.f32.mrb[58].mxu0  ;;  %8179 = vmatmul.mubr.msk.f32.gmra.mrb[66].mxu1 %vm5299_vm11, %v12848_v9  ;;  %v6855_v41 = vadd.f32 %v6854_v11, %v12797_v54  ;;  %v6882_v3 = vadd.f32 %v6768_v13, %v13321_v51  ;;  %v13331_v13 = vld [vmem:[#allocation22_spill] sm:$0xff] }
 0x602   : > { %v6772_v50 = vadd.f32 %v6771_v10, %v12799_v43  ;;  %v6773_v63 = vpop.f32.mrb[59].mxu0  ;;  %8176 = vmatmul.mubr.msk.f32.gmra.mrb[68].mxu0 %vm5299_vm11, %v12859_v34  ;;  %7106 = vmatprep.mubr.f32.mxu1 %v13306_v52  ;;  %v6857_v1 = vadd.f32 %v6856_v14, %v12797_v54  ;;  %v13323_v54 = vld [vmem:[#allocation21_spill] sm:$0xff]  ;;  %v13332_v10 = vld [vmem:[#allocation40_spill] sm:$0xff] }
 0x603   : > { %v6774_v25 = vadd.f32 %v6773_v63, %v12799_v43  ;;  %7023 = vmatprep.mubr.f32.mxu0 %v13306_v52  ;;  %v6883_v26 = vadd.f32 %v6855_v41, %v13323_v54  ;;  %v13333_v63 = vld [vmem:[#allocation37_spill] sm:$0xff] }
 0x604   : > { %v6889_v42 = vadd.f32 %v6772_v50, %v13320_v21  ;;  %v6860_v33 = vpop.f32.mrb[58].mxu1  ;;  %v6884_v37 = vadd.f32 %v6857_v1, %v13325_v20 }
 0x605   : > { %v6861_v35 = vadd.f32 %v6860_v33, %v12799_v43  ;;  %v6890_v61 = vadd.f32 %v6774_v25, %v13322_v46  ;;  %v6862_v31 = vpop.f32.mrb[59].mxu1  ;;  %v6777_v2 = vpop.f32.mrb[60].mxu0  ;;  %8180 = vmatmul.mubr.msk.f32.gmra.mrb[68].mxu1 %vm5299_vm11, %v12859_v34  ;;  %v13334_v25 = vld [vmem:[#allocation7_spill] sm:$0xff] }
 0x606   : > { %v8986_v5 = vpack.c.bf16 %v6889_v42, %v6881_v32  ;;  %v6863_v15 = vadd.f32 %v6862_v31, %v12799_v43  ;;  %v6779_v47 = vpop.f32.mrb[61].mxu0  ;;  %8177 = vmatmul.mubr.msk.f32.gmra.mrb[70].mxu0 %vm5299_vm11, %v12875_v19  ;;  %7112 = vmatprep.mubr.f32.mxu1 %v13306_v52  ;;  %v6778_v39 = vadd.f32 %v6777_v2, %v12802_v6  ;;  %v12943_v33 = vpop.permute.xlu1 %6918 }
 0x607   : > { %v6891_v55 = vadd.f32 %v6861_v35, %v13324_v12  ;;  %v8984_v30 = vpack.c.bf16 %v6890_v61, %v6882_v3  ;;  %7183 = vmatprep.mubr.f32.mxu0 %v13306_v52  ;;  %v6780_v59 = vadd.f32 %v6779_v47, %v12802_v6 }
 0x608   : > { %v6892_v43 = vadd.f32 %v6863_v15, %v13326_v22  ;;  %v6866_v16 = vpop.f32.mrb[60].mxu1  ;;  %v6897_v27 = vadd.f32 %v6778_v39, %v13327_v17 }
 0x609   : > { %v8994_v29 = vpack.c.bf16 %v6891_v55, %v6883_v26  ;;  %v6868_v8 = vpop.f32.mrb[61].mxu1  ;;  %v6783_v49 = vpop.f32.mrb[62].mxu0  ;;  %8985 = vmatprep.subr.bf16.mxu0 %v8984_v30  ;;  %8181 = vmatmul.mubr.msk.f32.gmra.mrb[70].mxu1 %vm5299_vm11, %v12875_v19  ;;  %v6867_v0 = vadd.f32 %v6866_v16, %v12802_v6  ;;  %v6898_v58 = vadd.f32 %v6780_v59, %v13329_v4 }
 0x60a   : > { %v6784_v44 = vadd.f32 %v6783_v49, %v12815_v60  ;;  %v8992_v23 = vpack.c.bf16 %v6892_v43, %v6884_v37  ;;  %v6785_v48 = vpop.f32.mrb[63].mxu0  ;;  %8987 = vmatpush1.bf16.msra.mxu0 %v8986_v5  ;;  %7272 = vmatprep.mubr.f32.mxu1 %v13306_v52  ;;  %v6869_v7 = vadd.f32 %v6868_v8, %v12802_v6  ;;  %v12950_v54 = vpop.permute.xlu1 %6922 }
 0x60b   : > { %v6786_v38 = vadd.f32 %v6785_v48, %v12815_v60  ;;  %v6899_v14 = vadd.f32 %v6867_v0, %v13331_v13 }
 0x60c   : > { %v6905_v45 = vadd.f32 %v6784_v44, %v13328_v62  ;;  %v6872_v24 = vpop.f32.mrb[62].mxu1  ;;  %8993 = vmatprep.subr.bf16.mxu1 %v8992_v23  ;;  %v6900_v41 = vadd.f32 %v6869_v7, %v13333_v63 }
 0x60d   : > { %v6873_v28 = vadd.f32 %v6872_v24, %v12815_v60  ;;  %v6906_v40 = vadd.f32 %v6786_v38, %v13330_v36  ;;  %v6874_v18 = vpop.f32.mrb[63].mxu1  ;;  %8995 = vmatpush1.bf16.msra.mxu1 %v8994_v29 }
 0x60e   : > { %v8990_v53 = vpack.c.bf16 %v6905_v45, %v6897_v27  ;;  %v6875_v11 = vadd.f32 %v6874_v18, %v12815_v60  ;;  %v7330_v60 = vld [vmem:[%s13049_s3] sm:$0xff] }
 0x60f   : > { %v6907_v50 = vadd.f32 %v6873_v28, %v13332_v10  ;;  %v8988_v6 = vpack.c.bf16 %v6906_v40, %v6898_v58 }
 0x610   : > { %v6908_v56 = vadd.f32 %v6875_v11, %v13334_v25 }
 0x611   : > { %v8998_v32 = vpack.c.bf16 %v6907_v50, %v6899_v14  ;;  %8989 = vmatprep.subr.bf16.mxu0 %v8988_v6 }
 0x612   : > { %v8996_v1 = vpack.c.bf16 %v6908_v56, %v6900_v41  ;;  %8991 = vmatpush1.bf16.msra.mxu0 %v8990_v53 }
 0x614   : > { %8997 = vmatprep.subr.bf16.mxu1 %v8996_v1 }
 0x615   : > { %8999 = vmatpush1.bf16.msra.mxu1 %v8998_v32  ;;  %8182 = vmatmul.mubr.msk.f32.vlgmr.msra.gmra.mrb[72].mxu0 %vm5299_vm11, %v12840_v57  ;;  %v12967_v32 = vld [vmem:[%s13048_s2 + $0xa0] sm:$0xff] }
 0x616   : > { %7189 = vmatprep.mubr.f32.mxu0 %v13306_v52 }
 0x618   : > { %8186 = vmatmul.mubr.msk.f32.vlgmr.msra.gmra.mrb[72].mxu1 %vm5299_vm11, %v12840_v57  ;;  %v9358_v57 = vmov 6  }
 0x619   : > { %7278 = vmatprep.mubr.f32.mxu1 %v13306_v52  ;;  %8183 = vmatmul.mubr.msk.f32.gmra.mrb[74].mxu0 %vm5299_vm11, %v12848_v9 }
 0x61a   : > { %7195 = vmatprep.mubr.f32.mxu0 %v13306_v52  ;;  %9163 = vset.pattern.permute.xlu1 %v9358_v57 }
 0x61b   : > { %9164 = vset.pattern.permute.xlu0 %v9358_v57  ;;  %7333 = vperm.xlu1 %9163, %v7330_v60  }
 0x61c   : > { %8187 = vmatmul.mubr.msk.f32.gmra.mrb[74].mxu1 %vm5299_vm11, %v12848_v9  ;;  %v12940_v9 = vpop.permute.xlu0 %6914 }
 0x61d   : > { %7284 = vmatprep.mubr.f32.mxu1 %v13306_v52  ;;  %8184 = vmatmul.mubr.msk.f32.gmra.mrb[76].mxu0 %vm5299_vm11, %v12859_v34 }
 0x61e   : > { %7201 = vmatprep.mubr.f32.mxu0 %v13306_v52 }
 0x620   : > { %8188 = vmatmul.mubr.msk.f32.gmra.mrb[76].mxu1 %vm5299_vm11, %v12859_v34  ;;  %v12955_v49 = vpop.permute.xlu0 %6926 }
 0x621   : > { %7290 = vmatprep.mubr.f32.mxu1 %v13306_v52  ;;  %8185 = vmatmul.mubr.msk.f32.gmra.mrb[78].mxu0 %vm5299_vm11, %v12875_v19 }
 0x622   : > { %7403 = vmatprep.mubr.f32.mxu0 %v13306_v52 }
 0x624   : > { %8189 = vmatmul.mubr.msk.f32.gmra.mrb[78].mxu1 %vm5299_vm11, %v12875_v19 }
 0x625   : > { %7474 = vmatprep.mubr.f32.mxu1 %v13306_v52 }
 0x6cd   : > { %v7007_v34 = vpop.f32.mrb[64].mxu0 }
 0x6ce   : > { %v7009_v21 = vpop.f32.mrb[65].mxu0  ;;  %v7008_v42 = vadd.f32 %v7007_v34, %v12940_v9 }
 0x6cf   : > { %v7010_v19 = vadd.f32 %v7009_v21, %v12940_v9 }
 0x6d0   : > { %v7096_v51 = vpop.f32.mrb[64].mxu1  ;;  %v7297_v31 = vmax.f32 %v7008_v42, 0.0 }
 0x6d1   : > { %v7013_v3 = vpop.f32.mrb[66].mxu0  ;;  %v7098_v35 = vpop.f32.mrb[65].mxu1  ;;  %v7097_v2 = vadd.f32 %v7096_v51, %v12940_v9  ;;  %v7298_v15 = vmax.f32 %v7010_v19, 0.0 }
 0x6d2   : > { %v7015_v46 = vpop.f32.mrb[67].mxu0  ;;  %v7014_v61 = vadd.f32 %v7013_v3, %v12943_v33  ;;  %v7099_v47 = vadd.f32 %v7098_v35, %v12940_v9 }
 0x6d3   : > { %v7016_v5 = vadd.f32 %v7015_v46, %v12943_v33  ;;  %v7299_v39 = vmax.f32 %v7097_v2, 0.0 }
 0x6d4   : > { %v7305_v26 = vmax.f32 %v7014_v61, 0.0  ;;  %v7102_v12 = vpop.f32.mrb[66].mxu1  ;;  %v7300_v8 = vmax.f32 %v7099_v47, 0.0 }
 0x6d5   : > { %v7306_v55 = vmax.f32 %v7016_v5, 0.0  ;;  %v7019_v30 = vpop.f32.mrb[68].mxu0  ;;  %v7104_v20 = vpop.f32.mrb[67].mxu1  ;;  %v7103_v43 = vadd.f32 %v7102_v12, %v12943_v33 }
 0x6d6   : > { %v7021_v37 = vpop.f32.mrb[69].mxu0  ;;  %v9002_v22 = vpack.c.bf16 %v7305_v26, %v7297_v31  ;;  %v7020_v16 = vadd.f32 %v7019_v30, %v12950_v54  ;;  %v7105_v59 = vadd.f32 %v7104_v20, %v12943_v33 }
 0x6d7   : > { %v9000_v29 = vpack.c.bf16 %v7306_v55, %v7298_v15  ;;  %v7022_v44 = vadd.f32 %v7021_v37, %v12950_v54  ;;  %v7307_v23 = vmax.f32 %v7103_v43, 0.0 }
 0x6d8   : > { %v7308_v48 = vmax.f32 %v7105_v59, 0.0  ;;  %v7108_v0 = vpop.f32.mrb[68].mxu1  ;;  %v7313_v45 = vmax.f32 %v7020_v16, 0.0 }
 0x6d9   : > { %v7025_v38 = vpop.f32.mrb[70].mxu0  ;;  %9001 = vmatprep.subr.bf16.mxu0 %v9000_v29  ;;  %v7110_v17 = vpop.f32.mrb[69].mxu1  ;;  %v9010_v7 = vpack.c.bf16 %v7307_v23, %v7299_v39  ;;  %v7109_v24 = vadd.f32 %v7108_v0, %v12950_v54  ;;  %v7314_v28 = vmax.f32 %v7022_v44, 0.0 }
 0x6da   : > { %v7027_v27 = vpop.f32.mrb[71].mxu0  ;;  %9003 = vmatpush1.bf16.msra.mxu0 %v9002_v22  ;;  %v7026_v62 = vadd.f32 %v7025_v38, %v12955_v49  ;;  %v9008_v4 = vpack.c.bf16 %v7308_v48, %v7300_v8  ;;  %v7111_v36 = vadd.f32 %v7110_v17, %v12950_v54 }
 0x6db   : > { %v7028_v58 = vadd.f32 %v7027_v27, %v12955_v49  ;;  %v7315_v10 = vmax.f32 %v7109_v24, 0.0 }
 0x6dc   : > { %v7321_v40 = vmax.f32 %v7026_v62, 0.0  ;;  %v7114_v18 = vpop.f32.mrb[70].mxu1  ;;  %9009 = vmatprep.subr.bf16.mxu1 %v9008_v4  ;;  %v7316_v63 = vmax.f32 %v7111_v36, 0.0 }
 0x6dd   : > { %v7322_v53 = vmax.f32 %v7028_v58, 0.0  ;;  %v7116_v11 = vpop.f32.mrb[71].mxu1  ;;  %9011 = vmatpush1.bf16.msra.mxu1 %v9010_v7  ;;  %v7115_v14 = vadd.f32 %v7114_v18, %v12955_v49 }
 0x6de   : > { %v9006_v13 = vpack.c.bf16 %v7321_v40, %v7313_v45  ;;  %v7117_v6 = vadd.f32 %v7116_v11, %v12955_v49 }
 0x6df   : > { %v9004_v50 = vpack.c.bf16 %v7322_v53, %v7314_v28  ;;  %v7323_v41 = vmax.f32 %v7115_v14, 0.0 }
 0x6e0   : > { %v7324_v25 = vmax.f32 %v7117_v6, 0.0 }
 0x6e1   : > { %9005 = vmatprep.subr.bf16.mxu0 %v9004_v50  ;;  %v9014_v56 = vpack.c.bf16 %v7323_v41, %v7315_v10 }
 0x6e2   : > { %9007 = vmatpush1.bf16.msra.mxu0 %v9006_v13  ;;  %v9012_v1 = vpack.c.bf16 %v7324_v25, %v7316_v63 }
 0x6e4   : > { %9013 = vmatprep.subr.bf16.mxu1 %v9012_v1 }
 0x6e5   : > { %8190 = vmatmul.mubr.msk.f32.vlgmr.msra.gmra.mrb[80].mxu0 %vm5299_vm11, %v12967_v32  ;;  %9015 = vmatpush1.bf16.msra.mxu1 %v9014_v56 }
 0x6e6   : > { %7545 = vmatprep.mubr.f32.mxu0 %v13306_v52 }
 0x6e8   : > { %v7185_v60 = vpop.f32.mrb[72].mxu0  ;;  %8191 = vmatmul.mubr.msk.f32.vlgmr.msra.gmra.mrb[80].mxu1 %vm5299_vm11, %v12967_v32 }
 0x6e9   : > { %v7187_v57 = vpop.f32.mrb[73].mxu0  ;;  %7616 = vmatprep.mubr.f32.mxu1 %v13306_v52  ;;  %v7186_v34 = vadd.f32 %v7185_v60, %v12940_v9 }
 0x6ea   : > { %v7188_v42 = vadd.f32 %v7187_v57, %v12940_v9 }
 0x6eb   : > { %v7274_v21 = vpop.f32.mrb[72].mxu1  ;;  %v7301_v31 = vmax.f32 %v7186_v34, 0.0 }
 0x6ec   : > { %v7276_v19 = vpop.f32.mrb[73].mxu1  ;;  %v7191_v51 = vpop.f32.mrb[74].mxu0  ;;  %v7275_v46 = vadd.f32 %v7274_v21, %v12940_v9  ;;  %v7302_v52 = vmax.f32 %v7188_v42, 0.0 }
 0x6ed   : > { %v7192_v3 = vadd.f32 %v7191_v51, %v12943_v33  ;;  %v7193_v35 = vpop.f32.mrb[75].mxu0  ;;  %v7277_v2 = vadd.f32 %v7276_v19, %v12940_v9 }
 0x6ee   : > { %v7194_v61 = vadd.f32 %v7193_v35, %v12943_v33  ;;  %v7303_v22 = vmax.f32 %v7275_v46, 0.0 }
 0x6ef   : > { %v7309_v5 = vmax.f32 %v7192_v3, 0.0  ;;  %v7280_v15 = vpop.f32.mrb[74].mxu1  ;;  %v7304_v16 = vmax.f32 %v7277_v2, 0.0 }
 0x6f0   : > { %v7281_v47 = vadd.f32 %v7280_v15, %v12943_v33  ;;  %v7310_v26 = vmax.f32 %v7194_v61, 0.0  ;;  %v7282_v12 = vpop.f32.mrb[75].mxu1  ;;  %v7197_v55 = vpop.f32.mrb[76].mxu0 }
 0x6f1   : > { %v9018_v30 = vpack.c.bf16 %v7309_v5, %v7301_v31  ;;  %v7283_v20 = vadd.f32 %v7282_v12, %v12943_v33  ;;  %v7199_v37 = vpop.f32.mrb[77].mxu0  ;;  %v7198_v59 = vadd.f32 %v7197_v55, %v12950_v54 }
 0x6f2   : > { %v7311_v43 = vmax.f32 %v7281_v47, 0.0  ;;  %v9016_v39 = vpack.c.bf16 %v7310_v26, %v7302_v52  ;;  %v7200_v44 = vadd.f32 %v7199_v37, %v12950_v54 }
 0x6f3   : > { %v7312_v29 = vmax.f32 %v7283_v20, 0.0  ;;  %v7286_v9 = vpop.f32.mrb[76].mxu1  ;;  %v7317_v7 = vmax.f32 %v7198_v59, 0.0 }
 0x6f4   : > { %v9026_v8 = vpack.c.bf16 %v7311_v43, %v7303_v22  ;;  %v7288_v23 = vpop.f32.mrb[77].mxu1  ;;  %v7203_v48 = vpop.f32.mrb[78].mxu0  ;;  %9017 = vmatprep.subr.bf16.mxu0 %v9016_v39  ;;  %v7287_v33 = vadd.f32 %v7286_v9, %v12950_v54  ;;  %v7318_v4 = vmax.f32 %v7200_v44, 0.0 }
 0x6f5   : > { %v9024_v0 = vpack.c.bf16 %v7312_v29, %v7304_v16  ;;  %v7204_v38 = vadd.f32 %v7203_v48, %v12955_v49  ;;  %v7205_v17 = vpop.f32.mrb[79].mxu0  ;;  %9019 = vmatpush1.bf16.msra.mxu0 %v9018_v30  ;;  %v7289_v62 = vadd.f32 %v7288_v23, %v12950_v54 }
 0x6f6   : > { %v7206_v27 = vadd.f32 %v7205_v17, %v12955_v49  ;;  %v7319_v53 = vmax.f32 %v7287_v33, 0.0 }
 0x6f7   : > { %v7325_v45 = vmax.f32 %v7204_v38, 0.0  ;;  %v7292_v24 = vpop.f32.mrb[78].mxu1  ;;  %9025 = vmatprep.subr.bf16.mxu1 %v9024_v0  ;;  %v7320_v14 = vmax.f32 %v7289_v62, 0.0 }
 0x6f8   : > { %v7293_v58 = vadd.f32 %v7292_v24, %v12955_v49  ;;  %v7326_v28 = vmax.f32 %v7206_v27, 0.0  ;;  %v7294_v36 = vpop.f32.mrb[79].mxu1  ;;  %9027 = vmatpush1.bf16.msra.mxu1 %v9026_v8 }
 0x6f9   : > { %v9022_v40 = vpack.c.bf16 %v7325_v45, %v7317_v7  ;;  %v7295_v18 = vadd.f32 %v7294_v36, %v12955_v49  ;;  %v7334_v49 = vpop.permute.xlu1 %7333 }
 0x6fa   : > { %v7327_v11 = vmax.f32 %v7293_v58, 0.0  ;;  %v9020_v13 = vpack.c.bf16 %v7326_v28, %v7318_v4 }
 0x6fb   : > { %v7328_v10 = vmax.f32 %v7295_v18, 0.0 }
 0x6fc   : > { %v9030_v54 = vpack.c.bf16 %v7327_v11, %v7319_v53  ;;  %9021 = vmatprep.subr.bf16.mxu0 %v9020_v13 }
 0x6fd   : > { %v9028_v50 = vpack.c.bf16 %v7328_v10, %v7320_v14  ;;  %9023 = vmatpush1.bf16.msra.mxu0 %v9022_v40 }
 0x6ff   : > { %9029 = vmatprep.subr.bf16.mxu1 %v9028_v50 }
 0x700   : > { %9031 = vmatpush1.bf16.msra.mxu1 %v9030_v54  ;;  %8192 = vmatmul.mubr.msk.f32.vlgmr.msra.gmra.mrb[82].mxu0 %vm5299_vm11, %v12967_v32 }
 0x703   : > { %8193 = vmatmul.mubr.msk.f32.vlgmr.msra.gmra.mrb[82].mxu1 %vm5299_vm11, %v12967_v32 }
 0x7b8   : > { %v7405_v6 = vpop.f32.mrb[80].mxu0 }
 0x7b9   : > { %v7406_v63 = vadd.f32 %v7405_v6, %v7334_v49  ;;  %v7407_v41 = vpop.f32.mrb[81].mxu0 }
 0x7ba   : > { %v7408_v25 = vadd.f32 %v7407_v41, %v7334_v49 }
 0x7bb   : > { %7623 = vst [vmem:[%s207_s29] sm:$0xff] %v7406_v63  ;;  %v7476_v56 = vpop.f32.mrb[80].mxu1 }
 0x7bc   : > { %7624 = vst [vmem:[%s207_s29 + $0x8] sm:$0xff] %v7408_v25  ;;  %v7477_v1 = vadd.f32 %v7476_v56, %v7334_v49  ;;  %v7478_v60 = vpop.f32.mrb[81].mxu1 }
 0x7bd   : > { %v7479_v57 = vadd.f32 %v7478_v60, %v7334_v49 }
 0x7be   : > { %7625 = vst [vmem:[%s207_s29 + $0x10] sm:$0xff] %v7477_v1 }
 0x7bf   : > { %7626 = vst [vmem:[%s207_s29 + $0x18] sm:$0xff] %v7479_v57 }
 0x7d3   : > { %v7547_v34 = vpop.f32.mrb[82].mxu0 }
 0x7d4   : > { %v7548_v32 = vadd.f32 %v7547_v34, %v7334_v49  ;;  %v7549_v21 = vpop.f32.mrb[83].mxu0 }
 0x7d5   : > { %v7550_v42 = vadd.f32 %v7549_v21, %v7334_v49 }
 0x7d6   : > { %7627 = vst [vmem:[%s207_s29 + $0x20] sm:$0xff] %v7548_v32  ;;  %v7618_v19 = vpop.f32.mrb[82].mxu1 }
 0x7d7   : > { %v7619_v51 = vadd.f32 %v7618_v19, %v7334_v49  ;;  %7628 = vst [vmem:[%s207_s29 + $0x28] sm:$0xff] %v7550_v42  ;;  %v7620_v3 = vpop.f32.mrb[83].mxu1 }
 0x7d8   : > { %v7621_v35 = vadd.f32 %v7620_v3, %v7334_v49 }
 0x7d9   : > { %7629 = vst [vmem:[%s207_s29 + $0x30] sm:$0xff] %v7619_v51 }
 0x7da   : > { %7630 = vst [vmem:[%s207_s29 + $0x38] sm:$0xff] %v7621_v35 }
 0x7db   : > { %9294 = shalt.err (!%p9291_p3)
}
 0x7dc   : > { %s9295_s13 = scalar_lea.hbm %s13002_s8, 1024  ;;  %s9299_s22 = scalar_lea.hbm %s13050_s4, 2048 }
 0x7dd   : > { %p9296_p4 = scmp.ne.s32.totalorder %s13002_s8, %s9295_s13  ;;  %p9300_p9 = scmp.lt.u32.totalorder %s13002_s8, %s13050_s4 }
 0x7de   : > { %p9301_p10 = scmp.lt.u32.totalorder %s9299_s22, %s9295_s13  ;;  %p9303_p12 = scmp.lt.u32.totalorder %s9295_s13, %s13002_s8 }
 0x7df   : > { %p9297_p7 = pnand %p9296_p4, %p9423_p5 }
 0x7e0   : > { %p9302_p11 = por %p9301_p10, %p9300_p9 }
 0x7e1   : > { %p9298_p8 = pneg %p9297_p7 }
 0x7e2   : > { %p9304_p13 = por %p9303_p12, %p9302_p11 }
 0x7e4   : > { %p9305_p0 = pnand %p9304_p13, %p9298_p8 }
 0x7e6   : > { %9308 = shalt.err (!%p9305_p0)
}
 0x7e7   : > { %9096 = dma.vmem_to_hbm [thread:$0]  (%p9423_p5), %s13004_s5, 1024, %s13002_s8, %s7632_s19  }
 0x7e8 PF: > { %p9102_p1 = scmp.ge.s32.totalorder %s9343_s18, 2  ;;  %s7658_s28 = sand.u32 1, %s9331_s15  }
 0x7e9   : > { %s7659_s29 = scalar_lea.sflag [#allocation3], %s7658_s28 }
 0x7ea   : > { %p9099_p2 = pnand %p9102_p1, %p9427_p6 }
 0x7ec   : > { %9326 = dma.done.wait (!%p9099_p2), %s7659_s29, 1024  }
 0x7ed   : > { %9328 = vsyncadd (!%p9099_p2), %s7659_s29, 4294966272  ;;  %p14_p3 = scmp.ge.s32.totalorder %s9410_s21, 4   ;;  %s13335_s15 = smov %s9335_s16 }
 0x7ee   : > { %s13336_s16 = smov %s9339_s17  ;;  %s13337_s17 = smov %s9421_s24 }
 0x7ef   : > { %s13338_s18 = smov %s9410_s21  ;;  %16 = sbr.rel (!%p14_p3) target bundleno = 3 (0x3), region = 74 }
 0x7f6   :  { %7664 = vsyncpa [#allocation3], 1 }
 0x7f7   :  { %7666 = vsyncpa [#allocation3 + $0x1], 1 }

</bundles_post_ra>
